<compile_context>
chip_gen: v7x
topology: tpu7x:2x2x1
jax: 0.10.0
libtpu: 0.0.40
codegen_flags: <defaults>
</compile_context>

<pallas_src>
import jax
import jax.numpy as jnp
import numpy as np
from jax.experimental import pallas as pl
from jax.experimental.pallas import tpu as pltpu


# Per-input, per-grid-step VMEM budget (double-buffering headroom included
# implicitly by keeping this well under the scoped-VMEM default).
_VMEM_BUDGET_BYTES = 2 * 1024 * 1024


def _batch_tile(n, per_step_bytes_per_elem):
    """Largest divisor of n whose per-step footprint stays under budget."""
    bn = max(1, min(n, _VMEM_BUDGET_BYTES // max(1, per_step_bytes_per_elem)))
    while n % bn:
        bn -= 1
    return bn


# ----------------------------------------------------------------------------
# Fused kernel: 2x2/stride-2 max pool of one input + channel concat,
# writing a lane-dense flat output.
# ----------------------------------------------------------------------------
def _make_pool_concat_kernel(pool_flat, other_flat, pooled_first):
    """Build the fused kernel.

    Refs (per grid step = `bn` batch elements):
      xp_ref: (bn, Cp, H, W)                    -- input that gets pooled
      xo_ref: (bn, 1, other_flat)               -- other input, already flat
      o_ref : (bn, 1, pool_flat + other_flat)   -- flat concatenated output
    """

    def kernel(xp_ref, xo_ref, o_ref):
        x = xp_ref[...]                                   # (bn, Cp, H, W)
        bn, cp, h, w = x.shape
        ho, wo = h // 2, w // 2
        # Non-overlapping 2x2 window max.  At these block sizes the relayout
        # from splitting the lane dim is negligible and lowers cleanly.
        xw = x.reshape(bn, cp, ho, 2, wo, 2)
        y = jnp.max(jnp.max(xw, axis=5), axis=3)          # (bn, Cp, Ho, Wo)
        y_flat = y.reshape(bn, 1, pool_flat)              # channel-major slab

        if pooled_first:
            o_ref[:, :, :pool_flat] = y_flat
            o_ref[:, :, pool_flat:] = xo_ref[...]
        else:
            o_ref[:, :, :other_flat] = xo_ref[...]
            o_ref[:, :, other_flat:] = y_flat

    return kernel


def _fused_pool_concat(x_pool, x_other, pooled_first):
    """Pool `x_pool` (2x2/s2) and concat with `x_other` along channels.

    `pooled_first=True`  -> output channels = [pooled(x_pool), x_other]
    `pooled_first=False` -> output channels = [x_other, pooled(x_pool)]
    """
    N, Cp, H, W = x_pool.shape
    # PyTorch MaxPool2d(2,2) floors the output size: drop trailing row/col.
    H2, W2 = (H // 2) * 2, (W // 2) * 2
    if (H2, W2) != (H, W):
        x_pool = x_pool[:, :, :H2, :W2]
        H, W = H2, W2
    Ho, Wo = H // 2, W // 2

    No, Co, Hs, Ws = x_other.shape
    assert N == No and (Ho, Wo) == (Hs, Ws), \
        "batch/spatial dims must match after pooling (torch.cat would fail)"
    assert x_pool.dtype == x_other.dtype

    pool_flat = Cp * Ho * Wo
    other_flat = Co * Hs * Ws
    total = pool_flat + other_flat

    itemsize = jnp.dtype(x_pool.dtype).itemsize
    per_elem_bytes = (Cp * H * W + other_flat + total) * itemsize
    bn = _batch_tile(N, per_elem_bytes)

    # Free reshape: NCHW is row-major contiguous, so (N, 1, C*H*W) keeps the
    # channel-plane order needed for the concat slabs.
    x_other_flat = x_other.reshape(N, 1, other_flat)

    out_flat = pl.pallas_call(
        _make_pool_concat_kernel(pool_flat, other_flat, pooled_first),
        out_shape=jax.ShapeDtypeStruct((N, 1, total), x_pool.dtype),
        grid=(N // bn,),
        in_specs=[
            pl.BlockSpec((bn, Cp, H, W), lambda n: (n, 0, 0, 0)),
            pl.BlockSpec((bn, 1, other_flat), lambda n: (n, 0, 0)),
        ],
        out_specs=pl.BlockSpec((bn, 1, total), lambda n: (n, 0, 0)),
        compiler_params=pltpu.CompilerParams(
            dimension_semantics=("parallel",)),
    )(x_pool, x_other_flat)

    if pooled_first:
        return out_flat.reshape(N, Cp + Co, Ho, Wo)
    return out_flat.reshape(N, Co + Cp, Ho, Wo)


# ----------------------------------------------------------------------------
# Concat-only kernel (spatial sizes already match): two wide slab copies on a
# lane-dense flat layout.
# ----------------------------------------------------------------------------
def _concat_flat_kernel(a_ref, b_ref, o_ref):
    # a_ref: (bn, 1, F1)  b_ref: (bn, 1, F2)  o_ref: (bn, 1, F1+F2)
    f1 = a_ref.shape[-1]
    o_ref[:, :, :f1] = a_ref[...]
    o_ref[:, :, f1:] = b_ref[...]


def _concat_same(a, b):
    N, C1, H, W = a.shape
    N2, C2, H2, W2 = b.shape
    assert (N, H, W) == (N2, H2, W2), "batch/spatial dims must match for concat"
    assert a.dtype == b.dtype
    f1, f2 = C1 * H * W, C2 * H * W

    itemsize = jnp.dtype(a.dtype).itemsize
    per_elem_bytes = 2 * (f1 + f2) * itemsize
    bn = _batch_tile(N, per_elem_bytes)

    out_flat = pl.pallas_call(
        _concat_flat_kernel,
        out_shape=jax.ShapeDtypeStruct((N, 1, f1 + f2), a.dtype),
        grid=(N // bn,),
        in_specs=[
            pl.BlockSpec((bn, 1, f1), lambda n: (n, 0, 0)),
            pl.BlockSpec((bn, 1, f2), lambda n: (n, 0, 0)),
        ],
        out_specs=pl.BlockSpec((bn, 1, f1 + f2), lambda n: (n, 0, 0)),
        compiler_params=pltpu.CompilerParams(
            dimension_semantics=("parallel",)),
    )(a.reshape(N, 1, f1), b.reshape(N, 1, f2))
    return out_flat.reshape(N, C1 + C2, H, W)


# ----------------------------------------------------------------------------
# Module forward (trace-time shape logic stays in Python, like PyTorch does).
# NOTE: like the PyTorch module, only dim 2 (H) is compared to decide pooling.
# ----------------------------------------------------------------------------
def concat_forward(input1, input2):
    """Pallas equivalent of Concat.forward for NCHW inputs."""
    if input1.shape[2] != input2.shape[2]:
        if input1.shape[2] > input2.shape[2]:
            return _fused_pool_concat(input1, input2, pooled_first=True)
        return _fused_pool_concat(input2, input1, pooled_first=False)
    return _concat_same(input1, input2)


# ----------------------------------------------------------------------------
# Pure-JAX reference for verification.
# ----------------------------------------------------------------------------
def _ref_maxpool2x2(x):
    N, C, H, W = x.shape
    H2, W2 = (H // 2) * 2, (W // 2) * 2
    x = x[:, :, :H2, :W2]
    return jnp.max(x.reshape(N, C, H2 // 2, 2, W2 // 2, 2), axis=(3, 5))


def _ref_forward(x1, x2):
    if x1.shape[2] != x2.shape[2]:
        if x1.shape[2] > x2.shape[2]:
            x1 = _ref_maxpool2x2(x1)
        else:
            x2 = _ref_maxpool2x2(x2)
    return jnp.concatenate([x1, x2], axis=1)


if __name__ == "__main__":
    key = jax.random.PRNGKey(0)
    k1, k2, k3, k4, k5 = jax.random.split(key, 5)

    # Case 1: input1 larger -> input1 max-pooled, then concat (fused kernel).
    x1 = jax.random.normal(k1, (2, 4, 16, 16), dtype=jnp.float32)   # NCHW
    x2 = jax.random.normal(k2, (2, 3, 8, 8), dtype=jnp.float32)
    out = jax.block_until_ready(concat_forward(x1, x2))
    assert out.shape == (2, 7, 8, 8), out.shape
    np.testing.assert_allclose(np.asarray(out),
                               np.asarray(_ref_forward(x1, x2)),
                               rtol=1e-6, atol=1e-6)

    # Case 2: matching spatial sizes -> plain channel concat.
    x3 = jax.random.normal(k3, (2, 5, 16, 16), dtype=jnp.float32)
    out2 = jax.block_until_ready(concat_forward(x1, x3))
    assert out2.shape == (2, 9, 16, 16), out2.shape
    np.testing.assert_allclose(np.asarray(out2),
                               np.asarray(_ref_forward(x1, x3)),
                               rtol=1e-6, atol=1e-6)

    # Case 3: input2 larger -> input2 max-pooled, concat order preserved.
    x4 = jax.random.normal(k4, (2, 3, 8, 8), dtype=jnp.float32)
    x5 = jax.random.normal(k5, (2, 2, 16, 16), dtype=jnp.float32)
    out3 = jax.block_until_ready(concat_forward(x4, x5))
    assert out3.shape == (2, 5, 8, 8), out3.shape
    np.testing.assert_allclose(np.asarray(out3),
                               np.asarray(_ref_forward(x4, x5)),
                               rtol=1e-6, atol=1e-6)

    print("KERNEL_OK")
</pallas_src>

<mosaic_0001>
module attributes {stable_mosaic.version = 11 : i64} {
  func.func @kernel(%arg0: i32, %arg1: memref<2x4x16x16xf32, #tpu.memory_space<vmem>>, %arg2: memref<2x1x192xf32, #tpu.memory_space<vmem>>, %arg3: memref<2x1x448xf32, #tpu.memory_space<vmem>>) attributes {dimension_semantics = [#tpu.dimension_semantics<parallel>], iteration_bounds = array<i64: 1>, scalar_prefetch = 0 : i64, scratch_operands = 0 : i64, tpu.core_type = #tpu.core_type<tc>, window_params = [{transform_indices = @transform_0, window_bounds = array<i64: 2, 4, 16, 16>}, {transform_indices = @transform_1, window_bounds = array<i64: 2, 1, 192>}, {transform_indices = @transform_2, window_bounds = array<i64: 2, 1, 448>}]} {
    %c0 = arith.constant 0 : index
    %c0_0 = arith.constant 0 : index
    %c0_1 = arith.constant 0 : index
    %c0_2 = arith.constant 0 : index
    %0 = vector.load %arg1[%c0, %c0_0, %c0_1, %c0_2] : memref<2x4x16x16xf32, #tpu.memory_space<vmem>>, vector<2x4x16x16xf32>
    %1 = vector.shape_cast %0 : vector<2x4x16x16xf32> to vector<2x4x8x2x8x2xf32>
    %cst = arith.constant dense<0xFF800000> : vector<2x4x8x2x8xf32>
    %2 = vector.multi_reduction <maximumf>, %1, %cst [5] : vector<2x4x8x2x8x2xf32> to vector<2x4x8x2x8xf32>
    %cst_3 = arith.constant dense<0xFF800000> : vector<2x4x8x8xf32>
    %3 = vector.multi_reduction <maximumf>, %2, %cst_3 [3] : vector<2x4x8x2x8xf32> to vector<2x4x8x8xf32>
    %4 = vector.shape_cast %3 : vector<2x4x8x8xf32> to vector<2x1x256xf32>
    %c0_4 = arith.constant 0 : index
    %c0_5 = arith.constant 0 : index
    %c0_6 = arith.constant 0 : index
    %5 = vector.load %arg3[%c0_4, %c0_5, %c0_6] : memref<2x1x448xf32, #tpu.memory_space<vmem>>, vector<2x1x256xf32>
    tpu.vector_store %arg3[%c0_4, %c0_5, %c0_6], %4 {strides = array<i32>} : memref<2x1x448xf32, #tpu.memory_space<vmem>>, vector<2x1x256xf32>,
    %c0_7 = arith.constant 0 : index
    %c0_8 = arith.constant 0 : index
    %c0_9 = arith.constant 0 : index
    %6 = vector.load %arg2[%c0_7, %c0_8, %c0_9] : memref<2x1x192xf32, #tpu.memory_space<vmem>>, vector<2x1x192xf32>
    %c0_10 = arith.constant 0 : index
    %c0_11 = arith.constant 0 : index
    %c256 = arith.constant 256 : index
    %7 = vector.load %arg3[%c0_10, %c0_11, %c256] : memref<2x1x448xf32, #tpu.memory_space<vmem>>, vector<2x1x192xf32>
    tpu.vector_store %arg3[%c0_10, %c0_11, %c256], %6 {strides = array<i32>} : memref<2x1x448xf32, #tpu.memory_space<vmem>>, vector<2x1x192xf32>,
    return
  }
  func.func @transform_0(%arg0: i32) -> (i32, i32, i32, i32) {
    %c0_i32 = arith.constant 0 : i32
    %c0_i32_0 = arith.constant 0 : i32
    %c0_i32_1 = arith.constant 0 : i32
    %c0_i32_2 = arith.constant 0 : i32
    return %arg0, %c0_i32, %c0_i32_0, %c0_i32_1 : i32, i32, i32, i32
  }
  func.func @transform_1(%arg0: i32) -> (i32, i32, i32) {
    %c0_i32 = arith.constant 0 : i32
    %c0_i32_0 = arith.constant 0 : i32
    %c0_i32_1 = arith.constant 0 : i32
    return %arg0, %c0_i32, %c0_i32_0 : i32, i32, i32
  }
  func.func @transform_2(%arg0: i32) -> (i32, i32, i32) {
    %c0_i32 = arith.constant 0 : i32
    %c0_i32_0 = arith.constant 0 : i32
    %c0_i32_1 = arith.constant 0 : i32
    return %arg0, %c0_i32, %c0_i32_0 : i32, i32, i32
  }
}

</mosaic_0001>

<bundles_post_ra>
// kernel: tpu_custom_call.1
= control target key start
LH: loop header
LB: loop body
LE: loop exit
PB: predicated region body
PF: predicated region fallthrough
CT: control target
= control target key end

     0   :  { %7 = vsyncpa [#allocation3], 0  ;;  %s13333_s0 = inlined_call_operand.hbm [shape: f32[2,4,16,16], index: 0, kind: input, shape index: {}]   ;;  %s13334_s1 = inlined_call_operand.hbm [shape: f32[2,1,192], index: 1, kind: input, shape index: {}]   ;;  %s13335_s2 = inlined_call_operand.hbm [shape: f32[2,1,448], index: 2, kind: output, shape index: {}]  }
   0x1   :  { %8 = vsyncpa [#allocation6], 0 }
   0x2   :  { %9 = vsyncpa [#allocation4], 0  ;;  %s8977_s9 = smov [#allocation2]   ;;  %s8905_s13 = scalar_lea.hbm %s13333_s0, 2048 }
   0x3   :  { %s15_s10 = sshll.u32 %s8977_s9, 4  ;;  %p8906_p0 = scmp.ne.s32.totalorder %s13333_s0, %s8905_s13  ;;  %s16_s10 = int_to_ptr.vmem [resolvable:$true] %s15_s10 }
   0x4   :  { %p8909_p1 = scmp.lt.u32.totalorder %s8905_s13, %s13333_s0 }
   0x6   :  { %p8911_p2 = pnand %p8909_p1, %p8906_p0 }
   0x8   :  { %8914 = shalt.err (!%p8911_p2)
}
   0x9   :  { %s8915_s18 = scalar_lea.vmem %s16_s10, 2048  ;;  %p8920_p4 = scmp.lt.s32.totalorder %s16_s10, %s16_s10 }
   0xa   :  { %p8916_p3 = scmp.ne.s32.totalorder %s16_s10, %s8915_s18  ;;  %p8921_p5 = scmp.lt.s32.totalorder %s8915_s18, %s8915_s18 }
   0xc   :  { %p8922_p6 = por %p8921_p5, %p8920_p4 }
   0xe   :  { %p8923_p7 = pnand %p8922_p6, %p8916_p3 }
  0x10   :  { %8926 = shalt.err (!%p8923_p7)
}
  0x11   :  { %s8978_s19 = smov 128   ;;  %s8979_s20 = smov 8  }
  0x12   :  { %21 = dma.hbm_to_vmem [thread:$0]  %s13333_s0, 2048, %s16_s10, [#allocation3], %s8978_s19, %s8978_s19, %s8979_s20  }
  0x13   :  { %s8980_s23 = smov [#allocation5]   ;;  %s8927_s27 = scalar_lea.hbm %s13334_s1, 64 }
  0x14   :  { %s27_s24 = sshll.u32 %s8980_s23, 4  ;;  %p8928_p8 = scmp.ne.s32.totalorder %s13334_s1, %s8927_s27  ;;  %s28_s24 = int_to_ptr.vmem [resolvable:$true] %s27_s24 }
  0x15   :  { %p8931_p9 = scmp.lt.u32.totalorder %s8927_s27, %s13334_s1 }
  0x17   :  { %p8933_p10 = pnand %p8931_p9, %p8928_p8 }
  0x19   :  { %8936 = shalt.err (!%p8933_p10)
}
  0x1a   :  { %s8937_s4 = scalar_lea.vmem %s28_s24, 64  ;;  %p8942_p12 = scmp.lt.s32.totalorder %s28_s24, %s28_s24 }
  0x1b   :  { %p8938_p11 = scmp.ne.s32.totalorder %s28_s24, %s8937_s4  ;;  %p8943_p13 = scmp.lt.s32.totalorder %s8937_s4, %s8937_s4 }
  0x1d   :  { %p8944_p0 = por %p8943_p13, %p8942_p12 }
  0x1f   :  { %p8945_p1 = pnand %p8944_p0, %p8938_p11 }
  0x21   :  { %8948 = shalt.err (!%p8945_p1)
}
  0x22   :  { %s8981_s0 = smov 32   ;;  %s8982_s5 = smov 2  }
  0x23   :  { %33 = dma.hbm_to_vmem [thread:$0]  %s13334_s1, 64, %s28_s24, [#allocation6], %s8981_s0, %s8981_s0, %s8982_s5  }
  0x24   :  { %8971 = dma.done.wait [#allocation3], 2048  }
  0x25   :  { %8972 = vsyncadd [#allocation3], 4294965248 }
  0x26   :  { %8973 = dma.done.wait [#allocation6], 64  }
  0x27   :  { %8974 = vsyncadd [#allocation6], 4294967232  ;;  %v9036_v0 = vld [vmem:[#allocation2 + $0x10] sm:$0xff]  ;;  %v9038_v1 = vld [vmem:[#allocation2] sm:$0xff]  ;;  %s8983_s8 = smov 126   ;;  %s8984_s1 = smov 124  }
  0x28   :  { %76 = vrot.lane.b32.xlu1 %v9036_v0, %s8983_s8  ;;  %72 = vrot.lane.b32.xlu0 %v9038_v1, %s8983_s8  ;;  %v9042_v2 = vld [vmem:[#allocation2 + $0x18] sm:$0xff]  ;;  %v9044_v3 = vld [vmem:[#allocation2 + $0x8] sm:$0xff]  ;;  %v9050_v5 = vld [vmem:[#allocation2 + $0x20] sm:$0xff]  ;;  %s8985_s9 = smov 122   ;;  %s8986_s10 = smov 120   ;;  %vm2584_vm0 = vcmask 15360  }
  0x29   :  { %v9048_v4 = vld [vmem:[#allocation2 + $0x28] sm:$0xff]  ;;  %v9054_v6 = vld [vmem:[#allocation2 + $0x38] sm:$0xff]  ;;  %v9056_v7 = vld [vmem:[#allocation2 + $0x30] sm:$0xff]  ;;  %s8987_s11 = smov 118   ;;  %s8988_s12 = smov 116   ;;  %vm8484_vm1 = vcmask 130112  }
  0x2a   :  { %v9060_v8 = vld [vmem:[#allocation2 + $0x48] sm:$0xff]  ;;  %v9062_v9 = vld [vmem:[#allocation2 + $0x40] sm:$0xff]  ;;  %v9066_v10 = vld [vmem:[#allocation2 + $0x58] sm:$0xff]  ;;  %s8989_s13 = smov 114   ;;  %vm8491_vm2 = vcmask 195712   ;;  %vm8498_vm3 = vcmask 261312  }
  0x2b   :  { %v9068_v11 = vld [vmem:[#allocation2 + $0x50] sm:$0xff]  ;;  %v9072_v12 = vld [vmem:[#allocation2 + $0x68] sm:$0xff]  ;;  %v9074_v13 = vld [vmem:[#allocation2 + $0x60] sm:$0xff]  ;;  %vm8505_vm4 = vcmask 326912   ;;  %vm8512_vm5 = vcmask 392512   ;;  %vm8519_vm6 = vcmask 458112  }
  0x2c   :  { %78 = vrot.lane.b32.xlu1 %v9042_v2, %s8983_s8  ;;  %74 = vrot.lane.b32.xlu0 %v9044_v3, %s8983_s8  ;;  %v9078_v14 = vld [vmem:[#allocation2 + $0x78] sm:$0xff]  ;;  %v9080_v15 = vld [vmem:[#allocation2 + $0x70] sm:$0xff]  ;;  %vm8526_vm7 = vcmask 523712   ;;  %vm8533_vm8 = vcmask 589312   ;;  %vm8540_vm9 = vcmask 654912   ;;  %vm8547_vm10 = vcmask 720512  }
  0x2d   :  { %vm8554_vm11 = vcmask 786112   ;;  %vm8561_vm12 = vcmask 851712   ;;  %vm8568_vm13 = vcmask 917312   ;;  %vm8575_vm14 = vcmask 982912   ;;  %s8994_s14 = smov [#allocation7]  }
  0x2e   :  { %vm8582_vm15 = vcmask 1048512   ;;  %s8870_s15 = sshll.u32 %s8994_s14, 4  ;;  %s8871_s15 = int_to_ptr.vmem [resolvable:$true] %s8870_s15 }
  0x2f   :  { %s8949_s16 = scalar_lea.vmem %s8871_s15, 128  ;;  %p8954_p3 = scmp.lt.s32.totalorder %s8871_s15, %s8871_s15 }
  0x30   :  { %82 = vrot.lane.b32.xlu1 %v9048_v4, %s8983_s8  ;;  %80 = vrot.lane.b32.xlu0 %v9050_v5, %s8983_s8  ;;  %p8950_p2 = scmp.ne.s32.totalorder %s8871_s15, %s8949_s16  ;;  %p8955_p4 = scmp.lt.s32.totalorder %s8949_s16, %s8949_s16 }
  0x32   :  { %p8956_p5 = por %p8955_p4, %p8954_p3 }
  0x34   :  { %86 = vrot.lane.b32.xlu1 %v9054_v6, %s8983_s8  ;;  %84 = vrot.lane.b32.xlu0 %v9056_v7, %s8983_s8  ;;  %p8957_p6 = pnand %p8956_p5, %p8950_p2 }
  0x38   :  { %90 = vrot.lane.b32.xlu1 %v9060_v8, %s8983_s8  ;;  %88 = vrot.lane.b32.xlu0 %v9062_v9, %s8983_s8 }
  0x3c   :  { %94 = vrot.lane.b32.xlu1 %v9066_v10, %s8983_s8  ;;  %92 = vrot.lane.b32.xlu0 %v9068_v11, %s8983_s8 }
  0x40   :  { %98 = vrot.lane.b32.xlu1 %v9072_v12, %s8983_s8  ;;  %96 = vrot.lane.b32.xlu0 %v9074_v13, %s8983_s8 }
  0x44   :  { %102 = vrot.lane.b32.xlu1 %v9078_v14, %s8983_s8  ;;  %100 = vrot.lane.b32.xlu0 %v9080_v15, %s8983_s8 }
  0x48   :  { %122 = vrot.lane.b32.xlu1 %v9044_v3, %s8984_s1  ;;  %120 = vrot.lane.b32.xlu0 %v9038_v1, %s8984_s1 }
  0x4c   :  { %126 = vrot.lane.b32.xlu1 %v9042_v2, %s8984_s1  ;;  %124 = vrot.lane.b32.xlu0 %v9036_v0, %s8984_s1 }
  0x50   :  { %130 = vrot.lane.b32.xlu1 %v9048_v4, %s8984_s1  ;;  %128 = vrot.lane.b32.xlu0 %v9050_v5, %s8984_s1 }
  0x54   :  { %134 = vrot.lane.b32.xlu1 %v9054_v6, %s8984_s1  ;;  %132 = vrot.lane.b32.xlu0 %v9056_v7, %s8984_s1 }
  0x58   :  { %138 = vrot.lane.b32.xlu1 %v9060_v8, %s8984_s1  ;;  %136 = vrot.lane.b32.xlu0 %v9062_v9, %s8984_s1 }
  0x5c   :  { %142 = vrot.lane.b32.xlu1 %v9066_v10, %s8984_s1  ;;  %140 = vrot.lane.b32.xlu0 %v9068_v11, %s8984_s1 }
  0x60   :  { %146 = vrot.lane.b32.xlu1 %v9072_v12, %s8984_s1  ;;  %144 = vrot.lane.b32.xlu0 %v9074_v13, %s8984_s1 }
  0x64   :  { %150 = vrot.lane.b32.xlu1 %v9078_v14, %s8984_s1  ;;  %148 = vrot.lane.b32.xlu0 %v9080_v15, %s8984_s1 }
  0x68   :  { %170 = vrot.lane.b32.xlu1 %v9044_v3, %s8985_s9  ;;  %168 = vrot.lane.b32.xlu0 %v9038_v1, %s8985_s9 }
  0x6c   :  { %174 = vrot.lane.b32.xlu1 %v9042_v2, %s8985_s9  ;;  %172 = vrot.lane.b32.xlu0 %v9036_v0, %s8985_s9 }
  0x70   :  { %178 = vrot.lane.b32.xlu1 %v9048_v4, %s8985_s9  ;;  %176 = vrot.lane.b32.xlu0 %v9050_v5, %s8985_s9 }
  0x74   :  { %182 = vrot.lane.b32.xlu1 %v9054_v6, %s8985_s9  ;;  %180 = vrot.lane.b32.xlu0 %v9056_v7, %s8985_s9 }
  0x78   :  { %186 = vrot.lane.b32.xlu1 %v9060_v8, %s8985_s9  ;;  %184 = vrot.lane.b32.xlu0 %v9062_v9, %s8985_s9 }
  0x7c   :  { %190 = vrot.lane.b32.xlu1 %v9066_v10, %s8985_s9  ;;  %188 = vrot.lane.b32.xlu0 %v9068_v11, %s8985_s9 }
  0x80   :  { %194 = vrot.lane.b32.xlu1 %v9072_v12, %s8985_s9  ;;  %192 = vrot.lane.b32.xlu0 %v9074_v13, %s8985_s9 }
  0x84   :  { %198 = vrot.lane.b32.xlu1 %v9078_v14, %s8985_s9  ;;  %196 = vrot.lane.b32.xlu0 %v9080_v15, %s8985_s9 }
  0x88   :  { %218 = vrot.lane.b32.xlu1 %v9044_v3, %s8986_s10  ;;  %216 = vrot.lane.b32.xlu0 %v9038_v1, %s8986_s10 }
  0x8c   :  { %222 = vrot.lane.b32.xlu1 %v9042_v2, %s8986_s10  ;;  %220 = vrot.lane.b32.xlu0 %v9036_v0, %s8986_s10 }
  0x90   :  { %226 = vrot.lane.b32.xlu1 %v9048_v4, %s8986_s10  ;;  %224 = vrot.lane.b32.xlu0 %v9050_v5, %s8986_s10 }
  0x94   :  { %230 = vrot.lane.b32.xlu1 %v9054_v6, %s8986_s10  ;;  %228 = vrot.lane.b32.xlu0 %v9056_v7, %s8986_s10 }
  0x98   :  { %234 = vrot.lane.b32.xlu1 %v9060_v8, %s8986_s10  ;;  %232 = vrot.lane.b32.xlu0 %v9062_v9, %s8986_s10 }
  0x9a   :  { %v9126_v16 = vpop.permute.xlu1 %76  ;;  %v9128_v17 = vpop.permute.xlu0 %72 }
  0x9c   :  { %238 = vrot.lane.b32.xlu1 %v9066_v10, %s8986_s10  ;;  %236 = vrot.lane.b32.xlu0 %v9068_v11, %s8986_s10 }
  0x9e   :  { %v9132_v18 = vpop.permute.xlu1 %78  ;;  %v9134_v19 = vpop.permute.xlu0 %74 }
  0xa0   :  { %242 = vrot.lane.b32.xlu1 %v9072_v12, %s8986_s10  ;;  %240 = vrot.lane.b32.xlu0 %v9074_v13, %s8986_s10 }
  0xa2   :  { %v9138_v20 = vpop.permute.xlu1 %82  ;;  %v9140_v21 = vpop.permute.xlu0 %80 }
  0xa4   :  { %246 = vrot.lane.b32.xlu1 %v9078_v14, %s8986_s10  ;;  %244 = vrot.lane.b32.xlu0 %v9080_v15, %s8986_s10 }
  0xa6   :  { %v9144_v22 = vpop.permute.xlu1 %86  ;;  %v9146_v23 = vpop.permute.xlu0 %84 }
  0xa8   :  { %266 = vrot.lane.b32.xlu1 %v9044_v3, %s8987_s11  ;;  %264 = vrot.lane.b32.xlu0 %v9038_v1, %s8987_s11 }
  0xaa   :  { %v9150_v24 = vpop.permute.xlu1 %90  ;;  %v9152_v25 = vpop.permute.xlu0 %88 }
  0xab   :  { %13479 = vst [vmem:[#allocation11_spill] sm:$0xff] %v9150_v24  ;;  %13480 = vst [vmem:[#allocation12_spill] sm:$0xff] %v9152_v25 }
  0xac   :  { %270 = vrot.lane.b32.xlu1 %v9042_v2, %s8987_s11  ;;  %268 = vrot.lane.b32.xlu0 %v9036_v0, %s8987_s11 }
  0xae   :  { %v9156_v26 = vpop.permute.xlu1 %94  ;;  %v9158_v27 = vpop.permute.xlu0 %92 }
  0xaf   :  { %13481 = vst [vmem:[#allocation13_spill] sm:$0xff] %v9156_v26  ;;  %13482 = vst [vmem:[#allocation14_spill] sm:$0xff] %v9158_v27 }
  0xb0   :  { %274 = vrot.lane.b32.xlu1 %v9048_v4, %s8987_s11  ;;  %272 = vrot.lane.b32.xlu0 %v9050_v5, %s8987_s11 }
  0xb2   :  { %v9162_v28 = vpop.permute.xlu1 %98  ;;  %v9164_v29 = vpop.permute.xlu0 %96 }
  0xb3   :  { %13483 = vst [vmem:[#allocation15_spill] sm:$0xff] %v9162_v28  ;;  %13484 = vst [vmem:[#allocation16_spill] sm:$0xff] %v9164_v29 }
  0xb4   :  { %278 = vrot.lane.b32.xlu1 %v9054_v6, %s8987_s11  ;;  %276 = vrot.lane.b32.xlu0 %v9056_v7, %s8987_s11 }
  0xb6   :  { %v9168_v30 = vpop.permute.xlu1 %102  ;;  %v9170_v31 = vpop.permute.xlu0 %100 }
  0xb7   :  { %13485 = vst [vmem:[#allocation17_spill] sm:$0xff] %v9168_v30  ;;  %13486 = vst [vmem:[#allocation18_spill] sm:$0xff] %v9170_v31 }
  0xb8   :  { %282 = vrot.lane.b32.xlu1 %v9060_v8, %s8987_s11  ;;  %280 = vrot.lane.b32.xlu0 %v9062_v9, %s8987_s11 }
  0xba   :  { %v9174_v32 = vpop.permute.xlu1 %122  ;;  %v9176_v33 = vpop.permute.xlu0 %120 }
  0xbc   :  { %286 = vrot.lane.b32.xlu1 %v9066_v10, %s8987_s11  ;;  %284 = vrot.lane.b32.xlu0 %v9068_v11, %s8987_s11 }
  0xbe   :  { %v9180_v34 = vpop.permute.xlu1 %126  ;;  %v9182_v35 = vpop.permute.xlu0 %124 }
  0xc0   :  { %290 = vrot.lane.b32.xlu1 %v9072_v12, %s8987_s11  ;;  %288 = vrot.lane.b32.xlu0 %v9074_v13, %s8987_s11 }
  0xc2   :  { %v9186_v36 = vpop.permute.xlu1 %130  ;;  %v9188_v37 = vpop.permute.xlu0 %128 }
  0xc4   :  { %294 = vrot.lane.b32.xlu1 %v9078_v14, %s8987_s11  ;;  %292 = vrot.lane.b32.xlu0 %v9080_v15, %s8987_s11 }
  0xc6   :  { %v9192_v38 = vpop.permute.xlu1 %134  ;;  %v9194_v39 = vpop.permute.xlu0 %132 }
  0xc8   :  { %314 = vrot.lane.b32.xlu1 %v9044_v3, %s8988_s12  ;;  %312 = vrot.lane.b32.xlu0 %v9038_v1, %s8988_s12 }
  0xca   :  { %v9198_v40 = vpop.permute.xlu1 %138  ;;  %v9200_v41 = vpop.permute.xlu0 %136 }
  0xcc   :  { %318 = vrot.lane.b32.xlu1 %v9042_v2, %s8988_s12  ;;  %316 = vrot.lane.b32.xlu0 %v9036_v0, %s8988_s12 }
  0xce   :  { %v9204_v42 = vpop.permute.xlu1 %142  ;;  %v9206_v43 = vpop.permute.xlu0 %140 }
  0xd0   :  { %322 = vrot.lane.b32.xlu1 %v9048_v4, %s8988_s12  ;;  %320 = vrot.lane.b32.xlu0 %v9050_v5, %s8988_s12 }
  0xd2   :  { %v9210_v44 = vpop.permute.xlu1 %146  ;;  %v9212_v45 = vpop.permute.xlu0 %144 }
  0xd4   :  { %326 = vrot.lane.b32.xlu1 %v9054_v6, %s8988_s12  ;;  %324 = vrot.lane.b32.xlu0 %v9056_v7, %s8988_s12 }
  0xd6   :  { %v9216_v46 = vpop.permute.xlu1 %150  ;;  %v9218_v47 = vpop.permute.xlu0 %148 }
  0xd8   :  { %330 = vrot.lane.b32.xlu1 %v9060_v8, %s8988_s12  ;;  %328 = vrot.lane.b32.xlu0 %v9062_v9, %s8988_s12 }
  0xda   :  { %v9222_v48 = vpop.permute.xlu1 %170  ;;  %v9224_v49 = vpop.permute.xlu0 %168 }
  0xdc   :  { %334 = vrot.lane.b32.xlu1 %v9066_v10, %s8988_s12  ;;  %332 = vrot.lane.b32.xlu0 %v9068_v11, %s8988_s12 }
  0xde   :  { %v9228_v50 = vpop.permute.xlu1 %174  ;;  %v9230_v51 = vpop.permute.xlu0 %172 }
  0xe0   :  { %338 = vrot.lane.b32.xlu1 %v9072_v12, %s8988_s12  ;;  %336 = vrot.lane.b32.xlu0 %v9074_v13, %s8988_s12 }
  0xe2   :  { %v9234_v52 = vpop.permute.xlu1 %178  ;;  %v9236_v53 = vpop.permute.xlu0 %176 }
  0xe4   :  { %342 = vrot.lane.b32.xlu1 %v9078_v14, %s8988_s12  ;;  %340 = vrot.lane.b32.xlu0 %v9080_v15, %s8988_s12 }
  0xe6   :  { %v9240_v54 = vpop.permute.xlu1 %182  ;;  %v9242_v55 = vpop.permute.xlu0 %180 }
  0xe8   :  { %362 = vrot.lane.b32.xlu1 %v9044_v3, %s8989_s13  ;;  %360 = vrot.lane.b32.xlu0 %v9038_v1, %s8989_s13 }
  0xea   :  { %v9246_v56 = vpop.permute.xlu1 %186  ;;  %v9248_v57 = vpop.permute.xlu0 %184 }
  0xeb   :  { %13487 = vst [vmem:[#allocation19_spill] sm:$0xff] %v9246_v56  ;;  %13488 = vst [vmem:[#allocation20_spill] sm:$0xff] %v9248_v57  ;;  %v13382_v57 = vlaneseq }
  0xec   :  { %366 = vrot.lane.b32.xlu1 %v9042_v2, %s8989_s13  ;;  %364 = vrot.lane.b32.xlu0 %v9036_v0, %s8989_s13 }
  0xee   :  { %v9252_v58 = vpop.permute.xlu1 %190  ;;  %v9254_v59 = vpop.permute.xlu0 %188 }
  0xef   :  { %13489 = vst [vmem:[#allocation21_spill] sm:$0xff] %v9252_v58  ;;  %13490 = vst [vmem:[#allocation22_spill] sm:$0xff] %v9254_v59 }
  0xf0   :  { %370 = vrot.lane.b32.xlu1 %v9048_v4, %s8989_s13  ;;  %368 = vrot.lane.b32.xlu0 %v9050_v5, %s8989_s13 }
  0xf2   :  { %v9258_v60 = vpop.permute.xlu1 %194  ;;  %v9260_v61 = vpop.permute.xlu0 %192 }
  0xf3   :  { %13491 = vst [vmem:[#allocation23_spill] sm:$0xff] %v9258_v60  ;;  %13492 = vst [vmem:[#allocation24_spill] sm:$0xff] %v9260_v61 }
  0xf4   :  { %374 = vrot.lane.b32.xlu1 %v9054_v6, %s8989_s13  ;;  %372 = vrot.lane.b32.xlu0 %v9056_v7, %s8989_s13 }
  0xf6   :  { %v9264_v62 = vpop.permute.xlu1 %198  ;;  %v9266_v63 = vpop.permute.xlu0 %196 }
  0xf7   :  { %13493 = vst [vmem:[#allocation25_spill] sm:$0xff] %v9264_v62  ;;  %13494 = vst [vmem:[#allocation26_spill] sm:$0xff] %v9266_v63 }
  0xf8   :  { %378 = vrot.lane.b32.xlu1 %v9060_v8, %s8989_s13  ;;  %376 = vrot.lane.b32.xlu0 %v9062_v9, %s8989_s13 }
  0xfa   :  { %v9270_v31 = vpop.permute.xlu1 %218  ;;  %v9272_v30 = vpop.permute.xlu0 %216 }
  0xfb   :  { %13495 = vst [vmem:[#allocation27_spill] sm:$0xff] %v9270_v31 }
  0xfc   :  { %382 = vrot.lane.b32.xlu1 %v9066_v10, %s8989_s13  ;;  %380 = vrot.lane.b32.xlu0 %v9068_v11, %s8989_s13 }
  0xfe   :  { %v9276_v29 = vpop.permute.xlu1 %222  ;;  %v9278_v61 = vpop.permute.xlu0 %220 }
  0xff   :  { %13496 = vst [vmem:[#allocation28_spill] sm:$0xff] %v9276_v29  ;;  %13497 = vst [vmem:[#allocation29_spill] sm:$0xff] %v9278_v61 }
 0x100   :  { %386 = vrot.lane.b32.xlu1 %v9072_v12, %s8989_s13  ;;  %384 = vrot.lane.b32.xlu0 %v9074_v13, %s8989_s13 }
 0x102   :  { %v9282_v63 = vpop.permute.xlu1 %226  ;;  %v9284_v62 = vpop.permute.xlu0 %224 }
 0x103   :  { %13498 = vst [vmem:[#allocation30_spill] sm:$0xff] %v9282_v63  ;;  %13499 = vst [vmem:[#allocation31_spill] sm:$0xff] %v9284_v62 }
 0x104   :  { %390 = vrot.lane.b32.xlu1 %v9078_v14, %s8989_s13  ;;  %388 = vrot.lane.b32.xlu0 %v9080_v15, %s8989_s13 }
 0x106   :  { %v9288_v31 = vpop.permute.xlu1 %230  ;;  %v9290_v28 = vpop.permute.xlu0 %228 }
 0x107   :  { %13500 = vst [vmem:[#allocation32_spill] sm:$0xff] %v9288_v31  ;;  %13501 = vst [vmem:[#allocation33_spill] sm:$0xff] %v9290_v28 }
 0x10a   :  { %v9292_v60 = vpop.permute.xlu1 %234  ;;  %v9294_v29 = vpop.permute.xlu0 %232 }
 0x10b   :  { %13502 = vst [vmem:[#allocation34_spill] sm:$0xff] %v9292_v60  ;;  %13503 = vst [vmem:[#allocation35_spill] sm:$0xff] %v9294_v29 }
 0x10e   :  { %v9296_v61 = vpop.permute.xlu1 %238  ;;  %v9298_v27 = vpop.permute.xlu0 %236 }
 0x10f   :  { %13504 = vst [vmem:[#allocation36_spill] sm:$0xff] %v9296_v61  ;;  %13505 = vst [vmem:[#allocation37_spill] sm:$0xff] %v9298_v27 }
 0x112   :  { %v9300_v59 = vpop.permute.xlu1 %242  ;;  %v9302_v63 = vpop.permute.xlu0 %240 }
 0x113   :  { %13506 = vst [vmem:[#allocation38_spill] sm:$0xff] %v9300_v59  ;;  %13507 = vst [vmem:[#allocation39_spill] sm:$0xff] %v9302_v63 }
 0x116   :  { %v9304_v62 = vpop.permute.xlu1 %246  ;;  %v9306_v26 = vpop.permute.xlu0 %244 }
 0x117   :  { %13508 = vst [vmem:[#allocation40_spill] sm:$0xff] %v9304_v62  ;;  %13509 = vst [vmem:[#allocation41_spill] sm:$0xff] %v9306_v26 }
 0x11a   :  { %v9308_v58 = vpop.permute.xlu1 %266  ;;  %v9310_v31 = vpop.permute.xlu0 %264 }
 0x11b   :  { %13510 = vst [vmem:[#allocation42_spill] sm:$0xff] %v9308_v58 }
 0x11e   :  { %v9312_v28 = vpop.permute.xlu1 %270  ;;  %v9314_v60 = vpop.permute.xlu0 %268 }
 0x11f   :  { %13511 = vst [vmem:[#allocation43_spill] sm:$0xff] %v9312_v28  ;;  %13512 = vst [vmem:[#allocation44_spill] sm:$0xff] %v9314_v60 }
 0x122   :  { %v9316_v29 = vpop.permute.xlu1 %274  ;;  %v9318_v61 = vpop.permute.xlu0 %272 }
 0x123   :  { %13513 = vst [vmem:[#allocation45_spill] sm:$0xff] %v9316_v29  ;;  %13514 = vst [vmem:[#allocation46_spill] sm:$0xff] %v9318_v61  ;;  %v8990_v61 = vmov 1983009808  }
 0x126   :  { %v9320_v27 = vpop.permute.xlu1 %278  ;;  %v9322_v59 = vpop.permute.xlu0 %276 }
 0x127   :  { %13515 = vst [vmem:[#allocation47_spill] sm:$0xff] %v9320_v27  ;;  %13516 = vst [vmem:[#allocation48_spill] sm:$0xff] %v9322_v59  ;;  %v411_v27 = vunpack.c.l.s4 %v8990_v61 }
 0x12a   :  { %v9324_v63 = vpop.permute.xlu1 %282  ;;  %v9326_v62 = vpop.permute.xlu0 %280 }
 0x12b   :  { %13517 = vst [vmem:[#allocation49_spill] sm:$0xff] %v9324_v63  ;;  %13518 = vst [vmem:[#allocation50_spill] sm:$0xff] %v9326_v62  ;;  %v8991_v62 = vmov 1934713408  }
 0x12c   :  { %v475_v24 = vunpack.c.l.s4 %v8991_v62 }
 0x12e   :  { %v9328_v26 = vpop.permute.xlu1 %286  ;;  %v9330_v58 = vpop.permute.xlu0 %284  ;;  %v476_v61 = vunpack.c.0.s8 %v475_v24 }
 0x12f   :  { %13519 = vst [vmem:[#allocation51_spill] sm:$0xff] %v9328_v26  ;;  %13520 = vst [vmem:[#allocation52_spill] sm:$0xff] %v9330_v58  ;;  %v412_v26 = vunpack.c.0.s8 %v411_v27  ;;  %v9345_v58 = vshrl.u32 %v13382_v57, 7  ;;  %v409_v27 = vcombine.high %v9038_v1, %v9176_v33  ;;  %v1088_v57 = vcombine.low %v9042_v2, %v9180_v34 }
 0x131   :  { %13526 = vst [vmem:[#allocation58_spill] sm:$0xff] %v9345_v58 }
 0x132   :  { %v9332_v25 = vpop.permute.xlu1 %290  ;;  %v9334_v28 = vpop.permute.xlu0 %288 }
 0x133   :  { %13521 = vst [vmem:[#allocation53_spill] sm:$0xff] %v9332_v25  ;;  %13522 = vst [vmem:[#allocation54_spill] sm:$0xff] %v9334_v28  ;;  %v9354_v28 = vsub.s32 %v412_v26, %v9345_v58  ;;  %v952_v26 = vcombine.low %v9036_v0, %v9182_v35 }
 0x136   :  { %v9336_v60 = vpop.permute.xlu1 %294  ;;  %v9338_v29 = vpop.permute.xlu0 %292 }
 0x137   :  { %13523 = vst [vmem:[#allocation55_spill] sm:$0xff] %v9336_v60  ;;  %13524 = vst [vmem:[#allocation56_spill] sm:$0xff] %v9338_v29  ;;  %v544_v60 = vcombine.low %v9044_v3, %v9174_v32  ;;  %v545_v29 = vcombine.high %v9044_v3, %v9174_v32  ;;  %v9377_v32 = vsub.s32 %v476_v61, %v9345_v58 }
 0x138   :  { %v1496_v61 = vcombine.low %v9050_v5, %v9188_v37  ;;  %v9412_v58 = vrot.slane %v952_v26, %v9354_v28  ;;  %v680_v26 = vcombine.low %v9062_v9, %v9200_v41 }
 0x139   :  { %v9369_v3 = vrot.slane %v544_v60, %v9354_v28  ;;  %v9372_v24 = vrot.slane %v545_v29, %v9354_v28  ;;  %v9389_v29 = vrot.slane %v409_v27, %v9354_v28  ;;  %v9392_v60 = vrot.slane %v1088_v57, %v9354_v28 }
 0x13a   :  { %v9340_v59 = vpop.permute.xlu1 %314  ;;  %v9342_v63 = vpop.permute.xlu0 %312 }
 0x13b   :  { %13525 = vst [vmem:[#allocation57_spill] sm:$0xff] %v9340_v59  ;;  %v408_v59 = vcombine.low %v9038_v1, %v9176_v33  ;;  %v1632_v33 = vcombine.low %v9048_v4, %v9186_v36 }
 0x13d   :  { %v9380_v1 = vrot.slane %v408_v59, %v9354_v28  ;;  %v1497_v59 = vcombine.high %v9050_v5, %v9188_v37  ;;  %v2041_v5 = vcombine.high %v9056_v7, %v9194_v39  ;;  %v817_v37 = vcombine.high %v9060_v8, %v9198_v40 }
 0x13e   :  { %v9347_v25 = vpop.permute.xlu0 %316  ;;  %v9358_v62 = vpop.permute.xlu1 %318 }
 0x13f   :  { %13527 = vst [vmem:[#allocation59_spill] sm:$0xff] %v9347_v25  ;;  %13528 = vst [vmem:[#allocation60_spill] sm:$0xff] %v9358_v62  ;;  %v1089_v25 = vcombine.high %v9042_v2, %v9180_v34  ;;  %v953_v2 = vcombine.high %v9036_v0, %v9182_v35  ;;  %v1633_v34 = vcombine.high %v9048_v4, %v9186_v36 }
 0x140   :  { %v2176_v35 = vcombine.low %v9054_v6, %v9192_v38  ;;  %v2177_v4 = vcombine.high %v9054_v6, %v9192_v38  ;;  %v2040_v36 = vcombine.low %v9056_v7, %v9194_v39  ;;  %v9424_v38 = vrot.slane %v1632_v33, %v9354_v28 }
 0x141   :  { %v9399_v0 = vrot.slane %v1089_v25, %v9354_v28  ;;  %v816_v25 = vcombine.low %v9060_v8, %v9198_v40  ;;  %v9421_v6 = vrot.slane %v953_v2, %v9354_v28  ;;  %v9432_v7 = vrot.slane %v1496_v61, %v9354_v28 }
 0x142   :  { %v9366_v56 = vpop.permute.xlu0 %320  ;;  %v9407_v57 = vpop.permute.xlu1 %322  ;;  %v9435_v39 = vrot.slane %v1497_v59, %v9354_v28  ;;  %v681_v8 = vcombine.high %v9062_v9, %v9200_v41  ;;  %v1360_v40 = vcombine.low %v9066_v10, %v9204_v42  ;;  %v9442_v2 = vrot.slane %v2176_v35, %v9354_v28 }
 0x143   :  { %13529 = vst [vmem:[#allocation61_spill] sm:$0xff] %v9366_v56  ;;  %13530 = vst [vmem:[#allocation62_spill] sm:$0xff] %v9407_v57  ;;  %v9445_v33 = vrot.slane %v2177_v4, %v9354_v28  ;;  %v1361_v61 = vcombine.high %v9066_v10, %v9204_v42  ;;  %v9455_v56 = vrot.slane %v2041_v5, %v9354_v28 }
 0x144   :  { %13533 = vst [vmem:[#allocation65_spill] sm:$0xff] %v9442_v2  ;;  %v9458_v9 = vrot.slane %v816_v25, %v9354_v28  ;;  %v9461_v41 = vrot.slane %v817_v37, %v9354_v28  ;;  %v1224_v35 = vcombine.low %v9068_v11, %v9206_v43  ;;  %v9466_v4 = vrot.slane %v680_v26, %v9354_v28 }
 0x145   :  { %13534 = vst [vmem:[#allocation66_spill] sm:$0xff] %v9445_v33  ;;  %v1225_v10 = vcombine.high %v9068_v11, %v9206_v43  ;;  %v424_v42 = vcombine.low %v9128_v17, %v9224_v49  ;;  %v9477_v25 = vrot.slane %v681_v8, %v9354_v28  ;;  %v9480_v37 = vrot.slane %v1360_v40, %v9354_v28 }
 0x146   :  { %v9409_v27 = vpop.permute.xlu0 %324  ;;  %13536 = vst [vmem:[#allocation68_spill] sm:$0xff] %v9458_v9  ;;  %13537 = vst [vmem:[#allocation69_spill] sm:$0xff] %v9461_v41  ;;  %v9474_v5 = vpop.permute.xlu1 %326  ;;  %v1904_v26 = vcombine.low %v9072_v12, %v9210_v44  ;;  %v1905_v11 = vcombine.high %v9072_v12, %v9210_v44  ;;  %v9487_v43 = vrot.slane %v1361_v61, %v9354_v28 }
 0x147   :  { %13531 = vst [vmem:[#allocation63_spill] sm:$0xff] %v9409_v27  ;;  %v9427_v27 = vrot.slane %v1633_v34, %v9354_v28  ;;  %v9448_v34 = vrot.slane %v2040_v36, %v9354_v28  ;;  %13538 = vst [vmem:[#allocation70_spill] sm:$0xff] %v9466_v4  ;;  %v425_v36 = vcombine.high %v9128_v17, %v9224_v49  ;;  %v13579_v4 = vld [vmem:[#allocation18_spill] sm:$0xff] }
 0x148   :  { %13539 = vst [vmem:[#allocation71_spill] sm:$0xff] %v9474_v5  ;;  %13540 = vst [vmem:[#allocation72_spill] sm:$0xff] %v9477_v25  ;;  %v1768_v17 = vcombine.low %v9074_v13, %v9212_v45  ;;  %v1769_v49 = vcombine.high %v9074_v13, %v9212_v45  ;;  %v560_v8 = vcombine.low %v9134_v19, %v9222_v48 }
 0x149   :  { %13532 = vst [vmem:[#allocation64_spill] sm:$0xff] %v9427_v27  ;;  %13541 = vst [vmem:[#allocation73_spill] sm:$0xff] %v9487_v43  ;;  %v2448_v12 = vcombine.low %v9078_v14, %v9216_v46  ;;  %v2449_v44 = vcombine.high %v9078_v14, %v9216_v46  ;;  %v561_v61 = vcombine.high %v9134_v19, %v9222_v48 }
 0x14a   :  { %v9452_v59 = vpop.permute.xlu0 %328  ;;  %v9507_v5 = vrot.slane %v1225_v10, %v9354_v28  ;;  %v2312_v13 = vcombine.low %v9080_v15, %v9218_v47  ;;  %v432_v45 = vrot.slane %v424_v42, %v9354_v28  ;;  %v9517_v57 = vrot.slane %v1905_v11, %v9354_v28 }
 0x14b   :  { %13535 = vst [vmem:[#allocation67_spill] sm:$0xff] %v9452_v59  ;;  %v9498_v59 = vrot.slane %v1224_v35, %v9354_v28  ;;  %v439_v35 = vrot.slane %v425_v36, %v9354_v28  ;;  %v2313_v14 = vcombine.high %v9080_v15, %v9218_v47  ;;  %v1104_v19 = vcombine.low %v9132_v18, %v9228_v50  ;;  %v9534_v36 = vpop.permute.xlu1 %330 }
 0x14c   :  { %v9524_v46 = vrot.slane %v1768_v17, %v9354_v28  ;;  %v9527_v48 = vrot.slane %v1769_v49, %v9354_v28  ;;  %v9530_v10 = vrot.slane %v560_v8, %v9354_v28  ;;  %v1105_v42 = vcombine.high %v9132_v18, %v9228_v50  ;;  %13543 = vst [vmem:[#allocation75_spill] sm:$0xff] %v9534_v36 }
 0x14d   :  { %v9540_v15 = vrot.slane %v2449_v44, %v9354_v28  ;;  %v9543_v47 = vrot.slane %v561_v61, %v9354_v28  ;;  %v968_v11 = vcombine.low %v9126_v16, %v9230_v51  ;;  %v9550_v49 = vrot.slane %v2312_v13, %v9354_v28 }
 0x14e   :  { %v9495_v40 = vpop.permute.xlu0 %332  ;;  %v472_v18 = vcombine.low %v9380_v1, %v432_v45  ;;  %v473_v50 = vcombine.high %v9380_v1, %v432_v45  ;;  %v488_v8 = vcombine.low %v9389_v29, %v439_v35  ;;  %v489_v44 = vcombine.high %v9389_v29, %v439_v35 }
 0x14f   :  { %13542 = vst [vmem:[#allocation74_spill] sm:$0xff] %v9495_v40  ;;  %v9514_v40 = vrot.slane %v1904_v26, %v9354_v28  ;;  %v9537_v26 = vrot.slane %v2448_v12, %v9354_v28  ;;  %v9556_v12 = vrot.slane %v2313_v14, %v9354_v28  ;;  %v9560_v61 = vrot.slane %v1104_v19, %v9354_v28 }
 0x150   :  { %v9569_v1 = vrot.slane %v1105_v42, %v9354_v28  ;;  %v1648_v45 = vcombine.low %v9138_v20, %v9234_v52  ;;  %v1512_v19 = vcombine.low %v9140_v21, %v9236_v53  ;;  %v9586_v42 = vpop.permute.xlu1 %334  ;;  %v9589_v36 = vrot.slane %v472_v18, %v9377_v32 }
 0x151   :  { %13547 = vst [vmem:[#allocation79_spill] sm:$0xff] %v9586_v42  ;;  %v9592_v29 = vrot.slane %v488_v8, %v9377_v32  ;;  %v9595_v35 = vrot.slane %v473_v50, %v9377_v32  ;;  %v9605_v13 = vrot.slane %v489_v44, %v9377_v32  ;;  %v2192_v44 = vcombine.low %v9144_v22, %v9240_v54 }
 0x152   :  { %v9547_v17 = vpop.permute.xlu0 %336  ;;  %13545 = vst [vmem:[#allocation77_spill] sm:$0xff] %v9569_v1  ;;  %v9612_v50 = vrot.slane %v1648_v45, %v9354_v28  ;;  %v9628_v8 = vrot.slane %v1512_v19, %v9354_v28  ;;  %v2056_v45 = vcombine.low %v9146_v23, %v9242_v55 }
 0x153   :  { %13544 = vst [vmem:[#allocation76_spill] sm:$0xff] %v9547_v17  ;;  %v969_v17 = vcombine.high %v9126_v16, %v9230_v51  ;;  %v9578_v16 = vrot.slane %v968_v11, %v9354_v28  ;;  %v1649_v51 = vcombine.high %v9138_v20, %v9234_v52  ;;  %v1513_v52 = vcombine.high %v9140_v21, %v9236_v53 }
 0x154   :  { %13548 = vst [vmem:[#allocation80_spill] sm:$0xff] %v9612_v50  ;;  %v440_v11 = vcombine.low %v9272_v30, %v9342_v63  ;;  %v9647_v62 = vpop.permute.xlu1 %338  ;;  %v9655_v1 = vrot.slane %v2192_v44, %v9354_v28  ;;  %v13553_v44 = vld [vmem:[#allocation19_spill] sm:$0xff] }
 0x155   :  { %v9600_v20 = vrot.slane %v969_v17, %v9354_v28  ;;  %v9621_v53 = vrot.slane %v1649_v51, %v9354_v28  ;;  %v9638_v42 = vrot.slane %v1513_v52, %v9354_v28  ;;  %13550 = vst [vmem:[#allocation82_spill] sm:$0xff] %v9647_v62  ;;  %v9668_v52 = vrot.slane %v2056_v45, %v9354_v28  ;;  %v13554_v62 = vld [vmem:[#allocation11_spill] sm:$0xff]  ;;  %v13557_v51 = vld [vmem:[#allocation12_spill] sm:$0xff] }
 0x156   :  { %v9582_v14 = vpop.permute.xlu0 %340  ;;  %13551 = vst [vmem:[#allocation83_spill] sm:$0xff] %v9655_v1  ;;  %v832_v50 = vcombine.low %v13554_v62, %v13553_v44  ;;  %v13566_v1 = vld [vmem:[#allocation14_spill] sm:$0xff] }
 0x157   :  { %13546 = vst [vmem:[#allocation78_spill] sm:$0xff] %v9582_v14  ;;  %13549 = vst [vmem:[#allocation81_spill] sm:$0xff] %v9621_v53  ;;  %v2193_v14 = vcombine.high %v9144_v22, %v9240_v54  ;;  %v2057_v22 = vcombine.high %v9146_v23, %v9242_v55  ;;  %v448_v54 = vrot.slane %v440_v11, %v9354_v28  ;;  %v13556_v55 = vld [vmem:[#allocation20_spill] sm:$0xff] }
 0x158   :  { %v696_v53 = vcombine.low %v13557_v51, %v13556_v55 }
 0x159   :  { %v9663_v11 = vrot.slane %v2193_v14, %v9354_v28  ;;  %v9677_v23 = vrot.slane %v2057_v22, %v9354_v28  ;;  %v833_v14 = vcombine.high %v13554_v62, %v13553_v44  ;;  %v13565_v44 = vld [vmem:[#allocation22_spill] sm:$0xff] }
 0x15a   :  { %v361_v18 = vpop.permute.xlu0 %360  ;;  %v1240_v2 = vcombine.low %v13566_v1, %v13565_v44 }
 0x15b   :  { %v456_v17 = vcombine.low %v9310_v31, %v361_v18  ;;  %v457_v19 = vcombine.high %v9310_v31, %v361_v18  ;;  %13552 = vst [vmem:[#allocation84_spill] sm:$0xff] %v9663_v11  ;;  %v441_v31 = vcombine.high %v9272_v30, %v9342_v63  ;;  %13555 = vst [vmem:[#allocation19_spill] sm:$0xff] %v9677_v23  ;;  %v9696_v18 = vpop.permute.xlu1 %342 }
 0x15c   :  { %v697_v30 = vcombine.high %v13557_v51, %v13556_v55  ;;  %13558 = vst [vmem:[#allocation11_spill] sm:$0xff] %v9696_v18  ;;  %v9712_v22 = vrot.slane %v833_v14, %v9354_v28  ;;  %v13563_v51 = vld [vmem:[#allocation21_spill] sm:$0xff] }
 0x15d   :  { %v464_v21 = vrot.slane %v456_v17, %v9354_v28  ;;  %v471_v63 = vrot.slane %v457_v19, %v9354_v28  ;;  %v9704_v19 = vrot.slane %v832_v50, %v9354_v28  ;;  %v455_v55 = vrot.slane %v441_v31, %v9354_v28  ;;  %v13564_v50 = vld [vmem:[#allocation13_spill] sm:$0xff] }
 0x15e   :  { %13560 = vst [vmem:[#allocation12_spill] sm:$0xff] %v9712_v22  ;;  %v9718_v27 = vrot.slane %v697_v30, %v9354_v28  ;;  %v1376_v18 = vcombine.low %v13564_v50, %v13563_v51  ;;  %v1377_v62 = vcombine.high %v13564_v50, %v13563_v51  ;;  %v13574_v22 = vld [vmem:[#allocation57_spill] sm:$0xff] }
 0x15f   :  { %v504_v17 = vcombine.low %v448_v54, %v464_v21  ;;  %13559 = vst [vmem:[#allocation20_spill] sm:$0xff] %v9704_v19  ;;  %v505_v11 = vcombine.high %v448_v54, %v464_v21  ;;  %v520_v31 = vcombine.low %v455_v55, %v471_v63  ;;  %v1241_v21 = vcombine.high %v13566_v1, %v13565_v44 }
 0x160   :  { %13562 = vst [vmem:[#allocation86_spill] sm:$0xff] %v9718_v27  ;;  %v521_v50 = vcombine.high %v455_v55, %v471_v63  ;;  %v9751_v51 = vrot.slane %v1376_v18, %v9354_v28  ;;  %v9754_v54 = vrot.slane %v1377_v62, %v9354_v28  ;;  %v9761_v55 = vrot.slane %v1240_v2, %v9354_v28  ;;  %v13571_v62 = vld [vmem:[#allocation15_spill] sm:$0xff] }
 0x161   :  { %v512_v45 = vrot.slane %v504_v17, %v9377_v32  ;;  %v9715_v17 = vrot.slane %v696_v53, %v9354_v28  ;;  %v9745_v19 = vrot.slane %v520_v31, %v9377_v32  ;;  %v519_v1 = vrot.slane %v505_v11, %v9377_v32  ;;  %v13569_v11 = vld [vmem:[#allocation42_spill] sm:$0xff]  ;;  %v13575_v63 = vld [vmem:[#allocation27_spill] sm:$0xff] }
 0x162   :  { %13567 = vst [vmem:[#allocation21_spill] sm:$0xff] %v9751_v51  ;;  %13568 = vst [vmem:[#allocation13_spill] sm:$0xff] %v9754_v54  ;;  %v9766_v18 = vrot.slane %v1241_v21, %v9354_v28  ;;  %v576_v41 = vcombine.low %v13575_v63, %v13574_v22  ;;  %v9780_v21 = vrot.slane %v521_v50, %v9377_v32 }
 0x163   :  { %13561 = vst [vmem:[#allocation85_spill] sm:$0xff] %v9715_v17  ;;  %v537_v33 = vcombine.high %v9589_v36, %v512_v45  ;;  %v536_v14 = vcombine.low %v9589_v36, %v512_v45  ;;  %v9740_v45 = vpop.permute.xlu1 %362  ;;  %v540_v2 = vcombine.low %v9592_v29, %v9745_v19  ;;  %v538_v9 = vcombine.low %v9595_v35, %v519_v1 }
 0x164   :  { %v592_v31 = vcombine.low %v13569_v11, %v9740_v45  ;;  %v539_v43 = vcombine.high %v9595_v35, %v519_v1 }
 0x165   :  { %v2588_v30 = vsel %vm2584_vm0, %v537_v33, -inf  ;;  %v2585_v53 = vsel %vm2584_vm0, %v536_v14, -inf  ;;  %v13570_v14 = vld [vmem:[#allocation23_spill] sm:$0xff]  ;;  %v13573_v33 = vld [vmem:[#allocation16_spill] sm:$0xff]  ;;  %v2597_v23 = vsel %vm2584_vm0, %v540_v2, -inf  ;;  %v542_v2 = vcombine.low %v9605_v13, %v9780_v21 }
 0x166   :  { %2589 = vmax.xlane.f32.xlu1 %v2588_v30  ;;  %2586 = vmax.xlane.f32.xlu0 %v2585_v53  ;;  %v1920_v44 = vcombine.low %v13571_v62, %v13570_v14  ;;  %v1921_v53 = vcombine.high %v13571_v62, %v13570_v14  ;;  %v13572_v30 = vld [vmem:[#allocation24_spill] sm:$0xff]  ;;  %v600_v50 = vrot.slane %v592_v31, %v9354_v28 }
 0x167   :  { %v1784_v36 = vcombine.low %v13573_v33, %v13572_v30  ;;  %v1785_v25 = vcombine.high %v13573_v33, %v13572_v30  ;;  %v2591_v33 = vsel %vm2584_vm0, %v538_v9, -inf  ;;  %v584_v31 = vrot.slane %v576_v41, %v9354_v28  ;;  %v13577_v9 = vld [vmem:[#allocation17_spill] sm:$0xff] }
 0x168   :  { %v9801_v62 = vrot.slane %v1920_v44, %v9354_v28  ;;  %v9805_v30 = vrot.slane %v1921_v53, %v9354_v28  ;;  %v541_v14 = vcombine.high %v9592_v29, %v9745_v19  ;;  %v13583_v29 = vcombine.high %v9369_v3, %v9530_v10 }
 0x169   :  { %v9808_v17 = vrot.slane %v1784_v36, %v9354_v28  ;;  %v9816_v44 = vrot.slane %v1785_v25, %v9354_v28  ;;  %v13578_v36 = vld [vmem:[#allocation26_spill] sm:$0xff]  ;;  %v640_v41 = vcombine.low %v584_v31, %v600_v50 }
 0x16a   :  { %2598 = vmax.xlane.f32.xlu1 %v2597_v23  ;;  %2592 = vmax.xlane.f32.xlu0 %v2591_v33  ;;  %v13576_v23 = vld [vmem:[#allocation25_spill] sm:$0xff]  ;;  %v2328_v54 = vcombine.low %v13579_v4, %v13578_v36  ;;  %v2603_v33 = vsel %vm2584_vm0, %v542_v2, -inf  ;;  %v2329_v51 = vcombine.high %v13579_v4, %v13578_v36  ;;  %v2594_v36 = vsel %vm2584_vm0, %v539_v43, -inf }
 0x16b   :  { %v2464_v27 = vcombine.low %v13577_v9, %v13576_v23  ;;  %v2465_v53 = vcombine.high %v13577_v9, %v13576_v23  ;;  %v593_v23 = vcombine.high %v13569_v11, %v9740_v45  ;;  %v577_v45 = vcombine.high %v13575_v63, %v13574_v22  ;;  %v365_v11 = vpop.permute.xlu0 %364 }
 0x16c   :  { %v641_v2 = vcombine.high %v584_v31, %v600_v50  ;;  %v648_v9 = vrot.slane %v640_v41, %v9377_v32  ;;  %v13581_v43 = vcombine.low %v9369_v3, %v9530_v10  ;;  %v9867_v50 = vrot.slane %v2329_v51, %v9354_v28  ;;  %v13582_v31 = vld [vmem:[#allocation44_spill] sm:$0xff]  ;;  %v13585_v3 = vld [vmem:[#allocation59_spill] sm:$0xff]  ;;  %v13586_v10 = vld [vmem:[#allocation29_spill] sm:$0xff] }
 0x16d   :  { %v9845_v4 = vrot.slane %v2464_v27, %v9354_v28  ;;  %v9856_v25 = vrot.slane %v2465_v53, %v9354_v28  ;;  %v9859_v27 = vrot.slane %v2328_v54, %v9354_v28  ;;  %v607_v22 = vrot.slane %v593_v23, %v9354_v28 }
 0x16e   :  { %2604 = vmax.xlane.f32.xlu1 %v2603_v33  ;;  %2595 = vmax.xlane.f32.xlu0 %v2594_v36  ;;  %v616_v63 = vrot.slane %v13581_v43, %v9377_v32  ;;  %v1000_v41 = vcombine.low %v13582_v31, %v365_v11  ;;  %v9874_v19 = vrot.slane %v13583_v29, %v9377_v32  ;;  %v2600_v43 = vsel %vm2584_vm0, %v541_v14, -inf }
 0x16f   :  { %13580 = vst [vmem:[#allocation22_spill] sm:$0xff] %v9845_v4  ;;  %v13584_v54 = vcombine.low %v9372_v24, %v9543_v47  ;;  %v591_v51 = vrot.slane %v577_v45, %v9354_v28  ;;  %v984_v29 = vcombine.low %v13586_v10, %v13585_v3  ;;  %v655_v1 = vrot.slane %v641_v2, %v9377_v32 }
 0x170   :  { %v672_v36 = vcombine.low %v616_v63, %v648_v9  ;;  %v13589_v45 = vcombine.high %v9412_v58, %v9578_v16 }
 0x171   :  { %v9880_v53 = vrot.slane %v13584_v54, %v9377_v32  ;;  %v543_v54 = vcombine.high %v9605_v13, %v9780_v21  ;;  %v656_v35 = vcombine.low %v591_v51, %v607_v22  ;;  %v657_v4 = vcombine.high %v591_v51, %v607_v22 }
 0x172   :  { %2601 = vmax.xlane.f32.xlu0 %v2600_v43  ;;  %v2609_v14 = vsel %vm2584_vm0, %v672_v36, -inf  ;;  %v1008_v43 = vrot.slane %v1000_v41, %v9354_v28  ;;  %v674_v2 = vcombine.low %v9874_v19, %v655_v1  ;;  %v992_v23 = vrot.slane %v984_v29, %v9354_v28 }
 0x173   :  { %2610 = vmax.xlane.f32.xlu1 %v2609_v14  ;;  %v2606_v36 = vsel %vm2584_vm0, %v543_v54, -inf  ;;  %v13587_v22 = vcombine.high %v9372_v24, %v9543_v47  ;;  %v13588_v51 = vcombine.low %v9412_v58, %v9578_v16  ;;  %v9926_v54 = vrot.slane %v13589_v45, %v9377_v32 }
 0x174   :  { %v1001_v29 = vcombine.high %v13582_v31, %v365_v11  ;;  %v664_v24 = vrot.slane %v656_v35, %v9377_v32  ;;  %v13590_v47 = vcombine.low %v9421_v6, %v9600_v20  ;;  %v673_v21 = vcombine.high %v616_v63, %v648_v9 }
 0x175   :  { %v9914_v41 = vrot.slane %v13587_v22, %v9377_v32  ;;  %v9920_v14 = vrot.slane %v13588_v51, %v9377_v32  ;;  %v1048_v51 = vcombine.low %v992_v23, %v1008_v43  ;;  %v9938_v13 = vrot.slane %v657_v4, %v9377_v32  ;;  %v13594_v4 = vld [vmem:[#allocation77_spill] sm:$0xff] }
 0x176   :  { %2607 = vmax.xlane.f32.xlu0 %v2606_v36  ;;  %v2615_v36 = vsel %vm2584_vm0, %v674_v2, -inf  ;;  %v9935_v22 = vrot.slane %v13590_v47, %v9377_v32  ;;  %v13591_v58 = vcombine.high %v9421_v6, %v9600_v20  ;;  %v13592_v35 = vcombine.low %v9392_v60, %v9560_v61 }
 0x177   :  { %2616 = vmax.xlane.f32.xlu1 %v2615_v36  ;;  %v13593_v31 = vcombine.high %v9392_v60, %v9560_v61  ;;  %v13595_v63 = vcombine.low %v9399_v0, %v13594_v4  ;;  %v13596_v6 = vcombine.high %v9399_v0, %v13594_v4  ;;  %v985_v2 = vcombine.high %v13586_v10, %v13585_v3 }
 0x178   :  { %v9944_v16 = vrot.slane %v13591_v58, %v9377_v32  ;;  %v9950_v11 = vrot.slane %v13592_v35, %v9377_v32  ;;  %v676_v36 = vcombine.low %v9880_v53, %v664_v24  ;;  %v2612_v60 = vsel %vm2584_vm0, %v673_v21, -inf  ;;  %v9996_v21 = vpop.permute.xlu1 %366 }
 0x179   :  { %v9956_v9 = vrot.slane %v13593_v31, %v9377_v32  ;;  %v9962_v45 = vrot.slane %v13595_v63, %v9377_v32  ;;  %v9968_v20 = vrot.slane %v13596_v6, %v9377_v32  ;;  %v675_v61 = vcombine.high %v9874_v19, %v655_v1  ;;  %v13601_v63 = vld [vmem:[#allocation80_spill] sm:$0xff] }
 0x17a   :  { %v9976_v47 = vrot.slane %v1001_v29, %v9354_v28  ;;  %2613 = vmax.xlane.f32.xlu0 %v2612_v60  ;;  %v13597_v58 = vcombine.low %v9432_v7, %v9628_v8  ;;  %v13598_v3 = vcombine.high %v9432_v7, %v9628_v8  ;;  %v13599_v1 = vcombine.low %v9435_v39, %v9638_v42 }
 0x17b   :  { %v1049_v29 = vcombine.high %v992_v23, %v1008_v43  ;;  %v2621_v35 = vsel %vm2584_vm0, %v676_v36, -inf  ;;  %v678_v31 = vcombine.low %v9914_v41, %v9938_v13  ;;  %v1056_v4 = vrot.slane %v1048_v51, %v9377_v32  ;;  %v13604_v51 = vld [vmem:[#allocation64_spill] sm:$0xff]  ;;  %v13605_v36 = vld [vmem:[#allocation81_spill] sm:$0xff] }
 0x17c   :  { %v9982_v0 = vrot.slane %v13597_v58, %v9377_v32  ;;  %v9988_v10 = vrot.slane %v13598_v3, %v9377_v32  ;;  %v9994_v19 = vrot.slane %v13599_v1, %v9377_v32  ;;  %2622 = vmax.xlane.f32.xlu1 %v2621_v35  ;;  %v13600_v7 = vcombine.high %v9435_v39, %v9638_v42 }
 0x17d   :  { %v13602_v6 = vcombine.low %v9424_v38, %v13601_v63  ;;  %v13603_v23 = vcombine.high %v9424_v38, %v13601_v63  ;;  %v13606_v58 = vcombine.low %v13604_v51, %v13605_v36  ;;  %v999_v39 = vrot.slane %v985_v2, %v9354_v28  ;;  %v13608_v38 = vld [vmem:[#allocation43_spill] sm:$0xff] }
 0x17e   :  { %v10006_v8 = vrot.slane %v13600_v7, %v9377_v32  ;;  %v2618_v42 = vsel %vm2584_vm0, %v675_v61, -inf  ;;  %v677_v1 = vcombine.high %v9880_v53, %v664_v24  ;;  %v13607_v35 = vcombine.high %v13604_v51, %v13605_v36  ;;  %v13613_v2 = vld [vmem:[#allocation19_spill] sm:$0xff] }
 0x17f   :  { %v10012_v60 = vrot.slane %v13602_v6, %v9377_v32  ;;  %v10018_v43 = vrot.slane %v13603_v23, %v9377_v32  ;;  %v10024_v3 = vrot.slane %v13606_v58, %v9377_v32  ;;  %v1136_v63 = vcombine.low %v13608_v38, %v9996_v21  ;;  %2619 = vmax.xlane.f32.xlu0 %v2618_v42 }
 0x180   :  { %v10033_v7 = vrot.slane %v13607_v35, %v9377_v32  ;;  %v13609_v6 = vcombine.low %v9448_v34, %v9668_v52  ;;  %v13611_v53 = vcombine.high %v9448_v34, %v9668_v52  ;;  %v13614_v61 = vcombine.low %v9455_v56, %v13613_v2 }
 0x181   :  { %v1064_v36 = vcombine.low %v999_v39, %v9976_v47  ;;  %v2627_v58 = vsel %vm2584_vm0, %v678_v31, -inf  ;;  %v1080_v42 = vcombine.low %v9920_v14, %v1056_v4  ;;  %v10059_v35 = vrot.slane %v1049_v29, %v9377_v32  ;;  %v13624_v29 = vld [vmem:[#allocation66_spill] sm:$0xff] }
 0x182   :  { %v10041_v23 = vrot.slane %v13609_v6, %v9377_v32  ;;  %v10047_v24 = vrot.slane %v13611_v53, %v9377_v32  ;;  %v10053_v51 = vrot.slane %v13614_v61, %v9377_v32  ;;  %2628 = vmax.xlane.f32.xlu1 %v2627_v58  ;;  %v13616_v34 = vcombine.high %v9455_v56, %v13613_v2  ;;  %v13618_v6 = vld [vmem:[#allocation65_spill] sm:$0xff]  ;;  %v13619_v53 = vld [vmem:[#allocation83_spill] sm:$0xff]  ;;  %v13625_v58 = vld [vmem:[#allocation84_spill] sm:$0xff] }
 0x183   :  { %v13620_v61 = vcombine.low %v13618_v6, %v13619_v53  ;;  %v13622_v31 = vcombine.high %v13618_v6, %v13619_v53  ;;  %v13628_v56 = vld [vmem:[#allocation60_spill] sm:$0xff]  ;;  %v13630_v6 = vcombine.high %v13624_v29, %v13625_v58 }
 0x184   :  { %13610 = vst [vmem:[#allocation14_spill] sm:$0xff] %v10041_v23  ;;  %13612 = vst [vmem:[#allocation42_spill] sm:$0xff] %v10047_v24  ;;  %v10065_v52 = vrot.slane %v13616_v34, %v9377_v32  ;;  %v13626_v24 = vcombine.low %v13624_v29, %v13625_v58  ;;  %v13629_v2 = vld [vmem:[#allocation28_spill] sm:$0xff]  ;;  %v13639_v29 = vld [vmem:[#allocation86_spill] sm:$0xff] }
 0x185   :  { %13615 = vst [vmem:[#allocation23_spill] sm:$0xff] %v10053_v51  ;;  %v10071_v33 = vrot.slane %v13620_v61, %v9377_v32  ;;  %v10077_v51 = vrot.slane %v13622_v31, %v9377_v32  ;;  %v1120_v34 = vcombine.low %v13629_v2, %v13628_v56  ;;  %v679_v61 = vcombine.high %v9914_v41, %v9938_v13 }
 0x186   :  { %13617 = vst [vmem:[#allocation15_spill] sm:$0xff] %v10065_v52  ;;  %v10083_v23 = vrot.slane %v13626_v24, %v9377_v32  ;;  %v2624_v52 = vsel %vm2584_vm0, %v677_v1, -inf  ;;  %v10094_v53 = vrot.slane %v13630_v6, %v9377_v32  ;;  %v10097_v31 = vrot.slane %v1136_v63, %v9354_v28  ;;  %v13632_v24 = vld [vmem:[#allocation70_spill] sm:$0xff]  ;;  %v13638_v1 = vld [vmem:[#allocation72_spill] sm:$0xff] }
 0x187   :  { %13621 = vst [vmem:[#allocation24_spill] sm:$0xff] %v10071_v33  ;;  %13623 = vst [vmem:[#allocation16_spill] sm:$0xff] %v10077_v51  ;;  %2625 = vmax.xlane.f32.xlu0 %v2624_v52  ;;  %v13640_v58 = vcombine.low %v13638_v1, %v13639_v29  ;;  %v1065_v63 = vcombine.high %v999_v39, %v9976_v47  ;;  %v2633_v52 = vsel %vm2584_vm0, %v1080_v42, -inf }
 0x188   :  { %13627 = vst [vmem:[#allocation57_spill] sm:$0xff] %v10083_v23  ;;  %13631 = vst [vmem:[#allocation27_spill] sm:$0xff] %v10094_v53  ;;  %v13633_v23 = vld [vmem:[#allocation85_spill] sm:$0xff]  ;;  %2634 = vmax.xlane.f32.xlu1 %v2633_v52  ;;  %v13649_v52 = vld [vmem:[#allocation12_spill] sm:$0xff] }
 0x189   :  { %v13634_v51 = vcombine.low %v13632_v24, %v13633_v23  ;;  %v13636_v13 = vcombine.high %v13632_v24, %v13633_v23  ;;  %v10115_v6 = vrot.slane %v13640_v58, %v9377_v32  ;;  %v13642_v23 = vcombine.high %v13638_v1, %v13639_v29  ;;  %v13644_v58 = vld [vmem:[#allocation20_spill] sm:$0xff] }
 0x18a   :  { %v1128_v1 = vrot.slane %v1120_v34, %v9354_v28  ;;  %v2630_v29 = vsel %vm2584_vm0, %v679_v61, -inf  ;;  %v13654_v34 = vcombine.low %v9507_v5, %v9766_v18 }
 0x18b   :  { %v10103_v33 = vrot.slane %v13634_v51, %v9377_v32  ;;  %v10109_v41 = vrot.slane %v13636_v13, %v9377_v32  ;;  %13641 = vst [vmem:[#allocation26_spill] sm:$0xff] %v10115_v6  ;;  %v1082_v51 = vcombine.low %v9926_v54, %v10059_v35  ;;  %v10128_v24 = vrot.slane %v13642_v23, %v9377_v32  ;;  %v13643_v13 = vld [vmem:[#allocation68_spill] sm:$0xff] }
 0x18c   :  { %v13645_v6 = vcombine.low %v13643_v13, %v13644_v58  ;;  %v13647_v39 = vcombine.high %v13643_v13, %v13644_v58  ;;  %v1081_v23 = vcombine.high %v9920_v14, %v1056_v4  ;;  %v1137_v13 = vcombine.high %v13608_v38, %v9996_v21  ;;  %2631 = vmax.xlane.f32.xlu0 %v2630_v29 }
 0x18d   :  { %13635 = vst [vmem:[#allocation25_spill] sm:$0xff] %v10103_v33  ;;  %13637 = vst [vmem:[#allocation17_spill] sm:$0xff] %v10109_v41  ;;  %v10122_v33 = vrot.slane %v1064_v36, %v9377_v32  ;;  %v13648_v36 = vld [vmem:[#allocation69_spill] sm:$0xff]  ;;  %v13653_v14 = vcombine.high %v9498_v59, %v9761_v55  ;;  %v10175_v61 = vrot.slane %v13654_v34, %v9377_v32  ;;  %v2639_v38 = vsel %vm2584_vm0, %v1082_v51, -inf }
 0x18e   :  { %v10134_v47 = vrot.slane %v13645_v6, %v9377_v32  ;;  %v10140_v42 = vrot.slane %v13647_v39, %v9377_v32  ;;  %v13650_v41 = vcombine.low %v13648_v36, %v13649_v52  ;;  %v13651_v6 = vcombine.high %v13648_v36, %v13649_v52  ;;  %2640 = vmax.xlane.f32.xlu1 %v2639_v38  ;;  %v13658_v52 = vld [vmem:[#allocation21_spill] sm:$0xff] }
 0x18f   :  { %v10169_v4 = vrot.slane %v13653_v14, %v9377_v32  ;;  %13655 = vst [vmem:[#allocation44_spill] sm:$0xff] %v10175_v61  ;;  %v1184_v21 = vcombine.low %v1128_v1, %v10097_v31  ;;  %v1084_v39 = vcombine.low %v9935_v22, %v10122_v33  ;;  %v10182_v36 = vrot.slane %v1065_v63, %v9377_v32  ;;  %v13663_v63 = vld [vmem:[#allocation73_spill] sm:$0xff] }
 0x190   :  { %13646 = vst [vmem:[#allocation18_spill] sm:$0xff] %v10134_v47  ;;  %v10146_v53 = vrot.slane %v13650_v41, %v9377_v32  ;;  %v10155_v47 = vrot.slane %v13651_v6, %v9377_v32  ;;  %v13652_v41 = vcombine.low %v9498_v59, %v9761_v55  ;;  %v13656_v59 = vcombine.high %v9507_v5, %v9766_v18  ;;  %v13664_v14 = vld [vmem:[#allocation13_spill] sm:$0xff] }
 0x191   :  { %v13659_v29 = vcombine.low %v9480_v37, %v13658_v52  ;;  %v13661_v51 = vcombine.high %v9480_v37, %v13658_v52  ;;  %v13665_v34 = vcombine.low %v13663_v63, %v13664_v14  ;;  %v1121_v5 = vcombine.high %v13629_v2, %v13628_v56 }
 0x192   :  { %v10163_v58 = vrot.slane %v13652_v41, %v9377_v32  ;;  %v10188_v55 = vrot.slane %v13656_v59, %v9377_v32  ;;  %v2636_v18 = vsel %vm2584_vm0, %v1081_v23, -inf  ;;  %v1083_v59 = vcombine.high %v9926_v54, %v10059_v35 }
 0x193   :  { %v10194_v6 = vrot.slane %v13659_v29, %v9377_v32  ;;  %v10200_v41 = vrot.slane %v13661_v51, %v9377_v32  ;;  %v10206_v38 = vrot.slane %v13665_v34, %v9377_v32  ;;  %v13667_v37 = vcombine.high %v13663_v63, %v13664_v14  ;;  %2637 = vmax.xlane.f32.xlu0 %v2636_v18  ;;  %v10241_v63 = vpop.permute.xlu0 %368 }
 0x194   :  { %13657 = vst [vmem:[#allocation59_spill] sm:$0xff] %v10188_v55  ;;  %v10220_v29 = vrot.slane %v1137_v13, %v9354_v28  ;;  %v13669_v51 = vcombine.low %v9524_v46, %v9808_v17  ;;  %v13671_v54 = vcombine.high %v9524_v46, %v9808_v17  ;;  %v13673_v2 = vcombine.low %v9527_v48, %v9816_v44 }
 0x195   :  { %13660 = vst [vmem:[#allocation29_spill] sm:$0xff] %v10194_v6  ;;  %13662 = vst [vmem:[#allocation77_spill] sm:$0xff] %v10200_v41  ;;  %v10217_v52 = vrot.slane %v13667_v37, %v9377_v32  ;;  %v1185_v13 = vcombine.high %v1128_v1, %v10097_v31  ;;  %v2645_v14 = vsel %vm2584_vm0, %v1084_v39, -inf  ;;  %v1086_v34 = vcombine.low %v9944_v16, %v10182_v36 }
 0x196   :  { %13666 = vst [vmem:[#allocation80_spill] sm:$0xff] %v10206_v38  ;;  %v10226_v56 = vrot.slane %v13669_v51, %v9377_v32  ;;  %v10232_v35 = vrot.slane %v13671_v54, %v9377_v32  ;;  %v10238_v23 = vrot.slane %v13673_v2, %v9377_v32  ;;  %v10247_v18 = vrot.slane %v1184_v21, %v9377_v32 }
 0x197   :  { %13668 = vst [vmem:[#allocation64_spill] sm:$0xff] %v10217_v52  ;;  %2646 = vmax.xlane.f32.xlu1 %v2645_v14  ;;  %v13675_v46 = vcombine.high %v9527_v48, %v9816_v44  ;;  %v13677_v31 = vcombine.low %v9514_v40, %v9801_v62  ;;  %v13679_v39 = vcombine.high %v9514_v40, %v9801_v62  ;;  %v2642_v44 = vsel %vm2584_vm0, %v1083_v59, -inf  ;;  %v13685_v62 = vld [vmem:[#allocation46_spill] sm:$0xff] }
 0x198   :  { %13670 = vst [vmem:[#allocation81_spill] sm:$0xff] %v10226_v56  ;;  %13672 = vst [vmem:[#allocation43_spill] sm:$0xff] %v10232_v35  ;;  %v13681_v21 = vcombine.low %v9517_v57, %v9805_v30  ;;  %v1135_v48 = vrot.slane %v1121_v5, %v9354_v28  ;;  %v1085_v54 = vcombine.high %v9935_v22, %v10122_v33  ;;  %2643 = vmax.xlane.f32.xlu0 %v2642_v44  ;;  %v13692_v44 = vld [vmem:[#allocation62_spill] sm:$0xff]  ;;  %v13728_v56 = vld [vmem:[#allocation47_spill] sm:$0xff] }
 0x199   :  { %13674 = vst [vmem:[#allocation19_spill] sm:$0xff] %v10238_v23  ;;  %v10253_v17 = vrot.slane %v13675_v46, %v9377_v32  ;;  %v10259_v1 = vrot.slane %v13677_v31, %v9377_v32  ;;  %v10265_v37 = vrot.slane %v13679_v39, %v9377_v32  ;;  %v13683_v2 = vcombine.high %v9517_v57, %v9805_v30  ;;  %v13725_v23 = vld [vmem:[#allocation40_spill] sm:$0xff] }
 0x19a   :  { %v10271_v51 = vrot.slane %v13681_v21, %v9377_v32  ;;  %v1544_v14 = vcombine.low %v13685_v62, %v10241_v63  ;;  %v13686_v46 = vcombine.low %v9550_v49, %v9859_v27  ;;  %v13688_v33 = vcombine.high %v9550_v49, %v9859_v27  ;;  %v13693_v49 = vld [vmem:[#allocation30_spill] sm:$0xff] }
 0x19b   :  { %13676 = vst [vmem:[#allocation65_spill] sm:$0xff] %v10253_v17  ;;  %13678 = vst [vmem:[#allocation83_spill] sm:$0xff] %v10259_v1  ;;  %v10281_v40 = vrot.slane %v13683_v2, %v9377_v32  ;;  %v13690_v57 = vcombine.low %v9556_v12, %v9867_v50  ;;  %v1200_v59 = vcombine.low %v1135_v48, %v10220_v29  ;;  %v2651_v31 = vsel %vm2584_vm0, %v1086_v34, -inf }
 0x19c   :  { %13680 = vst [vmem:[#allocation66_spill] sm:$0xff] %v10265_v37  ;;  %13682 = vst [vmem:[#allocation84_spill] sm:$0xff] %v10271_v51  ;;  %v10289_v5 = vrot.slane %v13686_v46, %v9377_v32  ;;  %v10295_v22 = vrot.slane %v13688_v33, %v9377_v32  ;;  %v1216_v39 = vcombine.low %v9950_v11, %v10247_v18  ;;  %2652 = vmax.xlane.f32.xlu1 %v2651_v31  ;;  %v13696_v33 = vld [vmem:[#allocation22_spill] sm:$0xff]  ;;  %v13702_v31 = vld [vmem:[#allocation31_spill] sm:$0xff] }
 0x19d   :  { %13684 = vst [vmem:[#allocation60_spill] sm:$0xff] %v10281_v40  ;;  %v10301_v30 = vrot.slane %v13690_v57, %v9377_v32  ;;  %v10308_v21 = vrot.slane %v1185_v13, %v9377_v32  ;;  %v1664_v27 = vcombine.low %v13693_v49, %v13692_v44  ;;  %v13694_v2 = vcombine.high %v9556_v12, %v9867_v50 }
 0x19e   :  { %13687 = vst [vmem:[#allocation28_spill] sm:$0xff] %v10289_v5  ;;  %13689 = vst [vmem:[#allocation70_spill] sm:$0xff] %v10295_v22  ;;  %v13697_v34 = vcombine.low %v9537_v26, %v13696_v33  ;;  %v13699_v13 = vcombine.high %v9537_v26, %v13696_v33  ;;  %v13701_v22 = vld [vmem:[#allocation61_spill] sm:$0xff]  ;;  %v2648_v40 = vsel %vm2584_vm0, %v1085_v54, -inf  ;;  %v1087_v12 = vcombine.high %v9944_v16, %v10182_v36 }
 0x19f   :  { %13691 = vst [vmem:[#allocation85_spill] sm:$0xff] %v10301_v30  ;;  %v10316_v46 = vrot.slane %v13694_v2, %v9377_v32  ;;  %v1528_v5 = vcombine.low %v13702_v31, %v13701_v22  ;;  %v13703_v50 = vcombine.low %v9540_v15, %v9856_v25  ;;  %v1529_v26 = vcombine.high %v13702_v31, %v13701_v22 }
 0x1a0   :  { %v10322_v57 = vrot.slane %v13697_v34, %v9377_v32  ;;  %v10328_v30 = vrot.slane %v13699_v13, %v9377_v32  ;;  %v1665_v34 = vcombine.high %v13693_v49, %v13692_v44  ;;  %v1201_v33 = vcombine.high %v1135_v48, %v10220_v29  ;;  %2649 = vmax.xlane.f32.xlu0 %v2648_v40  ;;  %v13707_v29 = vld [vmem:[#allocation71_spill] sm:$0xff]  ;;  %v13708_v48 = vld [vmem:[#allocation32_spill] sm:$0xff]  ;;  %v13710_v49 = vld [vmem:[#allocation33_spill] sm:$0xff] }
 0x1a1   :  { %13695 = vst [vmem:[#allocation72_spill] sm:$0xff] %v10316_v46  ;;  %v10339_v2 = vrot.slane %v13703_v50, %v9377_v32  ;;  %v13705_v54 = vcombine.high %v9540_v15, %v9856_v25  ;;  %v1552_v36 = vrot.slane %v1544_v14, %v9354_v28  ;;  %v2657_v13 = vsel %vm2584_vm0, %v1216_v39, -inf  ;;  %v13709_v25 = vld [vmem:[#allocation63_spill] sm:$0xff] }
 0x1a2   :  { %13698 = vst [vmem:[#allocation86_spill] sm:$0xff] %v10322_v57  ;;  %13700 = vst [vmem:[#allocation68_spill] sm:$0xff] %v10328_v30  ;;  %v1218_v50 = vcombine.low %v9956_v9, %v10308_v21  ;;  %v10357_v44 = vrot.slane %v1200_v59, %v9377_v32  ;;  %v10360_v22 = vrot.slane %v1664_v27, %v9354_v28  ;;  %2658 = vmax.xlane.f32.xlu1 %v2657_v13 }
 0x1a3   :  { %13704 = vst [vmem:[#allocation20_spill] sm:$0xff] %v10339_v2  ;;  %v10350_v16 = vrot.slane %v13705_v54, %v9377_v32  ;;  %v2208_v40 = vcombine.low %v13708_v48, %v13707_v29  ;;  %v2209_v15 = vcombine.high %v13708_v48, %v13707_v29  ;;  %v2072_v14 = vcombine.low %v13710_v49, %v13709_v25  ;;  %v13711_v29 = vld [vmem:[#allocation75_spill] sm:$0xff]  ;;  %v13712_v48 = vld [vmem:[#allocation34_spill] sm:$0xff] }
 0x1a4   :  { %v1536_v39 = vrot.slane %v1528_v5, %v9354_v28  ;;  %v2073_v31 = vcombine.high %v13710_v49, %v13709_v25  ;;  %v2654_v59 = vsel %vm2584_vm0, %v1087_v12, -inf  ;;  %v1217_v27 = vcombine.high %v9950_v11, %v10247_v18  ;;  %v13714_v49 = vld [vmem:[#allocation35_spill] sm:$0xff] }
 0x1a5   :  { %13706 = vst [vmem:[#allocation69_spill] sm:$0xff] %v10350_v16  ;;  %v10375_v54 = vrot.slane %v1665_v34, %v9354_v28  ;;  %v10378_v16 = vrot.slane %v1529_v26, %v9354_v28  ;;  %v848_v2 = vcombine.low %v13712_v48, %v13711_v29  ;;  %v1545_v5 = vcombine.high %v13685_v62, %v10241_v63 }
 0x1a6   :  { %2655 = vmax.xlane.f32.xlu0 %v2654_v59  ;;  %v1592_v13 = vcombine.low %v1536_v39, %v1552_v36  ;;  %v2663_v25 = vsel %vm2584_vm0, %v1218_v50, -inf  ;;  %v1220_v12 = vcombine.low %v9962_v45, %v10357_v44  ;;  %v10388_v11 = vrot.slane %v1201_v33, %v9377_v32  ;;  %v13713_v50 = vld [vmem:[#allocation67_spill] sm:$0xff]  ;;  %v10406_v59 = vpop.permute.xlu1 %370 }
 0x1a7   :  { %v10391_v18 = vrot.slane %v2208_v40, %v9354_v28  ;;  %v10394_v34 = vrot.slane %v2209_v15, %v9354_v28  ;;  %v10397_v26 = vrot.slane %v2072_v14, %v9354_v28  ;;  %v849_v63 = vcombine.high %v13712_v48, %v13711_v29  ;;  %2664 = vmax.xlane.f32.xlu1 %v2663_v25  ;;  %v13715_v48 = vld [vmem:[#allocation79_spill] sm:$0xff]  ;;  %v13716_v25 = vld [vmem:[#allocation36_spill] sm:$0xff] }
 0x1a8   :  { %v10402_v62 = vrot.slane %v2073_v31, %v9354_v28  ;;  %v712_v33 = vcombine.low %v13714_v49, %v13713_v50  ;;  %v2660_v40 = vsel %vm2584_vm0, %v1217_v27, -inf  ;;  %v1219_v15 = vcombine.high %v9956_v9, %v10308_v21 }
 0x1a9   :  { %v10412_v14 = vrot.slane %v848_v2, %v9354_v28  ;;  %v713_v29 = vcombine.high %v13714_v49, %v13713_v50  ;;  %v1392_v31 = vcombine.low %v13716_v25, %v13715_v48  ;;  %v10419_v30 = vrot.slane %v1545_v5, %v9354_v28  ;;  %v13717_v50 = vld [vmem:[#allocation74_spill] sm:$0xff]  ;;  %v13718_v49 = vld [vmem:[#allocation37_spill] sm:$0xff] }
 0x1aa   :  { %2661 = vmax.xlane.f32.xlu0 %v2660_v40  ;;  %v1593_v57 = vcombine.high %v1536_v39, %v1552_v36  ;;  %v2669_v46 = vsel %vm2584_vm0, %v1220_v12, -inf  ;;  %v1222_v27 = vcombine.low %v9968_v20, %v10388_v11  ;;  %v10425_v9 = vrot.slane %v1592_v13, %v9377_v32  ;;  %v13719_v12 = vld [vmem:[#allocation82_spill] sm:$0xff] }
 0x1ab   :  { %v10428_v21 = vrot.slane %v849_v63, %v9354_v28  ;;  %v1393_v2 = vcombine.high %v13716_v25, %v13715_v48  ;;  %v1256_v5 = vcombine.low %v13718_v49, %v13717_v50  ;;  %v1257_v36 = vcombine.high %v13718_v49, %v13717_v50  ;;  %2670 = vmax.xlane.f32.xlu1 %v2669_v46  ;;  %v13720_v40 = vld [vmem:[#allocation38_spill] sm:$0xff] }
 0x1ac   :  { %v10437_v39 = vrot.slane %v712_v33, %v9354_v28  ;;  %v1936_v13 = vcombine.low %v13720_v40, %v13719_v12  ;;  %v2666_v51 = vsel %vm2584_vm0, %v1219_v15, -inf  ;;  %v1221_v63 = vcombine.high %v9962_v45, %v10357_v44  ;;  %v13721_v33 = vld [vmem:[#allocation45_spill] sm:$0xff]  ;;  %v375_v15 = vpop.permute.xlu1 %374 }
 0x1ad   :  { %v10445_v48 = vrot.slane %v713_v29, %v9354_v28  ;;  %v10448_v25 = vrot.slane %v1392_v31, %v9354_v28  ;;  %v1937_v46 = vcombine.high %v13720_v40, %v13719_v12  ;;  %v1680_v50 = vcombine.low %v13721_v33, %v10406_v59  ;;  %v13722_v12 = vld [vmem:[#allocation76_spill] sm:$0xff]  ;;  %v13723_v40 = vld [vmem:[#allocation39_spill] sm:$0xff] }
 0x1ae   :  { %2667 = vmax.xlane.f32.xlu0 %v2666_v51  ;;  %v1608_v49 = vcombine.low %v10378_v16, %v10419_v30  ;;  %v2675_v37 = vsel %vm2584_vm0, %v1222_v27, -inf  ;;  %v1624_v45 = vcombine.low %v9982_v0, %v10425_v9  ;;  %v10460_v44 = vrot.slane %v1593_v57, %v9377_v32 }
 0x1af   :  { %v10463_v29 = vrot.slane %v1393_v2, %v9354_v28  ;;  %v10466_v31 = vrot.slane %v1256_v5, %v9354_v28  ;;  %v10469_v51 = vrot.slane %v1257_v36, %v9354_v28  ;;  %v1800_v1 = vcombine.low %v13723_v40, %v13722_v12  ;;  %2676 = vmax.xlane.f32.xlu1 %v2675_v37  ;;  %v13724_v36 = vld [vmem:[#allocation11_spill] sm:$0xff] }
 0x1b0   :  { %v10474_v27 = vrot.slane %v1936_v13, %v9354_v28  ;;  %v1801_v57 = vcombine.high %v13723_v40, %v13722_v12  ;;  %v2672_v17 = vsel %vm2584_vm0, %v1221_v63, -inf  ;;  %v1223_v2 = vcombine.high %v9968_v20, %v10388_v11  ;;  %v373_v63 = vpop.permute.xlu0 %372  ;;  %v379_v52 = vpop.permute.xlu1 %378 }
 0x1b1   :  { %v10482_v5 = vrot.slane %v1937_v46, %v9354_v28  ;;  %v2480_v35 = vcombine.low %v13725_v23, %v13724_v36  ;;  %v1681_v37 = vcombine.high %v13721_v33, %v10406_v59  ;;  %v10489_v13 = vrot.slane %v1680_v50, %v9354_v28  ;;  %v13726_v33 = vld [vmem:[#allocation78_spill] sm:$0xff] }
 0x1b2   :  { %2673 = vmax.xlane.f32.xlu0 %v2672_v17  ;;  %v1609_v12 = vcombine.high %v10378_v16, %v10419_v30  ;;  %v2681_v40 = vsel %vm2584_vm0, %v1624_v45, -inf  ;;  %v1626_v20 = vcombine.low %v9988_v10, %v10460_v44  ;;  %v10497_v11 = vrot.slane %v1608_v49, %v9377_v32  ;;  %v13727_v17 = vld [vmem:[#allocation41_spill] sm:$0xff] }
 0x1b3   :  { %v10500_v46 = vrot.slane %v1800_v1, %v9354_v28  ;;  %v2481_v59 = vcombine.high %v13725_v23, %v13724_v36  ;;  %v2344_v50 = vcombine.low %v13727_v17, %v13726_v33  ;;  %v2224_v30 = vcombine.low %v13728_v56, %v375_v15  ;;  %2682 = vmax.xlane.f32.xlu1 %v2681_v40 }
 0x1b4   :  { %v2345_v16 = vcombine.high %v13727_v17, %v13726_v33  ;;  %v2225_v45 = vcombine.high %v13728_v56, %v375_v15  ;;  %v2678_v49 = vsel %vm2584_vm0, %v1223_v2, -inf  ;;  %v1625_v1 = vcombine.high %v9982_v0, %v10425_v9  ;;  %v13729_v56 = vld [vmem:[#allocation48_spill] sm:$0xff] }
 0x1b5   :  { %v10514_v38 = vrot.slane %v1801_v57, %v9354_v28  ;;  %v10517_v23 = vrot.slane %v2480_v35, %v9354_v28  ;;  %v10520_v36 = vrot.slane %v1681_v37, %v9354_v28  ;;  %v1728_v40 = vcombine.low %v10360_v22, %v10489_v13 }
 0x1b6   :  { %2679 = vmax.xlane.f32.xlu0 %v2678_v49  ;;  %v2088_v15 = vcombine.low %v13729_v56, %v373_v63  ;;  %v2687_v2 = vsel %vm2584_vm0, %v1626_v20, -inf  ;;  %v1628_v0 = vcombine.low %v9994_v19, %v10497_v11  ;;  %v10529_v9 = vrot.slane %v1609_v12, %v9377_v32  ;;  %v377_v12 = vpop.permute.xlu0 %376 }
 0x1b7   :  { %v10532_v35 = vrot.slane %v2481_v59, %v9354_v28  ;;  %v10535_v57 = vrot.slane %v2344_v50, %v9354_v28  ;;  %v10538_v37 = vrot.slane %v2224_v30, %v9354_v28  ;;  %v2089_v33 = vcombine.high %v13729_v56, %v373_v63  ;;  %2688 = vmax.xlane.f32.xlu1 %v2687_v2  ;;  %v13730_v63 = vld [vmem:[#allocation49_spill] sm:$0xff]  ;;  %v383_v2 = vpop.permute.xlu1 %382 }
 0x1b8   :  { %v10542_v20 = vrot.slane %v2345_v16, %v9354_v28  ;;  %v10545_v17 = vrot.slane %v2225_v45, %v9354_v28  ;;  %v2684_v49 = vsel %vm2584_vm0, %v1625_v1, -inf  ;;  %v1627_v59 = vcombine.high %v9988_v10, %v10460_v44 }
 0x1b9   :  { %v1729_v50 = vcombine.high %v10360_v22, %v10489_v13  ;;  %v1744_v30 = vcombine.low %v10375_v54, %v10520_v36  ;;  %v864_v56 = vcombine.low %v13730_v63, %v379_v52  ;;  %v865_v16 = vcombine.high %v13730_v63, %v379_v52 }
 0x1ba   :  { %2685 = vmax.xlane.f32.xlu0 %v2684_v49  ;;  %v10557_v45 = vrot.slane %v2088_v15, %v9354_v28  ;;  %v2693_v1 = vsel %vm2584_vm0, %v1628_v0, -inf  ;;  %v1630_v10 = vcombine.low %v10006_v8, %v10529_v9  ;;  %v10563_v44 = vrot.slane %v1728_v40, %v9377_v32  ;;  %v13731_v15 = vld [vmem:[#allocation50_spill] sm:$0xff]  ;;  %v381_v0 = vpop.permute.xlu0 %380 }
 0x1bb   :  { %v1745_v22 = vcombine.high %v10375_v54, %v10520_v36  ;;  %v10570_v52 = vrot.slane %v2089_v33, %v9354_v28  ;;  %v728_v49 = vcombine.low %v13731_v15, %v377_v12  ;;  %2694 = vmax.xlane.f32.xlu1 %v2693_v1  ;;  %v2690_v40 = vsel %vm2584_vm0, %v1627_v59, -inf  ;;  %v387_v41 = vpop.permute.xlu1 %386 }
 0x1bc   :  { %v1629_v54 = vcombine.high %v9994_v19, %v10497_v11  ;;  %v10583_v33 = vrot.slane %v864_v56, %v9354_v28  ;;  %v10586_v13 = vrot.slane %v865_v16, %v9354_v28  ;;  %v729_v1 = vcombine.high %v13731_v15, %v377_v12  ;;  %v13732_v15 = vld [vmem:[#allocation51_spill] sm:$0xff] }
 0x1bd   :  { %v2136_v63 = vcombine.low %v10397_v26, %v10557_v45  ;;  %v2699_v59 = vsel %vm2584_vm0, %v1630_v10, -inf  ;;  %v1760_v19 = vcombine.low %v10012_v60, %v10563_v44  ;;  %v10595_v11 = vrot.slane %v1729_v50, %v9377_v32 }
 0x1be   :  { %2691 = vmax.xlane.f32.xlu0 %v2690_v40  ;;  %v10602_v12 = vrot.slane %v728_v49, %v9354_v28  ;;  %v1408_v40 = vcombine.low %v13732_v15, %v383_v2  ;;  %v1409_v36 = vcombine.high %v13732_v15, %v383_v2  ;;  %v2696_v50 = vsel %vm2584_vm0, %v1629_v54, -inf  ;;  %v13733_v2 = vld [vmem:[#allocation52_spill] sm:$0xff] }
 0x1bf   :  { %2700 = vmax.xlane.f32.xlu1 %v2699_v59  ;;  %v1631_v56 = vcombine.high %v10006_v8, %v10529_v9  ;;  %v10618_v6 = vrot.slane %v729_v1, %v9354_v28  ;;  %v1272_v15 = vcombine.low %v13733_v2, %v381_v0  ;;  %v2705_v54 = vsel %vm2584_vm0, %v1760_v19, -inf  ;;  %v391_v19 = vpop.permute.xlu1 %390 }
 0x1c0   :  { %v1762_v8 = vcombine.low %v10018_v43, %v10595_v11  ;;  %v10625_v9 = vrot.slane %v1744_v30, %v9377_v32  ;;  %v10632_v1 = vrot.slane %v1408_v40, %v9354_v28  ;;  %v10638_v16 = vrot.slane %v1409_v36, %v9354_v28  ;;  %v385_v30 = vpop.permute.xlu0 %384 }
 0x1c1   :  { %v2702_v10 = vsel %vm2584_vm0, %v1631_v56, -inf  ;;  %v1761_v49 = vcombine.high %v10012_v60, %v10563_v44  ;;  %v10650_v36 = vrot.slane %v1272_v15, %v9354_v28  ;;  %v1759_v44 = vrot.slane %v1745_v22, %v9377_v32 }
 0x1c2   :  { %2697 = vmax.xlane.f32.xlu0 %v2696_v50  ;;  %v1273_v50 = vcombine.high %v13733_v2, %v381_v0  ;;  %v13734_v0 = vld [vmem:[#allocation53_spill] sm:$0xff]  ;;  %v2711_v56 = vsel %vm2584_vm0, %v1762_v8, -inf  ;;  %v1764_v60 = vcombine.low %v10024_v3, %v10625_v9  ;;  %v1763_v22 = vcombine.high %v10018_v43, %v10595_v11  ;;  %v13738_v8 = vld [vmem:[#allocation14_spill] sm:$0xff] }
 0x1c3   :  { %2706 = vmax.xlane.f32.xlu1 %v2705_v54  ;;  %v1952_v2 = vcombine.low %v13734_v0, %v387_v41  ;;  %v1953_v54 = vcombine.high %v13734_v0, %v387_v41  ;;  %v2708_v55 = vsel %vm2584_vm0, %v1761_v49, -inf  ;;  %v1766_v43 = vcombine.low %v10033_v7, %v1759_v44 }
 0x1c4   :  { %v10661_v41 = vrot.slane %v1273_v50, %v9354_v28  ;;  %v2717_v49 = vsel %vm2584_vm0, %v1764_v60, -inf  ;;  %v2144_v11 = vrot.slane %v2136_v63, %v9377_v32  ;;  %v2714_v63 = vsel %vm2584_vm0, %v1763_v22, -inf }
 0x1c5   :  { %v10673_v40 = vrot.slane %v1952_v2, %v9354_v28  ;;  %v10676_v50 = vrot.slane %v1953_v54, %v9354_v28  ;;  %v1765_v2 = vcombine.high %v10024_v3, %v10625_v9  ;;  %v2723_v22 = vsel %vm2584_vm0, %v1766_v43, -inf }
 0x1c6   :  { %2703 = vmax.xlane.f32.xlu0 %v2702_v10  ;;  %v13735_v10 = vld [vmem:[#allocation54_spill] sm:$0xff]  ;;  %v13739_v3 = vcombine.high %v10397_v26, %v10557_v45  ;;  %v1767_v45 = vcombine.high %v10033_v7, %v1759_v44 }
 0x1c7   :  { %v1816_v15 = vcombine.low %v13735_v10, %v385_v30  ;;  %2712 = vmax.xlane.f32.xlu1 %v2711_v56  ;;  %v1817_v0 = vcombine.high %v13735_v10, %v385_v30  ;;  %v13736_v56 = vld [vmem:[#allocation55_spill] sm:$0xff]  ;;  %v389_v10 = vpop.permute.xlu0 %388  ;;  %v2168_v30 = vcombine.low %v13738_v8, %v2144_v11  ;;  %v2720_v26 = vsel %vm2584_vm0, %v1765_v2, -inf  ;;  %v13741_v44 = vld [vmem:[#allocation42_spill] sm:$0xff] }
 0x1c8   :  { %v2496_v61 = vcombine.low %v13736_v56, %v391_v19  ;;  %v2151_v9 = vrot.slane %v13739_v3, %v9377_v32  ;;  %v2726_v54 = vsel %vm2584_vm0, %v1767_v45, -inf }
 0x1c9   :  { %v10689_v59 = vrot.slane %v1816_v15, %v9354_v28  ;;  %v10695_v60 = vrot.slane %v1817_v0, %v9354_v28  ;;  %v2729_v7 = vsel %vm2584_vm0, %v2168_v30, -inf  ;;  %v13743_v30 = vcombine.low %v10391_v18, %v10538_v37 }
 0x1ca   :  { %2709 = vmax.xlane.f32.xlu0 %v2708_v55  ;;  %v2497_v55 = vcombine.high %v13736_v56, %v391_v19  ;;  %v10705_v19 = vrot.slane %v2496_v61, %v9354_v28  ;;  %v13737_v56 = vld [vmem:[#allocation56_spill] sm:$0xff] }
 0x1cb   :  { %2718 = vmax.xlane.f32.xlu1 %v2717_v49  ;;  %v2360_v49 = vcombine.low %v13737_v56, %v389_v10  ;;  %v2361_v0 = vcombine.high %v13737_v56, %v389_v10  ;;  %v13740_v10 = vcombine.low %v10402_v62, %v10570_v52  ;;  %v2280_v2 = vrot.slane %v13743_v30, %v9377_v32 }
 0x1cd   :  { %v10735_v15 = vrot.slane %v2360_v49, %v9354_v28  ;;  %v2160_v56 = vrot.slane %v13740_v10, %v9377_v32  ;;  %v10754_v10 = vrot.slane %v2361_v0, %v9354_v28  ;;  %v13748_v49 = vld [vmem:[#allocation24_spill] sm:$0xff] }
 0x1ce   :  { %2715 = vmax.xlane.f32.xlu0 %v2714_v63  ;;  %v10721_v63 = vrot.slane %v2497_v55, %v9354_v28  ;;  %v13742_v55 = vcombine.high %v10402_v62, %v10570_v52  ;;  %v2169_v62 = vcombine.high %v13738_v8, %v2144_v11  ;;  %v2171_v52 = vcombine.high %v13741_v44, %v2151_v9  ;;  %v13746_v11 = vld [vmem:[#allocation15_spill] sm:$0xff]  ;;  %v13750_v0 = vld [vmem:[#allocation16_spill] sm:$0xff] }
 0x1cf   :  { %2724 = vmax.xlane.f32.xlu1 %v2723_v22  ;;  %v2170_v22 = vcombine.low %v13741_v44, %v2151_v9  ;;  %v2305_v28 = vcombine.high %v13748_v49, %v2280_v2 }
 0x1d0   :  { %v2167_v3 = vrot.slane %v13742_v55, %v9377_v32  ;;  %v13744_v55 = vcombine.high %v10391_v18, %v10538_v37  ;;  %v13747_v18 = vcombine.low %v10394_v34, %v10545_v17 }
 0x1d1   :  { %v2735_v8 = vsel %vm2584_vm0, %v2170_v22, -inf  ;;  %v13749_v22 = vcombine.high %v10394_v34, %v10545_v17  ;;  %v13751_v34 = vcombine.low %v10437_v39, %v10602_v12 }
 0x1d2   :  { %2721 = vmax.xlane.f32.xlu0 %v2720_v26  ;;  %v2287_v26 = vrot.slane %v13744_v55, %v9377_v32  ;;  %v2174_v9 = vcombine.low %v13746_v11, %v2167_v3  ;;  %v2175_v44 = vcombine.high %v13746_v11, %v2167_v3  ;;  %v2296_v37 = vrot.slane %v13747_v18, %v9377_v32 }
 0x1d3   :  { %2730 = vmax.xlane.f32.xlu1 %v2729_v7  ;;  %v13745_v7 = vld [vmem:[#allocation23_spill] sm:$0xff]  ;;  %v2732_v3 = vsel %vm2584_vm0, %v2169_v62, -inf  ;;  %v2738_v11 = vsel %vm2584_vm0, %v2171_v52, -inf  ;;  %v784_v17 = vrot.slane %v13751_v34, %v9377_v32  ;;  %v2756_v34 = vsel %vm2584_vm0, %v2305_v28, -inf }
 0x1d4   :  { %v2172_v30 = vcombine.low %v13745_v7, %v2160_v56  ;;  %v2173_v45 = vcombine.high %v13745_v7, %v2160_v56  ;;  %v2304_v56 = vcombine.low %v13748_v49, %v2280_v2  ;;  %v2303_v7 = vrot.slane %v13749_v22, %v9377_v32  ;;  %v13752_v22 = vld [vmem:[#allocation57_spill] sm:$0xff] }
 0x1d5   :  { %v2306_v18 = vcombine.low %v13750_v0, %v2287_v26  ;;  %v2747_v62 = vsel %vm2584_vm0, %v2174_v9, -inf  ;;  %v2750_v52 = vsel %vm2584_vm0, %v2175_v44, -inf  ;;  %v2308_v43 = vcombine.low %v13752_v22, %v2296_v37 }
 0x1d6   :  { %2727 = vmax.xlane.f32.xlu0 %v2726_v54  ;;  %v2741_v55 = vsel %vm2584_vm0, %v2172_v30, -inf  ;;  %v2307_v54 = vcombine.high %v13750_v0, %v2287_v26  ;;  %v13753_v2 = vcombine.high %v10437_v39, %v10602_v12  ;;  %v2753_v30 = vsel %vm2584_vm0, %v2304_v56, -inf  ;;  %v13754_v26 = vld [vmem:[#allocation27_spill] sm:$0xff] }
 0x1d7   :  { %2736 = vmax.xlane.f32.xlu1 %v2735_v8  ;;  %v2744_v8 = vsel %vm2584_vm0, %v2173_v45, -inf  ;;  %v2310_v0 = vcombine.low %v13754_v26, %v2303_v7  ;;  %v2309_v45 = vcombine.high %v13752_v22, %v2296_v37  ;;  %v13755_v9 = vcombine.low %v10445_v48, %v10618_v6  ;;  %v13757_v37 = vld [vmem:[#allocation25_spill] sm:$0xff] }
 0x1d8   :  { %v791_v49 = vrot.slane %v13753_v2, %v9377_v32  ;;  %v2759_v44 = vsel %vm2584_vm0, %v2306_v18, -inf  ;;  %v2311_v61 = vcombine.high %v13754_v26, %v2303_v7  ;;  %v13756_v39 = vcombine.high %v10445_v48, %v10618_v6  ;;  %v13759_v2 = vld [vmem:[#allocation17_spill] sm:$0xff] }
 0x1d9   :  { %v808_v56 = vcombine.low %v13757_v37, %v784_v17  ;;  %v809_v22 = vcombine.high %v13757_v37, %v784_v17  ;;  %v13758_v18 = vcombine.low %v10412_v14, %v10583_v33  ;;  %v2765_v7 = vsel %vm2584_vm0, %v2308_v43, -inf }
 0x1da   :  { %2733 = vmax.xlane.f32.xlu0 %v2732_v3  ;;  %v800_v3 = vrot.slane %v13755_v9, %v9377_v32  ;;  %v807_v12 = vrot.slane %v13756_v39, %v9377_v32  ;;  %v810_v26 = vcombine.low %v13759_v2, %v791_v49  ;;  %v811_v6 = vcombine.high %v13759_v2, %v791_v49  ;;  %v13761_v9 = vld [vmem:[#allocation26_spill] sm:$0xff] }
 0x1db   :  { %2742 = vmax.xlane.f32.xlu1 %v2741_v55  ;;  %v10822_v55 = vsel %vm2584_vm0, %v2307_v54, -inf  ;;  %v920_v28 = vrot.slane %v13758_v18, %v9377_v32  ;;  %v13760_v48 = vcombine.high %v10412_v14, %v10583_v33  ;;  %v10841_v17 = vsel %vm2584_vm0, %v2309_v45, -inf  ;;  %v13763_v45 = vld [vmem:[#allocation18_spill] sm:$0xff] }
 0x1dc   :  { %v812_v39 = vcombine.low %v13761_v9, %v800_v3  ;;  %v813_v43 = vcombine.high %v13761_v9, %v800_v3  ;;  %v10846_v37 = vsel %vm2584_vm0, %v2311_v61, -inf  ;;  %v814_v49 = vcombine.low %v10128_v24, %v807_v12 }
 0x1dd   :  { %v927_v54 = vrot.slane %v13760_v48, %v9377_v32  ;;  %v815_v18 = vcombine.high %v10128_v24, %v807_v12  ;;  %v13762_v14 = vcombine.low %v10428_v21, %v10586_v13  ;;  %v944_v3 = vcombine.low %v13763_v45, %v920_v28 }
 0x1de   :  { %2739 = vmax.xlane.f32.xlu0 %v2738_v11  ;;  %v10838_v11 = vsel %vm2584_vm0, %v2310_v0, -inf  ;;  %v10858_v0 = vsel %vm2584_vm0, %v809_v22, -inf  ;;  %v945_v61 = vcombine.high %v13763_v45, %v920_v28  ;;  %v10863_v2 = vsel %vm2584_vm0, %v810_v26, -inf }
 0x1df   :  { %2748 = vmax.xlane.f32.xlu1 %v2747_v62  ;;  %v936_v33 = vrot.slane %v13762_v14, %v9377_v32  ;;  %v10855_v62 = vsel %vm2584_vm0, %v808_v56, -inf  ;;  %v10866_v24 = vsel %vm2584_vm0, %v811_v6, -inf  ;;  %v946_v12 = vcombine.low %v10140_v42, %v927_v54 }
 0x1e0   :  { %v10874_v22 = vsel %vm2584_vm0, %v812_v39, -inf  ;;  %v10877_v48 = vsel %vm2584_vm0, %v813_v43, -inf  ;;  %v13765_v28 = vcombine.low %v10466_v31, %v10650_v36  ;;  %v13766_v6 = vcombine.high %v10466_v31, %v10650_v36 }
 0x1e1   :  { %v947_v39 = vcombine.high %v10140_v42, %v927_v54  ;;  %v10896_v43 = vsel %vm2584_vm0, %v944_v3, -inf  ;;  %v10899_v14 = vsel %vm2584_vm0, %v945_v61, -inf  ;;  %v949_v31 = vcombine.high %v10146_v53, %v936_v33 }
 0x1e2   :  { %2745 = vmax.xlane.f32.xlu0 %v2744_v8  ;;  %v13764_v8 = vcombine.high %v10428_v21, %v10586_v13  ;;  %v1328_v26 = vrot.slane %v13765_v28, %v9377_v32  ;;  %v1335_v9 = vrot.slane %v13766_v6, %v9377_v32  ;;  %v10888_v21 = vsel %vm2584_vm0, %v814_v49, -inf }
 0x1e3   :  { %2754 = vmax.xlane.f32.xlu1 %v2753_v30  ;;  %v10891_v13 = vsel %vm2584_vm0, %v815_v18, -inf  ;;  %v948_v30 = vcombine.low %v10146_v53, %v936_v33  ;;  %v13767_v36 = vcombine.low %v10469_v51, %v10661_v41  ;;  %v10907_v18 = vsel %vm2584_vm0, %v946_v12, -inf }
 0x1e4   :  { %v943_v56 = vrot.slane %v13764_v8, %v9377_v32  ;;  %v1352_v53 = vcombine.low %v10163_v58, %v1328_v26  ;;  %v1354_v33 = vcombine.low %v10169_v4, %v1335_v9  ;;  %v1353_v3 = vcombine.high %v10163_v58, %v1328_v26 }
 0x1e5   :  { %v1344_v49 = vrot.slane %v13767_v36, %v9377_v32  ;;  %v13769_v61 = vcombine.low %v10448_v25, %v10632_v1  ;;  %v10923_v8 = vsel %vm2584_vm0, %v948_v30, -inf  ;;  %v10934_v58 = vsel %vm2584_vm0, %v949_v31, -inf }
 0x1e6   :  { %2751 = vmax.xlane.f32.xlu0 %v2750_v52  ;;  %v950_v45 = vcombine.low %v10155_v47, %v943_v56  ;;  %v951_v42 = vcombine.high %v10155_v47, %v943_v56  ;;  %v13768_v52 = vcombine.high %v10469_v51, %v10661_v41  ;;  %v10926_v47 = vsel %vm2584_vm0, %v947_v39, -inf  ;;  %v13771_v56 = vld [vmem:[#allocation44_spill] sm:$0xff] }
 0x1e7   :  { %2760 = vmax.xlane.f32.xlu1 %v2759_v44  ;;  %v1464_v12 = vrot.slane %v13769_v61, %v9377_v32  ;;  %v1355_v51 = vcombine.high %v10169_v4, %v1335_v9  ;;  %v13770_v41 = vcombine.high %v10448_v25, %v10632_v1  ;;  %v1356_v28 = vcombine.low %v13771_v56, %v1344_v49  ;;  %v13773_v25 = vld [vmem:[#allocation59_spill] sm:$0xff] }
 0x1e8   :  { %v1351_v54 = vrot.slane %v13768_v52, %v9377_v32  ;;  %v1357_v26 = vcombine.high %v13771_v56, %v1344_v49  ;;  %v13772_v6 = vcombine.low %v10463_v29, %v10638_v16  ;;  %v10943_v4 = vsel %vm2584_vm0, %v950_v45, -inf  ;;  %v13774_v49 = vld [vmem:[#allocation29_spill] sm:$0xff] }
 0x1e9   :  { %v1471_v44 = vrot.slane %v13770_v41, %v9377_v32  ;;  %v10946_v9 = vsel %vm2584_vm0, %v951_v42, -inf  ;;  %v10951_v39 = vsel %vm2584_vm0, %v1352_v53, -inf  ;;  %v10954_v31 = vsel %vm2584_vm0, %v1354_v33, -inf  ;;  %v13775_v42 = vld [vmem:[#allocation77_spill] sm:$0xff] }
 0x1ea   :  { %2757 = vmax.xlane.f32.xlu0 %v2756_v34  ;;  %v1480_v30 = vrot.slane %v13772_v6, %v9377_v32  ;;  %v1358_v1 = vcombine.low %v13773_v25, %v1351_v54  ;;  %v1359_v34 = vcombine.high %v13773_v25, %v1351_v54  ;;  %v10957_v36 = vsel %vm2584_vm0, %v1353_v3, -inf  ;;  %v13777_v3 = vld [vmem:[#allocation80_spill] sm:$0xff] }
 0x1eb   :  { %2766 = vmax.xlane.f32.xlu1 %v2765_v7  ;;  %v1488_v45 = vcombine.low %v13774_v49, %v1464_v12  ;;  %v10961_v52 = vsel %vm2584_vm0, %v1355_v51, -inf  ;;  %v1490_v61 = vcombine.low %v13775_v42, %v1471_v44  ;;  %v1489_v41 = vcombine.high %v13774_v49, %v1464_v12 }
 0x1ec   :  { %v13776_v7 = vcombine.high %v10463_v29, %v10638_v16  ;;  %v10971_v53 = vsel %vm2584_vm0, %v1356_v28, -inf  ;;  %v10974_v33 = vsel %vm2584_vm0, %v1357_v26, -inf  ;;  %v1492_v51 = vcombine.low %v13777_v3, %v1480_v30 }
 0x1ed   :  { %v1491_v56 = vcombine.high %v13775_v42, %v1471_v44  ;;  %v10979_v6 = vsel %vm2584_vm0, %v1358_v1, -inf  ;;  %v10982_v12 = vsel %vm2584_vm0, %v1359_v34, -inf  ;;  %v13778_v29 = vcombine.low %v10500_v46, %v10689_v59 }
 0x1ee   :  { %v1487_v54 = vrot.slane %v13776_v7, %v9377_v32  ;;  %2763 = vmax.xlane.f32.xlu0 %v10822_v55  ;;  %v13779_v55 = vcombine.high %v10500_v46, %v10689_v59  ;;  %v10994_v44 = vsel %vm2584_vm0, %v1488_v45, -inf  ;;  %v1493_v26 = vcombine.high %v13777_v3, %v1480_v30  ;;  %v13787_v3 = vld [vmem:[#allocation81_spill] sm:$0xff] }
 0x1ef   :  { %v1872_v16 = vrot.slane %v13778_v29, %v9377_v32  ;;  %2772 = vmax.xlane.f32.xlu1 %v10838_v11  ;;  %v13780_v25 = vcombine.low %v10514_v38, %v10695_v60  ;;  %v13781_v34 = vcombine.high %v10514_v38, %v10695_v60  ;;  %v11006_v46 = vsel %vm2584_vm0, %v1490_v61, -inf  ;;  %v13782_v11 = vld [vmem:[#allocation64_spill] sm:$0xff] }
 0x1f0   :  { %v1879_v28 = vrot.slane %v13779_v55, %v9377_v32  ;;  %v11009_v59 = vsel %vm2584_vm0, %v1489_v41, -inf  ;;  %v1494_v45 = vcombine.low %v13782_v11, %v1487_v54  ;;  %v13783_v30 = vcombine.low %v10474_v27, %v10673_v40  ;;  %v13788_v55 = vld [vmem:[#allocation43_spill] sm:$0xff] }
 0x1f1   :  { %v1888_v1 = vrot.slane %v13780_v25, %v9377_v32  ;;  %v1895_v49 = vrot.slane %v13781_v34, %v9377_v32  ;;  %v11018_v7 = vsel %vm2584_vm0, %v1492_v51, -inf  ;;  %v11021_v38 = vsel %vm2584_vm0, %v1491_v56, -inf  ;;  %v13791_v56 = vld [vmem:[#allocation19_spill] sm:$0xff] }
 0x1f2   :  { %v2008_v42 = vrot.slane %v13783_v30, %v9377_v32  ;;  %2769 = vmax.xlane.f32.xlu0 %v10841_v17  ;;  %13784 = vst [vmem:[#allocation12_spill] sm:$0xff] %v11018_v7  ;;  %13785 = vst [vmem:[#allocation21_spill] sm:$0xff] %v11021_v38  ;;  %v1495_v60 = vcombine.high %v13782_v11, %v1487_v54  ;;  %v13786_v61 = vcombine.high %v10474_v27, %v10673_v40  ;;  %v13792_v40 = vld [vmem:[#allocation65_spill] sm:$0xff] }
 0x1f3   :  { %v1896_v29 = vcombine.low %v13787_v3, %v1872_v16  ;;  %v1898_v25 = vcombine.low %v13788_v55, %v1879_v28  ;;  %v1897_v34 = vcombine.high %v13787_v3, %v1872_v16  ;;  %v13789_v17 = vcombine.low %v10482_v5, %v10676_v50  ;;  %2778 = vmax.xlane.f32.xlu1 %v10855_v62  ;;  %v13794_v16 = vld [vmem:[#allocation83_spill] sm:$0xff] }
 0x1f4   :  { %v2015_v41 = vrot.slane %v13786_v61, %v9377_v32  ;;  %v11039_v54 = vsel %vm2584_vm0, %v1493_v26, -inf  ;;  %v1900_v27 = vcombine.low %v13791_v56, %v1888_v1  ;;  %v1902_v11 = vcombine.low %v13792_v40, %v1895_v49  ;;  %v13796_v26 = vld [vmem:[#allocation66_spill] sm:$0xff] }
 0x1f5   :  { %v11035_v51 = vrot.slane %v13789_v17, %v9377_v32  ;;  %13790 = vst [vmem:[#allocation73_spill] sm:$0xff] %v11039_v54  ;;  %v1899_v30 = vcombine.high %v13788_v55, %v1879_v28  ;;  %v11045_v61 = vsel %vm2584_vm0, %v1494_v45, -inf  ;;  %v2032_v3 = vcombine.low %v13794_v16, %v2008_v42 }
 0x1f6   :  { %13793 = vst [vmem:[#allocation13_spill] sm:$0xff] %v11045_v61  ;;  %v1901_v38 = vcombine.high %v13791_v56, %v1888_v1  ;;  %v1903_v17 = vcombine.high %v13792_v40, %v1895_v49  ;;  %2775 = vmax.xlane.f32.xlu0 %v10846_v37  ;;  %v11052_v62 = vsel %vm2584_vm0, %v1495_v60, -inf  ;;  %v2034_v54 = vcombine.low %v13796_v26, %v2015_v41  ;;  %v13801_v49 = vld [vmem:[#allocation84_spill] sm:$0xff] }
 0x1f7   :  { %13795 = vst [vmem:[#allocation46_spill] sm:$0xff] %v11052_v62  ;;  %v2033_v7 = vcombine.high %v13794_v16, %v2008_v42  ;;  %v13797_v28 = vcombine.high %v10482_v5, %v10676_v50  ;;  %v11063_v55 = vsel %vm2584_vm0, %v1896_v29, -inf  ;;  %v11066_v1 = vsel %vm2584_vm0, %v1898_v25, -inf  ;;  %2784 = vmax.xlane.f32.xlu1 %v10863_v2  ;;  %v13810_v40 = vld [vmem:[#allocation60_spill] sm:$0xff] }
 0x1f8   :  { %13798 = vst [vmem:[#allocation62_spill] sm:$0xff] %v11063_v55  ;;  %13799 = vst [vmem:[#allocation30_spill] sm:$0xff] %v11066_v1  ;;  %v11069_v37 = vsel %vm2584_vm0, %v1897_v34, -inf  ;;  %v2036_v60 = vcombine.low %v13801_v49, %v11035_v51  ;;  %v11075_v42 = vsel %vm2584_vm0, %v1900_v27, -inf  ;;  %v11078_v5 = vsel %vm2584_vm0, %v1902_v11, -inf }
 0x1f9   :  { %v11060_v45 = vrot.slane %v13797_v28, %v9377_v32  ;;  %13800 = vst [vmem:[#allocation22_spill] sm:$0xff] %v11069_v37  ;;  %13802 = vst [vmem:[#allocation61_spill] sm:$0xff] %v11075_v42  ;;  %v11081_v50 = vsel %vm2584_vm0, %v1899_v30, -inf  ;;  %v11084_v29 = vsel %vm2584_vm0, %v2032_v3, -inf  ;;  %v11087_v25 = vsel %vm2584_vm0, %v1901_v38, -inf }
 0x1fa   :  { %13803 = vst [vmem:[#allocation31_spill] sm:$0xff] %v11078_v5  ;;  %13804 = vst [vmem:[#allocation71_spill] sm:$0xff] %v11081_v50  ;;  %v11090_v34 = vsel %vm2584_vm0, %v1903_v17, -inf  ;;  %v2035_v2 = vcombine.high %v13796_v26, %v2015_v41  ;;  %2781 = vmax.xlane.f32.xlu0 %v10858_v0  ;;  %v11095_v56 = vsel %vm2584_vm0, %v2034_v54, -inf  ;;  %v11098_v27 = vsel %vm2584_vm0, %v2033_v7, -inf  ;;  %v13813_v41 = vld [vmem:[#allocation58_spill] sm:$0xff] }
 0x1fb   :  { %13805 = vst [vmem:[#allocation32_spill] sm:$0xff] %v11084_v29  ;;  %13806 = vst [vmem:[#allocation63_spill] sm:$0xff] %v11087_v25  ;;  %v2038_v11 = vcombine.low %v13810_v40, %v11060_v45  ;;  %v13811_v38 = vcombine.low %v10535_v57, %v10735_v15  ;;  %v11109_v16 = vsel %vm2584_vm0, %v2036_v60, -inf  ;;  %v2037_v0 = vcombine.high %v13801_v49, %v11035_v51  ;;  %v2590_v51 = vpop.xlane.xlu1 %2589  ;;  %v2587_v49 = vpop.xlane.xlu0 %2586 }
 0x1fc   :  { %13807 = vst [vmem:[#allocation33_spill] sm:$0xff] %v11090_v34  ;;  %13808 = vst [vmem:[#allocation75_spill] sm:$0xff] %v11095_v56  ;;  %v11114_v54 = vsub.s32 0, %v13813_v41  ;;  %v8992_v7 = vmov 1966171168   ;;  %2790 = vmax.xlane.f32.xlu1 %v10874_v22  ;;  %v11118_v17 = vsub.s32 1, %v13813_v41  ;;  %v13816_v29 = vcombine.high %v10535_v57, %v10735_v15 }
 0x1fd   :  { %13809 = vst [vmem:[#allocation34_spill] sm:$0xff] %v11098_v27  ;;  %v11106_v30 = vrot.slane %v13811_v38, %v9377_v32  ;;  %13812 = vst [vmem:[#allocation67_spill] sm:$0xff] %v11109_v16  ;;  %v5150_v3 = vunpack.c.l.s4 %v8992_v7  ;;  %v11121_v26 = vsub.s32 2, %v13813_v41  ;;  %v11124_v28 = vsub.s32 3, %v13813_v41  ;;  %v13815_v56 = vld [vmem:[#allocation28_spill] sm:$0xff] }
 0x1fe   :  { %v11127_v60 = vsub.s32 4, %v13813_v41  ;;  %v11130_v38 = vsub.s32 5, %v13813_v41  ;;  %v11133_v7 = vsub.s32 6, %v13813_v41  ;;  %v11136_v22 = vsub.s32 7, %v13813_v41  ;;  %2787 = vmax.xlane.f32.xlu0 %v10866_v24 }
 0x1ff   :  { %v2969_v16 = vmax.f32 %v2587_v49, %v2590_v51  ;;  %v11140_v27 = vsel %vm2584_vm0, %v2035_v2, -inf  ;;  %v2440_v34 = vcombine.low %v13815_v56, %v11106_v30  ;;  %v2423_v25 = vrot.slane %v13816_v29, %v9377_v32 }
 0x200   :  { %13814 = vst [vmem:[#allocation35_spill] sm:$0xff] %v11140_v27  ;;  %v8993_v5 = vmov 0   ;;  %v2039_v50 = vcombine.high %v13810_v40, %v11060_v45  ;;  %v13817_v24 = vcombine.low %v10542_v20, %v10754_v10  ;;  %v13818_v2 = vcombine.high %v10542_v20, %v10754_v10  ;;  %2796 = vmax.xlane.f32.xlu1 %v10888_v21 }
 0x201   :  { %8903 = vset.pattern.permute.xlu1 %v8993_v5  ;;  %v5151_v27 = vunpack.c.0.s8 %v5150_v3  ;;  %8904 = vset.pattern.permute.xlu0 %v8993_v5  ;;  %v3100_v57 = vrot.slane %v2969_v16, %v11114_v54  ;;  %v3104_v15 = vrot.slane %v2969_v16, %v11118_v17  ;;  %v3108_v45 = vrot.slane %v2969_v16, %v11121_v26  ;;  %v13821_v5 = vld [vmem:[#allocation70_spill] sm:$0xff] }
 0x202   :  { %v2432_v51 = vrot.slane %v13817_v24, %v9377_v32  ;;  %v2439_v49 = vrot.slane %v13818_v2, %v9377_v32  ;;  %v3112_v29 = vrot.slane %v2969_v16, %v11124_v28  ;;  %v3116_v40 = vrot.slane %v2969_v16, %v11127_v60  ;;  %2793 = vmax.xlane.f32.xlu0 %v10877_v48 }
 0x203   :  { %v3120_v24 = vrot.slane %v2969_v16, %v11130_v38  ;;  %v3124_v42 = vrot.slane %v2969_v16, %v11133_v7  ;;  %v3128_v20 = vrot.slane %v2969_v16, %v11136_v22  ;;  %v11169_v10 = vsel %vm2584_vm0, %v2038_v11, -inf }
 0x204   :  { %13819 = vst [vmem:[#allocation79_spill] sm:$0xff] %v11169_v10  ;;  %v11172_v21 = vsel %vm2584_vm0, %v2037_v0, -inf  ;;  %v2442_v3 = vcombine.low %v13821_v5, %v2423_v25  ;;  %v13822_v2 = vcombine.low %v10517_v23, %v10705_v19  ;;  %v13823_v1 = vcombine.high %v10517_v23, %v10705_v19  ;;  %2802 = vmax.xlane.f32.xlu1 %v10896_v43  ;;  %v2599_v0 = vpop.xlane.xlu1 %2598  ;;  %v13824_v19 = vld [vmem:[#allocation85_spill] sm:$0xff]  ;;  %v13826_v43 = vld [vmem:[#allocation86_spill] sm:$0xff] }
 0x205   :  { %13820 = vst [vmem:[#allocation36_spill] sm:$0xff] %v11172_v21  ;;  %v5145_v48 = vcombine.low %v3100_v57, %v3104_v15  ;;  %v5146_v62 = vcombine.low %v3108_v45, %v3112_v29  ;;  %v11186_v11 = vsub.s32 %v5151_v27, %v13813_v41  ;;  %v2593_v21 = vpop.xlane.xlu0 %2592  ;;  %v11190_v10 = vsel %vm2584_vm0, %v2440_v34, -inf  ;;  %v13825_v57 = vld [vmem:[#allocation72_spill] sm:$0xff] }
 0x206   :  { %v2552_v37 = vrot.slane %v13822_v2, %v9377_v32  ;;  %v11183_v16 = vrot.slane %v13823_v1, %v9377_v32  ;;  %v2441_v2 = vcombine.high %v13815_v56, %v11106_v30  ;;  %v5147_v55 = vcombine.low %v3116_v40, %v3120_v24  ;;  %2799 = vmax.xlane.f32.xlu0 %v10891_v13  ;;  %v13828_v30 = vld [vmem:[#allocation68_spill] sm:$0xff] }
 0x207   :  { %v5148_v61 = vcombine.low %v3124_v42, %v3128_v20  ;;  %v11195_v23 = vsel %vm2584_vm0, %v2039_v50, -inf  ;;  %v2444_v1 = vcombine.low %v13824_v19, %v2432_v51  ;;  %v2446_v27 = vcombine.low %v13825_v57, %v2439_v49 }
 0x208   :  { %v2443_v15 = vcombine.high %v13821_v5, %v2423_v25  ;;  %v2576_v45 = vcombine.low %v13826_v43, %v2552_v37  ;;  %v2445_v34 = vcombine.high %v13824_v19, %v2432_v51  ;;  %v2447_v29 = vcombine.high %v13825_v57, %v2439_v49  ;;  %2808 = vmax.xlane.f32.xlu1 %v10907_v18 }
 0x209   :  { %v13827_v42 = vcombine.low %v10532_v35, %v10721_v63  ;;  %v11211_v56 = vsel %vm2584_vm0, %v2442_v3, -inf  ;;  %v2578_v25 = vcombine.low %v13828_v30, %v11183_v16  ;;  %v5155_v13 = vrot.slane %v5145_v48, %v11186_v11 }
 0x20a   :  { %v5162_v40 = vrot.slane %v5146_v62, %v11186_v11  ;;  %v2577_v51 = vcombine.high %v13826_v43, %v2552_v37  ;;  %v13829_v49 = vcombine.high %v10532_v35, %v10721_v63  ;;  %v5169_v20 = vrot.slane %v5147_v55, %v11186_v11  ;;  %2805 = vmax.xlane.f32.xlu0 %v10899_v14  ;;  %v2596_v35 = vpop.xlane.xlu0 %2595  ;;  %v13832_v37 = vld [vmem:[#allocation20_spill] sm:$0xff]  ;;  %v13835_v43 = vld [vmem:[#allocation69_spill] sm:$0xff] }
 0x20b   :  { %v11208_v50 = vrot.slane %v13827_v42, %v9377_v32  ;;  %v5176_v5 = vrot.slane %v5148_v61, %v11186_v11  ;;  %v11228_v3 = vsel %vm2584_vm0, %v2444_v1, -inf  ;;  %v11231_v48 = vsel %vm2584_vm0, %v2441_v2, -inf }
 0x20c   :  { %v11223_v24 = vrot.slane %v13829_v49, %v9377_v32  ;;  %v11234_v18 = vsel %vm2584_vm0, %v2446_v27, -inf  ;;  %v11237_v62 = vsel %vm2584_vm0, %v2443_v15, -inf  ;;  %v2605_v32 = vpop.xlane.xlu1 %2604  ;;  %v11241_v63 = vsel %vm2584_vm0, %v2576_v45, -inf  ;;  %2814 = vmax.xlane.f32.xlu1 %v10923_v8 }
 0x20d   :  { %13830 = vst [vmem:[#allocation74_spill] sm:$0xff] %v11241_v63  ;;  %v11244_v61 = vsel %vm2584_vm0, %v2445_v34, -inf  ;;  %v11247_v55 = vsel %vm2584_vm0, %v2447_v29, -inf  ;;  %v2580_v2 = vcombine.low %v13832_v37, %v11208_v50  ;;  %v2970_v19 = vmax.f32 %v2593_v21, %v2596_v35 }
 0x20e   :  { %13831 = vst [vmem:[#allocation37_spill] sm:$0xff] %v11247_v55  ;;  %v11255_v57 = vcombine.low %v5155_v13, %v5162_v40  ;;  %v11259_v27 = vsel %vm2584_vm0, %v2578_v25, -inf  ;;  %v11262_v15 = vsel %vm2584_vm0, %v2577_v51, -inf  ;;  %v11266_v21 = vcombine.low %v5169_v20, %v5176_v5  ;;  %2811 = vmax.xlane.f32.xlu0 %v10926_v47  ;;  %v2602_v8 = vpop.xlane.xlu0 %2601 }
 0x20f   :  { %13833 = vst [vmem:[#allocation82_spill] sm:$0xff] %v11259_v27  ;;  %13834 = vst [vmem:[#allocation38_spill] sm:$0xff] %v11262_v15  ;;  %v3132_v34 = vrot.slane %v2970_v19, %v11114_v54  ;;  %v3136_v29 = vrot.slane %v2970_v19, %v11118_v17  ;;  %v3140_v42 = vrot.slane %v2970_v19, %v11121_v26  ;;  %v11274_v25 = vsel %vm2584_vm0, %v2580_v2, -inf }
 0x210   :  { %v3144_v13 = vrot.slane %v2970_v19, %v11124_v28  ;;  %13836 = vst [vmem:[#allocation45_spill] sm:$0xff] %v11274_v25  ;;  %v3148_v51 = vrot.slane %v2970_v19, %v11127_v60  ;;  %v3152_v49 = vrot.slane %v2970_v19, %v11130_v38  ;;  %v2971_v20 = vmax.f32 %v2599_v0, %v2602_v8  ;;  %v2611_v47 = vpop.xlane.xlu1 %2610 }
 0x211   :  { %v3156_v35 = vrot.slane %v2970_v19, %v11133_v7  ;;  %v3160_v14 = vrot.slane %v2970_v19, %v11136_v22  ;;  %2820 = vmax.xlane.f32.xlu1 %v10943_v4  ;;  %v11287_v45 = vcombine.low %v3132_v34, %v3136_v29 }
 0x212   :  { %v11289_v40 = vcombine.low %v3140_v42, %v3144_v13  ;;  %v11291_v1 = vcombine.low %v3148_v51, %v3152_v49  ;;  %v3164_v0 = vrot.slane %v2971_v20, %v11114_v54  ;;  %v3168_v8 = vrot.slane %v2971_v20, %v11118_v17  ;;  %2817 = vmax.xlane.f32.xlu0 %v10934_v58  ;;  %v2608_v4 = vpop.xlane.xlu0 %2607 }
 0x213   :  { %v3172_v5 = vrot.slane %v2971_v20, %v11121_v26  ;;  %v3176_v19 = vrot.slane %v2971_v20, %v11124_v28  ;;  %v3180_v41 = vrot.slane %v2971_v20, %v11127_v60  ;;  %v3184_v34 = vrot.slane %v2971_v20, %v11130_v38 }
 0x214   :  { %v3188_v29 = vrot.slane %v2971_v20, %v11133_v7  ;;  %v3192_v42 = vrot.slane %v2971_v20, %v11136_v22  ;;  %v2972_v13 = vmax.f32 %v2605_v32, %v2608_v4  ;;  %v5243_v51 = vcombine.low %v3164_v0, %v3168_v8  ;;  %v2617_v25 = vpop.xlane.xlu1 %2616 }
 0x215   :  { %v5244_v49 = vcombine.low %v3172_v5, %v3176_v19  ;;  %v11302_v2 = vcombine.low %v3156_v35, %v3160_v14  ;;  %2826 = vmax.xlane.f32.xlu1 %v10951_v39  ;;  %v5245_v15 = vcombine.low %v3180_v41, %v3184_v34  ;;  %v5204_v58 = vrot.slane %v11287_v45, %v11186_v11 }
 0x216   :  { %v5246_v27 = vcombine.low %v3188_v29, %v3192_v42  ;;  %v5211_v55 = vrot.slane %v11289_v40, %v11186_v11  ;;  %v5253_v63 = vrot.slane %v5243_v51, %v11186_v11  ;;  %v3196_v32 = vrot.slane %v2972_v13, %v11114_v54  ;;  %2823 = vmax.xlane.f32.xlu0 %v10946_v9  ;;  %v2614_v35 = vpop.xlane.xlu0 %2613 }
 0x217   :  { %v5260_v20 = vrot.slane %v5244_v49, %v11186_v11  ;;  %v3200_v14 = vrot.slane %v2972_v13, %v11118_v17  ;;  %v5267_v39 = vrot.slane %v5245_v15, %v11186_v11  ;;  %v3204_v5 = vrot.slane %v2972_v13, %v11121_v26 }
 0x218   :  { %v5274_v41 = vrot.slane %v5246_v27, %v11186_v11  ;;  %v3208_v45 = vrot.slane %v2972_v13, %v11124_v28  ;;  %v3212_v0 = vrot.slane %v2972_v13, %v11127_v60  ;;  %v3216_v8 = vrot.slane %v2972_v13, %v11130_v38  ;;  %v2623_v27 = vpop.xlane.xlu1 %2622 }
 0x219   :  { %v5275_v40 = vcombine.low %v5253_v63, %v5260_v20  ;;  %v3220_v19 = vrot.slane %v2972_v13, %v11133_v7  ;;  %2832 = vmax.xlane.f32.xlu1 %v10954_v31  ;;  %v2973_v4 = vmax.f32 %v2611_v47, %v2614_v35  ;;  %v3224_v15 = vrot.slane %v2972_v13, %v11136_v22 }
 0x21a   :  { %v5276_v9 = vcombine.low %v5267_v39, %v5274_v41  ;;  %v5292_v34 = vcombine.low %v3196_v32, %v3200_v14  ;;  %v5293_v42 = vcombine.low %v3204_v5, %v3208_v45  ;;  %v5294_v51 = vcombine.low %v3212_v0, %v3216_v8  ;;  %2829 = vmax.xlane.f32.xlu0 %v10957_v36  ;;  %v2620_v13 = vpop.xlane.xlu0 %2619 }
 0x21b   :  { %v5283_v29 = vrot.slane %v5275_v40, %v11186_v11  ;;  %v5218_v63 = vrot.slane %v11291_v1, %v11186_v11  ;;  %v5295_v49 = vcombine.low %v3220_v19, %v3224_v15  ;;  %v3228_v31 = vrot.slane %v2973_v4, %v11114_v54 }
 0x21c   :  { %v5302_v20 = vrot.slane %v5292_v34, %v11186_v11  ;;  %v5225_v47 = vrot.slane %v11302_v2, %v11186_v11  ;;  %v5309_v32 = vrot.slane %v5293_v42, %v11186_v11  ;;  %v5316_v14 = vrot.slane %v5294_v51, %v11186_v11  ;;  %v2629_v35 = vpop.xlane.xlu1 %2628 }
 0x21d   :  { %v3232_v39 = vrot.slane %v2973_v4, %v11118_v17  ;;  %v3236_v41 = vrot.slane %v2973_v4, %v11121_v26  ;;  %2838 = vmax.xlane.f32.xlu1 %v10971_v53  ;;  %v2974_v36 = vmax.f32 %v2617_v25, %v2620_v13  ;;  %v5290_v1 = vrot.slane %v5276_v9, %v11186_v11 }
 0x21e   :  { %v5323_v5 = vrot.slane %v5295_v49, %v11186_v11  ;;  %v3240_v45 = vrot.slane %v2973_v4, %v11124_v28  ;;  %v5324_v2 = vcombine.low %v5302_v20, %v5309_v32  ;;  %v3244_v40 = vrot.slane %v2973_v4, %v11127_v60  ;;  %2835 = vmax.xlane.f32.xlu0 %v10961_v52  ;;  %v2626_v34 = vpop.xlane.xlu0 %2625 }
 0x21f   :  { %v3248_v0 = vrot.slane %v2973_v4, %v11130_v38  ;;  %v3252_v8 = vrot.slane %v2973_v4, %v11133_v7  ;;  %v13837_v53 = vcombine.high %v13828_v30, %v11183_v16  ;;  %v3256_v9 = vrot.slane %v2973_v4, %v11136_v22 }
 0x220   :  { %v5325_v19 = vcombine.low %v5316_v14, %v5323_v5  ;;  %v5341_v15 = vcombine.low %v3228_v31, %v3232_v39  ;;  %v13838_v42 = vcombine.low %v13835_v43, %v11223_v24  ;;  %v13839_v52 = vcombine.high %v13832_v37, %v11208_v50  ;;  %v2635_v14 = vpop.xlane.xlu1 %2634 }
 0x221   :  { %v11347_v25 = vsel %vm2584_vm0, %v13837_v53, -inf  ;;  %v5342_v16 = vcombine.low %v3236_v41, %v3240_v45  ;;  %v5343_v30 = vcombine.low %v3244_v40, %v3248_v0  ;;  %2844 = vmax.xlane.f32.xlu1 %v10979_v6  ;;  %v11363_v20 = vmax.f32 %v2623_v27, %v2626_v34 }
 0x222   :  { %v11354_v51 = vsel %vm2584_vm0, %v13838_v42, -inf  ;;  %v11360_v49 = vsel %vm2584_vm0, %v13839_v52, -inf  ;;  %v13840_v4 = vcombine.high %v13835_v43, %v11223_v24  ;;  %v13842_v13 = vrot.slane %v11266_v21, %v11186_v11  ;;  %2841 = vmax.xlane.f32.xlu0 %v10974_v33  ;;  %v2632_v5 = vpop.xlane.xlu0 %2631 }
 0x223   :  { %v13843_v50 = vrot.slane %v11255_v57, %v11186_v11  ;;  %v5226_v32 = vcombine.low %v5204_v58, %v5211_v55  ;;  %v11379_v39 = vcombine.low %v5283_v29, %v5290_v1  ;;  %v5332_v6 = vrot.slane %v5324_v2, %v11186_v11 }
 0x224   :  { %v11369_v31 = vsel %vm2584_vm0, %v13840_v4, -inf  ;;  %v5344_v27 = vcombine.low %v3252_v8, %v3256_v9  ;;  %v5227_v41 = vcombine.low %v5218_v63, %v5225_v47  ;;  %v5339_v24 = vrot.slane %v5325_v19, %v11186_v11  ;;  %v2641_v2 = vpop.xlane.xlu1 %2640 }
 0x225   :  { %13841 = vst [vmem:[#allocation76_spill] sm:$0xff] %v11369_v31  ;;  %v11377_v37 = vcombine.low %v13843_v50, %v13842_v13  ;;  %13845 = vst [vmem:[#allocation11_spill] sm:$0xff] %v11379_v39  ;;  %v5351_v43 = vrot.slane %v5341_v15, %v11186_v11  ;;  %v3260_v21 = vrot.slane %v2974_v36, %v11114_v54  ;;  %2850 = vmax.xlane.f32.xlu1 %v10994_v44 }
 0x226   :  { %v3264_v57 = vrot.slane %v2974_v36, %v11118_v17  ;;  %v5358_v55 = vrot.slane %v5342_v16, %v11186_v11  ;;  %v5365_v58 = vrot.slane %v5343_v30, %v11186_v11  ;;  %v3268_v29 = vrot.slane %v2974_v36, %v11121_v26  ;;  %2847 = vmax.xlane.f32.xlu0 %v10982_v12  ;;  %v2638_v15 = vpop.xlane.xlu0 %2637 }
 0x227   :  { %13844 = vst [vmem:[#allocation39_spill] sm:$0xff] %v11377_v37  ;;  %v3272_v1 = vrot.slane %v2974_v36, %v11124_v28  ;;  %v11392_v33 = vmax.f32 %v2629_v35, %v2632_v5  ;;  %v5234_v63 = vrot.slane %v5226_v32, %v11186_v11  ;;  %v3276_v47 = vrot.slane %v2974_v36, %v11127_v60  ;;  %v13861_v37 = vld [vmem:[#allocation33_spill] sm:$0xff] }
 0x228   :  { %v3280_v45 = vrot.slane %v2974_v36, %v11130_v38  ;;  %v5372_v40 = vrot.slane %v5344_v27, %v11186_v11  ;;  %v3284_v0 = vrot.slane %v2974_v36, %v11133_v7  ;;  %v3288_v8 = vrot.slane %v2974_v36, %v11136_v22  ;;  %v2647_v13 = vpop.xlane.xlu1 %2646 }
 0x229   :  { %v5390_v53 = vcombine.low %v3260_v21, %v3264_v57  ;;  %v5241_v44 = vrot.slane %v5227_v41, %v11186_v11  ;;  %v5391_v35 = vcombine.low %v3268_v29, %v3272_v1  ;;  %v3292_v9 = vrot.slane %v11363_v20, %v11114_v54  ;;  %2856 = vmax.xlane.f32.xlu1 %v11006_v46 }
 0x22a   :  { %v5392_v19 = vcombine.low %v3276_v47, %v3280_v45  ;;  %v5393_v34 = vcombine.low %v3284_v0, %v3288_v8  ;;  %v3296_v52 = vrot.slane %v11363_v20, %v11118_v17  ;;  %v3300_v36 = vrot.slane %v11363_v20, %v11121_v26  ;;  %2853 = vmax.xlane.f32.xlu0 %v11009_v59 }
 0x22b   :  { %v5400_v42 = vrot.slane %v5390_v53, %v11186_v11  ;;  %v11410_v12 = vmax.f32 %v2635_v14, %v2638_v15  ;;  %v11412_v16 = vcombine.low %v5332_v6, %v5339_v24  ;;  %v11414_v30 = vcombine.low %v5351_v43, %v5358_v55  ;;  %v2644_v43 = vpop.xlane.xlu0 %2643  ;;  %v13849_v53 = vld [vmem:[#allocation21_spill] sm:$0xff]  ;;  %v13853_v15 = vld [vmem:[#allocation46_spill] sm:$0xff] }
 0x22c   :  { %v5407_v4 = vrot.slane %v5391_v35, %v11186_v11  ;;  %v11417_v50 = vcombine.low %v5365_v58, %v5372_v40  ;;  %v3304_v32 = vrot.slane %v11363_v20, %v11124_v28  ;;  %v3308_v27 = vrot.slane %v11363_v20, %v11127_v60  ;;  %v13847_v58 = vld [vmem:[#allocation12_spill] sm:$0xff]  ;;  %v2653_v45 = vpop.xlane.xlu1 %2652 }
 0x22d   :  { %13846 = vst [vmem:[#allocation40_spill] sm:$0xff] %v11412_v16  ;;  %v3312_v46 = vrot.slane %v11363_v20, %v11130_v38  ;;  %v5414_v14 = vrot.slane %v5392_v19, %v11186_v11  ;;  %v3316_v6 = vrot.slane %v11363_v20, %v11133_v7  ;;  %v3320_v41 = vrot.slane %v11363_v20, %v11136_v22  ;;  %v13859_v20 = vld [vmem:[#allocation63_spill] sm:$0xff] }
 0x22e   :  { %v5439_v24 = vcombine.low %v3292_v9, %v3296_v52  ;;  %v5421_v21 = vrot.slane %v5393_v34, %v11186_v11  ;;  %v11432_v57 = vcombine.low %v5400_v42, %v5407_v4  ;;  %v5440_v5 = vcombine.low %v3300_v36, %v3304_v32  ;;  %2862 = vmax.xlane.f32.xlu1 %v13847_v58  ;;  %v13850_v52 = vld [vmem:[#allocation13_spill] sm:$0xff] }
 0x22f   :  { %v5441_v55 = vcombine.low %v3308_v27, %v3312_v46  ;;  %v11435_v29 = vmax.f32 %v2641_v2, %v2644_v43  ;;  %v11437_v59 = vcombine.low %v5234_v63, %v5241_v44  ;;  %v5442_v1 = vcombine.low %v3316_v6, %v3320_v41  ;;  %2859 = vmax.xlane.f32.xlu0 %v13849_v53  ;;  %v2650_v19 = vpop.xlane.xlu0 %2649  ;;  %v13851_v43 = vld [vmem:[#allocation73_spill] sm:$0xff] }
 0x230   :  { %v5449_v47 = vrot.slane %v5439_v24, %v11186_v11  ;;  %v5456_v40 = vrot.slane %v5440_v5, %v11186_v11  ;;  %v3324_v0 = vrot.slane %v11392_v33, %v11114_v54  ;;  %v3328_v8 = vrot.slane %v11392_v33, %v11118_v17  ;;  %v2659_v46 = vpop.xlane.xlu1 %2658 }
 0x231   :  { %13848 = vst [vmem:[#allocation78_spill] sm:$0xff] %v11437_v59  ;;  %v3332_v2 = vrot.slane %v11392_v33, %v11121_v26  ;;  %v3336_v44 = vrot.slane %v11392_v33, %v11124_v28  ;;  %v3340_v35 = vrot.slane %v11392_v33, %v11127_v60  ;;  %v11456_v9 = vcombine.low %v5414_v14, %v5421_v21 }
 0x232   :  { %v5463_v34 = vrot.slane %v5441_v55, %v11186_v11  ;;  %v3344_v42 = vrot.slane %v11392_v33, %v11130_v38  ;;  %2868 = vmax.xlane.f32.xlu1 %v13850_v52  ;;  %v2979_v36 = vmax.f32 %v2647_v13, %v2650_v19  ;;  %v5470_v4 = vrot.slane %v5442_v1, %v11186_v11 }
 0x233   :  { %v11465_v32 = vcombine.low %v5449_v47, %v5456_v40  ;;  %v3348_v27 = vrot.slane %v11392_v33, %v11133_v7  ;;  %v3352_v14 = vrot.slane %v11392_v33, %v11136_v22  ;;  %v5488_v6 = vcombine.low %v3324_v0, %v3328_v8  ;;  %2865 = vmax.xlane.f32.xlu0 %v13851_v43  ;;  %v2656_v58 = vpop.xlane.xlu0 %2655  ;;  %v13852_v0 = vld [vmem:[#allocation62_spill] sm:$0xff] }
 0x234   :  { %v5489_v41 = vcombine.low %v3332_v2, %v3336_v44  ;;  %v5490_v24 = vcombine.low %v3340_v35, %v3344_v42  ;;  %v3420_v21 = vrot.slane %v2979_v36, %v11114_v54  ;;  %v3424_v13 = vrot.slane %v2979_v36, %v11118_v17  ;;  %v2665_v35 = vpop.xlane.xlu1 %2664 }
 0x235   :  { %v3428_v5 = vrot.slane %v2979_v36, %v11121_v26  ;;  %v3432_v55 = vrot.slane %v2979_v36, %v11124_v28  ;;  %v3436_v1 = vrot.slane %v2979_v36, %v11127_v60  ;;  %v3440_v47 = vrot.slane %v2979_v36, %v11130_v38 }
 0x236   :  { %v3444_v33 = vrot.slane %v2979_v36, %v11133_v7  ;;  %v3448_v40 = vrot.slane %v2979_v36, %v11136_v22  ;;  %2874 = vmax.xlane.f32.xlu1 %v13852_v0  ;;  %v11481_v8 = vmax.f32 %v2653_v45, %v2656_v58  ;;  %v5635_v53 = vcombine.low %v3420_v21, %v3424_v13 }
 0x237   :  { %v5636_v2 = vcombine.low %v3428_v5, %v3432_v55  ;;  %v11483_v44 = vcombine.low %v5463_v34, %v5470_v4  ;;  %v5637_v19 = vcombine.low %v3436_v1, %v3440_v47  ;;  %v5491_v52 = vcombine.low %v3348_v27, %v3352_v14  ;;  %2871 = vmax.xlane.f32.xlu0 %v13853_v15  ;;  %v2662_v13 = vpop.xlane.xlu0 %2661  ;;  %v13857_v55 = vld [vmem:[#allocation71_spill] sm:$0xff] }
 0x238   :  { %v5638_v42 = vcombine.low %v3444_v33, %v3448_v40  ;;  %v5498_v43 = vrot.slane %v5488_v6, %v11186_v11  ;;  %v5645_v36 = vrot.slane %v5635_v53, %v11186_v11  ;;  %v5505_v21 = vrot.slane %v5489_v41, %v11186_v11  ;;  %v13854_v6 = vld [vmem:[#allocation30_spill] sm:$0xff]  ;;  %v2671_v58 = vpop.xlane.xlu1 %2670 }
 0x239   :  { %v5652_v45 = vrot.slane %v5636_v2, %v11186_v11  ;;  %v5659_v34 = vrot.slane %v5637_v19, %v11186_v11  ;;  %v5512_v27 = vrot.slane %v5490_v24, %v11186_v11  ;;  %v5519_v14 = vrot.slane %v5491_v52, %v11186_v11 }
 0x23a   :  { %v5666_v4 = vrot.slane %v5638_v42, %v11186_v11  ;;  %2880 = vmax.xlane.f32.xlu1 %v13854_v6  ;;  %v2981_v15 = vmax.f32 %v2659_v46, %v2662_v13  ;;  %v3356_v41 = vrot.slane %v11410_v12, %v11114_v54  ;;  %v11507_v24 = vcombine.low %v5498_v43, %v5505_v21  ;;  %v13855_v46 = vld [vmem:[#allocation22_spill] sm:$0xff] }
 0x23b   :  { %v11503_v1 = vcombine.low %v5645_v36, %v5652_v45  ;;  %v3360_v33 = vrot.slane %v11410_v12, %v11118_v17  ;;  %2877 = vmax.xlane.f32.xlu0 %v13855_v46  ;;  %v11515_v2 = vcombine.low %v5512_v27, %v5519_v14  ;;  %v2668_v19 = vpop.xlane.xlu0 %2667  ;;  %v3364_v36 = vrot.slane %v11410_v12, %v11121_v26  ;;  %v13856_v45 = vld [vmem:[#allocation61_spill] sm:$0xff] }
 0x23c   :  { %v11505_v47 = vcombine.low %v5659_v34, %v5666_v4  ;;  %v3484_v40 = vrot.slane %v2981_v15, %v11114_v54  ;;  %v3488_v0 = vrot.slane %v2981_v15, %v11118_v17  ;;  %v3492_v53 = vrot.slane %v2981_v15, %v11121_v26  ;;  %v2677_v27 = vpop.xlane.xlu1 %2676 }
 0x23d   :  { %v3496_v42 = vrot.slane %v2981_v15, %v11124_v28  ;;  %v3500_v52 = vrot.slane %v2981_v15, %v11127_v60  ;;  %v3504_v43 = vrot.slane %v2981_v15, %v11130_v38  ;;  %v11523_v21 = vmax.f32 %v2665_v35, %v2668_v19 }
 0x23e   :  { %2886 = vmax.xlane.f32.xlu1 %v13856_v45  ;;  %v3508_v13 = vrot.slane %v2981_v15, %v11133_v7  ;;  %v3512_v34 = vrot.slane %v2981_v15, %v11136_v22  ;;  %v5733_v4 = vcombine.low %v3484_v40, %v3488_v0  ;;  %v5675_v14 = vrot.slane %v11503_v1, %v11186_v11 }
 0x23f   :  { %v5734_v6 = vcombine.low %v3492_v53, %v3496_v42  ;;  %v5735_v46 = vcombine.low %v3500_v52, %v3504_v43  ;;  %v3368_v5 = vrot.slane %v11410_v12, %v11124_v28  ;;  %2883 = vmax.xlane.f32.xlu0 %v13857_v55  ;;  %v5682_v35 = vrot.slane %v11505_v47, %v11186_v11  ;;  %v2674_v40 = vpop.xlane.xlu0 %2673  ;;  %v13858_v42 = vld [vmem:[#allocation31_spill] sm:$0xff] }
 0x240   :  { %v5736_v19 = vcombine.low %v3508_v13, %v3512_v34  ;;  %v5743_v45 = vrot.slane %v5733_v4, %v11186_v11  ;;  %v5528_v15 = vrot.slane %v11507_v24, %v11186_v11  ;;  %v3372_v53 = vrot.slane %v11410_v12, %v11127_v60  ;;  %v2683_v13 = vpop.xlane.xlu1 %2682 }
 0x241   :  { %v5750_v0 = vrot.slane %v5734_v6, %v11186_v11  ;;  %v5757_v1 = vrot.slane %v5735_v46, %v11186_v11  ;;  %v3376_v55 = vrot.slane %v11410_v12, %v11130_v38  ;;  %v2983_v47 = vmax.f32 %v2671_v58, %v2674_v40 }
 0x242   :  { %2892 = vmax.xlane.f32.xlu1 %v13858_v42  ;;  %v5764_v52 = vrot.slane %v5736_v19, %v11186_v11  ;;  %v5535_v43 = vrot.slane %v11515_v2, %v11186_v11  ;;  %v3380_v24 = vrot.slane %v11410_v12, %v11133_v7  ;;  %v3384_v4 = vrot.slane %v11410_v12, %v11136_v22  ;;  %v13860_v12 = vld [vmem:[#allocation32_spill] sm:$0xff] }
 0x243   :  { %v5765_v34 = vcombine.low %v5743_v45, %v5750_v0  ;;  %v5537_v6 = vcombine.low %v3356_v41, %v3360_v33  ;;  %v5538_v46 = vcombine.low %v3364_v36, %v3368_v5  ;;  %2889 = vmax.xlane.f32.xlu0 %v13859_v20  ;;  %v3548_v58 = vrot.slane %v2983_v47, %v11114_v54  ;;  %v2680_v2 = vpop.xlane.xlu0 %2679 }
 0x244   :  { %v5766_v63 = vcombine.low %v5757_v1, %v5764_v52  ;;  %v3552_v19 = vrot.slane %v2983_v47, %v11118_v17  ;;  %v3556_v40 = vrot.slane %v2983_v47, %v11121_v26  ;;  %v3560_v42 = vrot.slane %v2983_v47, %v11124_v28  ;;  %v11564_v36 = vpop.xlane.xlu1 %2688 }
 0x245   :  { %v3564_v59 = vrot.slane %v2983_v47, %v11127_v60  ;;  %v3568_v45 = vrot.slane %v2983_v47, %v11130_v38  ;;  %v5539_v0 = vcombine.low %v3372_v53, %v3376_v55  ;;  %v11559_v5 = vmax.f32 %v2677_v27, %v2680_v2 }
 0x246   :  { %2898 = vmax.xlane.f32.xlu1 %v13860_v12  ;;  %v5773_v20 = vrot.slane %v5765_v34, %v11186_v11  ;;  %v3572_v41 = vrot.slane %v2983_v47, %v11133_v7  ;;  %v3576_v33 = vrot.slane %v2983_v47, %v11136_v22  ;;  %v5780_v1 = vrot.slane %v5766_v63, %v11186_v11 }
 0x247   :  { %v5831_v52 = vcombine.low %v3548_v58, %v3552_v19  ;;  %v5832_v16 = vcombine.low %v3556_v40, %v3560_v42  ;;  %v5833_v39 = vcombine.low %v3564_v59, %v3568_v45  ;;  %2895 = vmax.xlane.f32.xlu0 %v13861_v37  ;;  %v5540_v55 = vcombine.low %v3380_v24, %v3384_v4  ;;  %v2686_v34 = vpop.xlane.xlu0 %2685  ;;  %v13869_v45 = vld [vmem:[#allocation34_spill] sm:$0xff] }
 0x248   :  { %v5834_v53 = vcombine.low %v3572_v41, %v3576_v33  ;;  %v5547_v27 = vrot.slane %v5537_v6, %v11186_v11  ;;  %v5554_v2 = vrot.slane %v5538_v46, %v11186_v11  ;;  %v13862_v12 = vrot.slane %v11417_v50, %v11186_v11  ;;  %v13866_v6 = vld [vmem:[#allocation75_spill] sm:$0xff]  ;;  %v2695_v19 = vpop.xlane.xlu1 %2694 }
 0x249   :  { %v13863_v47 = vrot.slane %v11414_v30, %v11186_v11  ;;  %v13864_v59 = vrot.slane %v11456_v9, %v11186_v11  ;;  %v13865_v37 = vrot.slane %v11432_v57, %v11186_v11  ;;  %v5841_v24 = vrot.slane %v5831_v52, %v11186_v11 }
 0x24a   :  { %v5848_v4 = vrot.slane %v5832_v16, %v11186_v11  ;;  %2904 = vmax.xlane.f32.xlu1 %v13866_v6  ;;  %v2985_v50 = vmax.f32 %v2683_v13, %v2686_v34  ;;  %v13867_v30 = vrot.slane %v11483_v44, %v11186_v11  ;;  %v13868_v46 = vrot.slane %v11465_v32, %v11186_v11 }
 0x24b   :  { %v11576_v31 = vcombine.low %v13863_v47, %v13862_v12  ;;  %v11584_v63 = vcombine.low %v13865_v37, %v13864_v59  ;;  %v5855_v9 = vrot.slane %v5833_v39, %v11186_v11  ;;  %v5862_v57 = vrot.slane %v5834_v53, %v11186_v11  ;;  %2901 = vmax.xlane.f32.xlu0 %v13869_v45  ;;  %v2692_v33 = vpop.xlane.xlu0 %2691  ;;  %v13871_v47 = vld [vmem:[#allocation35_spill] sm:$0xff] }
 0x24c   :  { %v11595_v58 = vcombine.low %v13868_v46, %v13867_v30  ;;  %v11599_v40 = vcombine.low %v5675_v14, %v5682_v35  ;;  %v11601_v42 = vcombine.low %v5773_v20, %v5780_v1  ;;  %v11603_v16 = vcombine.low %v5528_v15, %v5535_v43 }
 0x24d   :  { %v5561_v13 = vrot.slane %v5539_v0, %v11186_v11  ;;  %v11607_v44 = vcombine.low %v5841_v24, %v5848_v4  ;;  %v5568_v32 = vrot.slane %v5540_v55, %v11186_v11  ;;  %v11610_v41 = vcombine.low %v5547_v27, %v5554_v2  ;;  %v13870_v0 = vld [vmem:[#allocation67_spill] sm:$0xff]  ;;  %v11624_v55 = vpop.xlane.xlu1 %2700 }
 0x24e   :  { %v3612_v39 = vrot.slane %v2985_v50, %v11114_v54  ;;  %v3616_v14 = vrot.slane %v2985_v50, %v11118_v17  ;;  %v3620_v35 = vrot.slane %v2985_v50, %v11121_v26  ;;  %v3624_v15 = vrot.slane %v2985_v50, %v11124_v28  ;;  %2910 = vmax.xlane.f32.xlu1 %v13870_v0 }
 0x24f   :  { %v3388_v43 = vrot.slane %v11435_v29, %v11114_v54  ;;  %v5864_v20 = vcombine.low %v5855_v9, %v5862_v57  ;;  %v3628_v1 = vrot.slane %v2985_v50, %v11127_v60  ;;  %v3392_v52 = vrot.slane %v11435_v29, %v11118_v17  ;;  %2907 = vmax.xlane.f32.xlu0 %v13871_v47  ;;  %v2698_v6 = vpop.xlane.xlu0 %2697 }
 0x250   :  { %v3396_v53 = vrot.slane %v11435_v29, %v11121_v26  ;;  %v3632_v27 = vrot.slane %v2985_v50, %v11130_v38  ;;  %v3636_v2 = vrot.slane %v2985_v50, %v11133_v7  ;;  %v3640_v34 = vrot.slane %v2985_v50, %v11136_v22  ;;  %v13872_v50 = vld [vmem:[#allocation79_spill] sm:$0xff] }
 0x251   :  { %v5929_v12 = vcombine.low %v3612_v39, %v3616_v14  ;;  %v5570_v59 = vcombine.low %v5561_v13, %v5568_v32  ;;  %v5577_v37 = vrot.slane %v11610_v41, %v11186_v11  ;;  %v5930_v24 = vcombine.low %v3620_v35, %v3624_v15  ;;  %v2707_v39 = vpop.xlane.xlu1 %2706 }
 0x252   :  { %v3400_v4 = vrot.slane %v11435_v29, %v11124_v28  ;;  %v5931_v30 = vcombine.low %v3628_v1, %v3632_v27  ;;  %v5932_v46 = vcombine.low %v3636_v2, %v3640_v34  ;;  %v3404_v57 = vrot.slane %v11435_v29, %v11127_v60  ;;  %2916 = vmax.xlane.f32.xlu1 %v13872_v50  ;;  %v13873_v1 = vld [vmem:[#allocation36_spill] sm:$0xff] }
 0x253   :  { %v5939_v9 = vrot.slane %v5929_v12, %v11186_v11  ;;  %v2987_v45 = vmax.f32 %v2695_v19, %v2698_v6  ;;  %v5946_v13 = vrot.slane %v5930_v24, %v11186_v11  ;;  %v3408_v32 = vrot.slane %v11435_v29, %v11130_v38  ;;  %2913 = vmax.xlane.f32.xlu0 %v13873_v1  ;;  %v2704_v12 = vpop.xlane.xlu0 %2703 }
 0x254   :  { %v3412_v41 = vrot.slane %v11435_v29, %v11133_v7  ;;  %v5953_v14 = vrot.slane %v5931_v30, %v11186_v11  ;;  %v5960_v35 = vrot.slane %v5932_v46, %v11186_v11  ;;  %v3416_v15 = vrot.slane %v11435_v29, %v11136_v22 }
 0x255   :  { %v5586_v0 = vcombine.low %v3388_v43, %v3392_v52  ;;  %v5871_v19 = vrot.slane %v11607_v44, %v11186_v11  ;;  %v5878_v27 = vrot.slane %v5864_v20, %v11186_v11  ;;  %v5587_v2 = vcombine.low %v3396_v53, %v3400_v4  ;;  %v11661_v20 = vpop.xlane.xlu1 %2712 }
 0x256   :  { %v5588_v34 = vcombine.low %v3404_v57, %v3408_v32  ;;  %v5589_v47 = vcombine.low %v3412_v41, %v3416_v15  ;;  %v3676_v6 = vrot.slane %v2987_v45, %v11114_v54  ;;  %v3680_v30 = vrot.slane %v2987_v45, %v11118_v17  ;;  %2922 = vmax.xlane.f32.xlu1 %v11190_v10 }
 0x257   :  { %v5596_v24 = vrot.slane %v5586_v0, %v11186_v11  ;;  %v5584_v29 = vrot.slane %v5570_v59, %v11186_v11  ;;  %v11656_v43 = vcombine.low %v5939_v9, %v5946_v13  ;;  %v11658_v52 = vcombine.low %v5953_v14, %v5960_v35  ;;  %2919 = vmax.xlane.f32.xlu0 %v11195_v23  ;;  %v2710_v32 = vpop.xlane.xlu0 %2709 }
 0x258   :  { %v5603_v44 = vrot.slane %v5587_v2, %v11186_v11  ;;  %v5610_v53 = vrot.slane %v5588_v34, %v11186_v11  ;;  %v5617_v4 = vrot.slane %v5589_v47, %v11186_v11  ;;  %v3684_v46 = vrot.slane %v2987_v45, %v11121_v26 }
 0x259   :  { %v3688_v57 = vrot.slane %v2987_v45, %v11124_v28  ;;  %v3692_v59 = vrot.slane %v2987_v45, %v11127_v60  ;;  %v3696_v9 = vrot.slane %v2987_v45, %v11130_v38  ;;  %v3700_v50 = vrot.slane %v2987_v45, %v11133_v7  ;;  %v11682_v2 = vpop.xlane.xlu1 %2718 }
 0x25a   :  { %v5618_v10 = vcombine.low %v5596_v24, %v5603_v44  ;;  %v11672_v13 = vmax.f32 %v11564_v36, %v2692_v33  ;;  %v11674_v41 = vcombine.low %v5871_v19, %v5878_v27  ;;  %v3704_v14 = vrot.slane %v2987_v45, %v11136_v22  ;;  %2928 = vmax.xlane.f32.xlu1 %v11211_v56 }
 0x25b   :  { %v6027_v35 = vcombine.low %v3676_v6, %v3680_v30  ;;  %v11678_v15 = vcombine.low %v5577_v37, %v5584_v29  ;;  %v5969_v23 = vrot.slane %v11656_v43, %v11186_v11  ;;  %v6028_v0 = vcombine.low %v3684_v46, %v3688_v57  ;;  %2925 = vmax.xlane.f32.xlu0 %v11231_v48  ;;  %v2716_v47 = vpop.xlane.xlu0 %2715 }
 0x25c   :  { %v6029_v1 = vcombine.low %v3692_v59, %v3696_v9  ;;  %v5976_v36 = vrot.slane %v11658_v52, %v11186_v11  ;;  %v5619_v33 = vcombine.low %v5610_v53, %v5617_v4  ;;  %v6030_v19 = vcombine.low %v3700_v50, %v3704_v14 }
 0x25d   :  { %v3452_v45 = vrot.slane %v11481_v8, %v11114_v54  ;;  %v2989_v27 = vmax.f32 %v2707_v39, %v2710_v32  ;;  %v5626_v56 = vrot.slane %v5618_v10, %v11186_v11  ;;  %v3456_v37 = vrot.slane %v11481_v8, %v11118_v17  ;;  %v2725_v44 = vpop.xlane.xlu1 %2724 }
 0x25e   :  { %v3460_v34 = vrot.slane %v11481_v8, %v11121_v26  ;;  %v6037_v24 = vrot.slane %v6027_v35, %v11186_v11  ;;  %v6044_v6 = vrot.slane %v6028_v0, %v11186_v11  ;;  %v3464_v30 = vrot.slane %v11481_v8, %v11124_v28  ;;  %2934 = vmax.xlane.f32.xlu1 %v11228_v3 }
 0x25f   :  { %v3468_v39 = vrot.slane %v11481_v8, %v11127_v60  ;;  %v6051_v48 = vrot.slane %v6029_v1, %v11186_v11  ;;  %v6058_v29 = vrot.slane %v6030_v19, %v11186_v11  ;;  %v3472_v43 = vrot.slane %v11481_v8, %v11130_v38  ;;  %2931 = vmax.xlane.f32.xlu0 %v11237_v62  ;;  %v2722_v50 = vpop.xlane.xlu0 %2721 }
 0x260   :  { %v3476_v52 = vrot.slane %v11481_v8, %v11133_v7  ;;  %v5633_v53 = vrot.slane %v5619_v33, %v11186_v11  ;;  %v3480_v4 = vrot.slane %v11481_v8, %v11136_v22  ;;  %v5684_v46 = vcombine.low %v3452_v45, %v3456_v37 }
 0x261   :  { %v5685_v57 = vcombine.low %v3460_v34, %v3464_v30  ;;  %v11711_v3 = vmax.f32 %v11624_v55, %v2704_v12  ;;  %v5686_v10 = vcombine.low %v3468_v39, %v3472_v43  ;;  %v3740_v59 = vrot.slane %v2989_v27, %v11114_v54  ;;  %v2731_v1 = vpop.xlane.xlu1 %2730 }
 0x262   :  { %v3744_v9 = vrot.slane %v2989_v27, %v11118_v17  ;;  %v6059_v32 = vcombine.low %v6037_v24, %v6044_v6  ;;  %v5687_v14 = vcombine.low %v3476_v52, %v3480_v4  ;;  %v5694_v35 = vrot.slane %v5684_v46, %v11186_v11  ;;  %2940 = vmax.xlane.f32.xlu1 %v11234_v18 }
 0x263   :  { %v5701_v0 = vrot.slane %v5685_v57, %v11186_v11  ;;  %v6060_v8 = vcombine.low %v6051_v48, %v6058_v29  ;;  %v5708_v55 = vrot.slane %v5686_v10, %v11186_v11  ;;  %v3748_v12 = vrot.slane %v2989_v27, %v11121_v26  ;;  %2937 = vmax.xlane.f32.xlu0 %v11244_v61  ;;  %v2728_v30 = vpop.xlane.xlu0 %2727  ;;  %v13874_v48 = vld [vmem:[#allocation74_spill] sm:$0xff] }
 0x264   :  { %v3752_v62 = vrot.slane %v2989_v27, %v11124_v28  ;;  %v11722_v33 = vcombine.low %v5969_v23, %v5976_v36  ;;  %v11724_v19 = vcombine.low %v5626_v56, %v5633_v53  ;;  %v5715_v45 = vrot.slane %v5687_v14, %v11186_v11 }
 0x265   :  { %v3756_v37 = vrot.slane %v2989_v27, %v11127_v60  ;;  %v3760_v18 = vrot.slane %v2989_v27, %v11130_v38  ;;  %v3764_v34 = vrot.slane %v2989_v27, %v11133_v7  ;;  %v3768_v24 = vrot.slane %v2989_v27, %v11136_v22  ;;  %v11737_v53 = vpop.xlane.xlu1 %2736 }
 0x266   :  { %v6125_v6 = vcombine.low %v3740_v59, %v3744_v9  ;;  %v6067_v39 = vrot.slane %v6059_v32, %v11186_v11  ;;  %v5716_v23 = vcombine.low %v5694_v35, %v5701_v0  ;;  %v5717_v36 = vcombine.low %v5708_v55, %v5715_v45  ;;  %2946 = vmax.xlane.f32.xlu1 %v13874_v48  ;;  %v13875_v9 = vld [vmem:[#allocation37_spill] sm:$0xff] }
 0x267   :  { %v6126_v56 = vcombine.low %v3748_v12, %v3752_v62  ;;  %v6074_v29 = vrot.slane %v6060_v8, %v11186_v11  ;;  %v6127_v43 = vcombine.low %v3756_v37, %v3760_v18  ;;  %v6128_v52 = vcombine.low %v3764_v34, %v3768_v24  ;;  %2943 = vmax.xlane.f32.xlu0 %v13875_v9  ;;  %v2734_v35 = vpop.xlane.xlu0 %2733 }
 0x268   :  { %v3516_v61 = vrot.slane %v11523_v21, %v11114_v54  ;;  %v6135_v27 = vrot.slane %v6125_v6, %v11186_v11  ;;  %v3520_v46 = vrot.slane %v11523_v21, %v11118_v17  ;;  %v3524_v57 = vrot.slane %v11523_v21, %v11121_v26  ;;  %v13877_v6 = vld [vmem:[#allocation38_spill] sm:$0xff] }
 0x269   :  { %v6142_v4 = vrot.slane %v6126_v56, %v11186_v11  ;;  %v11746_v10 = vmax.f32 %v11661_v20, %v2716_v47  ;;  %v2991_v59 = vmax.f32 %v11682_v2, %v2722_v50  ;;  %v3528_v32 = vrot.slane %v11523_v21, %v11124_v28  ;;  %v13876_v2 = vld [vmem:[#allocation82_spill] sm:$0xff]  ;;  %v2743_v37 = vpop.xlane.xlu1 %2742 }
 0x26a   :  { %v3532_v14 = vrot.slane %v11523_v21, %v11127_v60  ;;  %v5724_v0 = vrot.slane %v5716_v23, %v11186_v11  ;;  %v5731_v8 = vrot.slane %v5717_v36, %v11186_v11  ;;  %v3536_v55 = vrot.slane %v11523_v21, %v11130_v38  ;;  %2952 = vmax.xlane.f32.xlu1 %v13876_v2 }
 0x26b   :  { %v3540_v20 = vrot.slane %v11523_v21, %v11133_v7  ;;  %v6149_v47 = vrot.slane %v6127_v43, %v11186_v11  ;;  %v6156_v50 = vrot.slane %v6128_v52, %v11186_v11  ;;  %v3544_v12 = vrot.slane %v11523_v21, %v11136_v22  ;;  %2949 = vmax.xlane.f32.xlu0 %v13877_v6  ;;  %v2740_v52 = vpop.xlane.xlu0 %2739 }
 0x26c   :  { %v5782_v62 = vcombine.low %v3516_v61, %v3520_v46  ;;  %v11765_v45 = vmax.f32 %v2725_v44, %v2728_v30  ;;  %v11767_v18 = vcombine.low %v6067_v39, %v6074_v29  ;;  %v6157_v34 = vcombine.low %v6135_v27, %v6142_v4  ;;  %v13878_v39 = vld [vmem:[#allocation45_spill] sm:$0xff] }
 0x26d   :  { %v5783_v24 = vcombine.low %v3524_v57, %v3528_v32  ;;  %v5784_v23 = vcombine.low %v3532_v14, %v3536_v55  ;;  %v5785_v36 = vcombine.low %v3540_v20, %v3544_v12  ;;  %v3804_v56 = vrot.slane %v2991_v59, %v11114_v54  ;;  %v11782_v46 = vpop.xlane.xlu1 %2748 }
 0x26e   :  { %v3808_v48 = vrot.slane %v2991_v59, %v11118_v17  ;;  %v11772_v43 = vmax.f32 %v2731_v1, %v2734_v35  ;;  %v11774_v21 = vcombine.low %v5724_v0, %v5731_v8  ;;  %v3812_v44 = vrot.slane %v2991_v59, %v11121_v26  ;;  %2958 = vmax.xlane.f32.xlu1 %v13878_v39 }
 0x26f   :  { %v3816_v30 = vrot.slane %v2991_v59, %v11124_v28  ;;  %v6158_v29 = vcombine.low %v6149_v47, %v6156_v50  ;;  %v5792_v61 = vrot.slane %v5782_v62, %v11186_v11  ;;  %v5799_v27 = vrot.slane %v5783_v24, %v11186_v11  ;;  %2955 = vmax.xlane.f32.xlu0 %v11347_v25  ;;  %v2746_v55 = vpop.xlane.xlu0 %2745 }
 0x270   :  { %v3820_v4 = vrot.slane %v2991_v59, %v11127_v60  ;;  %v6165_v1 = vrot.slane %v6157_v34, %v11186_v11  ;;  %v3824_v57 = vrot.slane %v2991_v59, %v11130_v38  ;;  %v3828_v9 = vrot.slane %v2991_v59, %v11133_v7 }
 0x271   :  { %v3832_v32 = vrot.slane %v2991_v59, %v11136_v22  ;;  %v5806_v14 = vrot.slane %v5784_v23, %v11186_v11  ;;  %v5813_v35 = vrot.slane %v5785_v36, %v11186_v11  ;;  %v6223_v0 = vcombine.low %v3804_v56, %v3808_v48  ;;  %v11799_v34 = vpop.xlane.xlu1 %2754 }
 0x272   :  { %v6224_v8 = vcombine.low %v3812_v44, %v3816_v30  ;;  %v6225_v20 = vcombine.low %v3820_v4, %v3824_v57  ;;  %v3580_v47 = vrot.slane %v11559_v5, %v11114_v54  ;;  %v3584_v50 = vrot.slane %v11559_v5, %v11118_v17  ;;  %2964 = vmax.xlane.f32.xlu1 %v11354_v51 }
 0x273   :  { %v6226_v2 = vcombine.low %v3828_v9, %v3832_v32  ;;  %v6172_v59 = vrot.slane %v6158_v29, %v11186_v11  ;;  %v5814_v25 = vcombine.low %v5792_v61, %v5799_v27  ;;  %v6233_v12 = vrot.slane %v6223_v0, %v11186_v11  ;;  %2961 = vmax.xlane.f32.xlu0 %v11360_v49  ;;  %v2752_v39 = vpop.xlane.xlu0 %2751  ;;  %v13879_v0 = vld [vmem:[#allocation76_spill] sm:$0xff] }
 0x274   :  { %v6240_v62 = vrot.slane %v6224_v8, %v11186_v11  ;;  %v6247_v24 = vrot.slane %v6225_v20, %v11186_v11  ;;  %v3588_v23 = vrot.slane %v11559_v5, %v11121_v26  ;;  %v3592_v36 = vrot.slane %v11559_v5, %v11124_v28 }
 0x275   :  { %v6254_v6 = vrot.slane %v6226_v2, %v11186_v11  ;;  %v5815_v51 = vcombine.low %v5806_v14, %v5813_v35  ;;  %v3596_v48 = vrot.slane %v11559_v5, %v11127_v60  ;;  %v3600_v44 = vrot.slane %v11559_v5, %v11130_v38  ;;  %v2761_v14 = vpop.xlane.xlu1 %2760 }
 0x276   :  { %v6255_v56 = vcombine.low %v6233_v12, %v6240_v62  ;;  %v11813_v30 = vmax.f32 %v11737_v53, %v2740_v52  ;;  %v3604_v29 = vrot.slane %v11559_v5, %v11133_v7  ;;  %v3608_v61 = vrot.slane %v11559_v5, %v11136_v22 }
 0x277   :  { %v5880_v27 = vcombine.low %v3580_v47, %v3584_v50  ;;  %v11819_v49 = vcombine.low %v6165_v1, %v6172_v59  ;;  %v5822_v4 = vrot.slane %v5814_v25, %v11186_v11  ;;  %v5881_v57 = vcombine.low %v3588_v23, %v3592_v36  ;;  %2967 = vmax.xlane.f32.xlu0 %v13879_v0 }
 0x278   :  { %v5882_v9 = vcombine.low %v3596_v48, %v3600_v44  ;;  %v11822_v32 = vmax.f32 %v2743_v37, %v2746_v55  ;;  %v6256_v35 = vcombine.low %v6247_v24, %v6254_v6  ;;  %v5883_v53 = vcombine.low %v3604_v29, %v3608_v61  ;;  %v2758_v37 = vpop.xlane.xlu0 %2757 }
 0x279   :  { %v3868_v52 = vrot.slane %v11772_v43, %v11114_v54  ;;  %v5829_v8 = vrot.slane %v5815_v51, %v11186_v11  ;;  %v6263_v5 = vrot.slane %v6255_v56, %v11186_v11  ;;  %v3872_v1 = vrot.slane %v11772_v43, %v11118_v17  ;;  %v2767_v24 = vpop.xlane.xlu1 %2766 }
 0x27a   :  { %v3876_v20 = vrot.slane %v11772_v43, %v11121_v26  ;;  %v5890_v55 = vrot.slane %v5880_v27, %v11186_v11  ;;  %v5897_v2 = vrot.slane %v5881_v57, %v11186_v11  ;;  %v3880_v47 = vrot.slane %v11772_v43, %v11124_v28 }
 0x27b   :  { %v3884_v50 = vrot.slane %v11772_v43, %v11127_v60  ;;  %v5904_v59 = vrot.slane %v5882_v9, %v11186_v11  ;;  %v5911_v25 = vrot.slane %v5883_v53, %v11186_v11  ;;  %v3888_v12 = vrot.slane %v11772_v43, %v11130_v38 }
 0x27c   :  { %v3892_v62 = vrot.slane %v11772_v43, %v11133_v7  ;;  %v6270_v6 = vrot.slane %v6256_v35, %v11186_v11  ;;  %v3896_v23 = vrot.slane %v11772_v43, %v11136_v22  ;;  %v6321_v36 = vcombine.low %v3868_v52, %v3872_v1  ;;  %v2764_v61 = vpop.xlane.xlu0 %2763 }
 0x27d   :  { %v6322_v51 = vcombine.low %v3876_v20, %v3880_v47  ;;  %v11848_v56 = vcombine.low %v5822_v4, %v5829_v8  ;;  %v6323_v48 = vcombine.low %v3884_v50, %v3888_v12  ;;  %v3644_v44 = vrot.slane %v11672_v13, %v11114_v54  ;;  %v2773_v8 = vpop.xlane.xlu1 %2772 }
 0x27e   :  { %v3648_v29 = vrot.slane %v11672_v13, %v11118_v17  ;;  %v5912_v27 = vcombine.low %v5890_v55, %v5897_v2  ;;  %v6324_v57 = vcombine.low %v3892_v62, %v3896_v23  ;;  %v6331_v9 = vrot.slane %v6321_v36, %v11186_v11 }
 0x27f   :  { %v6338_v35 = vrot.slane %v6322_v51, %v11186_v11  ;;  %v5913_v53 = vcombine.low %v5904_v59, %v5911_v25  ;;  %v6345_v43 = vrot.slane %v6323_v48, %v11186_v11  ;;  %v3652_v4 = vrot.slane %v11672_v13, %v11121_v26  ;;  %v13880_v48 = vld [vmem:[#allocation39_spill] sm:$0xff] }
 0x280   :  { %v3656_v52 = vrot.slane %v11672_v13, %v11124_v28  ;;  %v11862_v0 = vmax.f32 %v11782_v46, %v2752_v39  ;;  %v11864_v1 = vcombine.low %v6263_v5, %v6270_v6  ;;  %v6352_v20 = vrot.slane %v6324_v57, %v11186_v11  ;;  %v2770_v46 = vpop.xlane.xlu0 %2769 }
 0x281   :  { %v3660_v55 = vrot.slane %v11672_v13, %v11127_v60  ;;  %v3664_v2 = vrot.slane %v11672_v13, %v11130_v38  ;;  %v3668_v47 = vrot.slane %v11672_v13, %v11133_v7  ;;  %v3672_v50 = vrot.slane %v11672_v13, %v11136_v22  ;;  %v11879_v51 = vpop.xlane.xlu1 %2778 }
 0x282   :  { %v5978_v59 = vcombine.low %v3644_v44, %v3648_v29  ;;  %v5920_v39 = vrot.slane %v5912_v27, %v11186_v11  ;;  %v6353_v5 = vcombine.low %v6331_v9, %v6338_v35  ;;  %v6354_v25 = vcombine.low %v6345_v43, %v6352_v20 }
 0x283   :  { %v5979_v12 = vcombine.low %v3652_v4, %v3656_v52  ;;  %v5927_v62 = vrot.slane %v5913_v53, %v11186_v11  ;;  %v5980_v6 = vcombine.low %v3660_v55, %v3664_v2  ;;  %v5981_v23 = vcombine.low %v3668_v47, %v3672_v50  ;;  %8282 = vperm.xlu1 %8903, %v13880_v48   ;;  %v13882_v50 = vld [vmem:[#allocation11_spill] sm:$0xff] }
 0x284   :  { %v3932_v36 = vrot.slane %v11822_v32, %v11114_v54  ;;  %v5988_v13 = vrot.slane %v5978_v59, %v11186_v11  ;;  %v3936_v29 = vrot.slane %v11822_v32, %v11118_v17  ;;  %v3940_v27 = vrot.slane %v11822_v32, %v11121_v26  ;;  %v2776_v43 = vpop.xlane.xlu0 %2775 }
 0x285   :  { %v5995_v44 = vrot.slane %v5979_v12, %v11186_v11  ;;  %v11889_v57 = vmax.f32 %v11799_v34, %v2758_v37  ;;  %v11891_v9 = vmax.f32 %v2761_v14, %v2764_v61  ;;  %v3944_v35 = vrot.slane %v11822_v32, %v11124_v28  ;;  %v2785_v47 = vpop.xlane.xlu1 %2784 }
 0x286   :  { %v3948_v53 = vrot.slane %v11822_v32, %v11127_v60  ;;  %v6361_v4 = vrot.slane %v6353_v5, %v11186_v11  ;;  %v6368_v52 = vrot.slane %v6354_v25, %v11186_v11  ;;  %v3952_v20 = vrot.slane %v11822_v32, %v11130_v38 }
 0x287   :  { %13881 = vst [vmem:[#allocation41_spill] sm:$0xff] %v11891_v9  ;;  %v3956_v34 = vrot.slane %v11822_v32, %v11133_v7  ;;  %v6002_v14 = vrot.slane %v5980_v6, %v11186_v11  ;;  %v6009_v37 = vrot.slane %v5981_v23, %v11186_v11  ;;  %v3960_v61 = vrot.slane %v11822_v32, %v11136_v22 }
 0x288   :  { %v6419_v55 = vcombine.low %v3932_v36, %v3936_v29  ;;  %v11907_v2 = vmax.f32 %v2767_v24, %v2770_v46  ;;  %8288 = vperm.xlu1 %8903, %v13882_v50   ;;  %v11910_v59 = vcombine.low %v5920_v39, %v5927_v62  ;;  %v6010_v5 = vcombine.low %v5988_v13, %v5995_v44  ;;  %v2782_v32 = vpop.xlane.xlu0 %2781 }
 0x289   :  { %v6420_v25 = vcombine.low %v3940_v27, %v3944_v35  ;;  %v6421_v12 = vcombine.low %v3948_v53, %v3952_v20  ;;  %v6422_v48 = vcombine.low %v3956_v34, %v3960_v61  ;;  %v3708_v6 = vrot.slane %v11711_v3, %v11114_v54  ;;  %v11928_v29 = vpop.xlane.xlu1 %2790 }
 0x28a   :  { %v3712_v23 = vrot.slane %v11711_v3, %v11118_v17  ;;  %v11916_v9 = vmax.f32 %v2773_v8, %v2776_v43  ;;  %v11918_v24 = vcombine.low %v6361_v4, %v6368_v52  ;;  %v3716_v46 = vrot.slane %v11711_v3, %v11121_v26  ;;  %v13883_v8 = vld [vmem:[#allocation40_spill] sm:$0xff] }
 0x28b   :  { %v3720_v39 = vrot.slane %v11711_v3, %v11124_v28  ;;  %v6011_v62 = vcombine.low %v6002_v14, %v6009_v37  ;;  %v6429_v36 = vrot.slane %v6419_v55, %v11186_v11  ;;  %v6436_v13 = vrot.slane %v6420_v25, %v11186_v11 }
 0x28c   :  { %v3724_v44 = vrot.slane %v11711_v3, %v11127_v60  ;;  %8291 = vperm.xlu1 %8903, %v13883_v8   ;;  %v6018_v27 = vrot.slane %v6010_v5, %v11186_v11  ;;  %v3728_v35 = vrot.slane %v11711_v3, %v11130_v38  ;;  %v3732_v53 = vrot.slane %v11711_v3, %v11133_v7  ;;  %v2788_v14 = vpop.xlane.xlu0 %2787  ;;  %v13884_v5 = vld [vmem:[#allocation78_spill] sm:$0xff] }
 0x28d   :  { %v3736_v43 = vrot.slane %v11711_v3, %v11136_v22  ;;  %v6443_v4 = vrot.slane %v6421_v12, %v11186_v11  ;;  %v6450_v52 = vrot.slane %v6422_v48, %v11186_v11  ;;  %v6076_v20 = vcombine.low %v3708_v6, %v3712_v23  ;;  %8285 = vperm.xlu0 %8904, %v13884_v5   ;;  %v11948_v6 = vpop.xlane.xlu1 %2796 }
 0x28e   :  { %v6077_v34 = vcombine.low %v3716_v46, %v3720_v39  ;;  %v6078_v37 = vcombine.low %v3724_v44, %v3728_v35  ;;  %v3996_v55 = vrot.slane %v11889_v57, %v11114_v54  ;;  %v4000_v50 = vrot.slane %v11889_v57, %v11118_v17 }
 0x28f   :  { %v6079_v61 = vcombine.low %v3732_v53, %v3736_v43  ;;  %v6025_v25 = vrot.slane %v6011_v62, %v11186_v11  ;;  %v6451_v3 = vcombine.low %v6429_v36, %v6436_v13  ;;  %v6086_v12 = vrot.slane %v6076_v20, %v11186_v11 }
 0x290   :  { %v6093_v48 = vrot.slane %v6077_v34, %v11186_v11  ;;  %8294 = vperm.xlu1 %8903, %v11576_v31   ;;  %v6100_v23 = vrot.slane %v6078_v37, %v11186_v11  ;;  %v4004_v39 = vrot.slane %v11889_v57, %v11121_v26  ;;  %v4008_v44 = vrot.slane %v11889_v57, %v11124_v28  ;;  %v2794_v35 = vpop.xlane.xlu0 %2793 }
 0x291   :  { %v6107_v46 = vrot.slane %v6079_v61, %v11186_v11  ;;  %v6452_v62 = vcombine.low %v6443_v4, %v6450_v52  ;;  %v4012_v13 = vrot.slane %v11889_v57, %v11127_v60  ;;  %v4016_v8 = vrot.slane %v11889_v57, %v11130_v38  ;;  %8312 = vperm.xlu0 %8904, %v11599_v40   ;;  %v11973_v5 = vpop.xlane.xlu1 %2802 }
 0x292   :  { %v6108_v36 = vcombine.low %v6086_v12, %v6093_v48  ;;  %v11962_v31 = vmax.f32 %v11879_v51, %v2782_v32  ;;  %v4020_v53 = vrot.slane %v11889_v57, %v11133_v7  ;;  %v4024_v43 = vrot.slane %v11889_v57, %v11136_v22 }
 0x293   :  { %v6517_v20 = vcombine.low %v3996_v55, %v4000_v50  ;;  %v11969_v4 = vcombine.low %v6018_v27, %v6025_v25  ;;  %v6109_v52 = vcombine.low %v6100_v23, %v6107_v46  ;;  %v6518_v34 = vcombine.low %v4004_v39, %v4008_v44 }
 0x294   :  { %v6519_v37 = vcombine.low %v4012_v13, %v4016_v8  ;;  %v11971_v61 = vmax.f32 %v2785_v47, %v2788_v14  ;;  %8297 = vperm.xlu1 %8903, %v11584_v63   ;;  %v6459_v51 = vrot.slane %v6451_v3, %v11186_v11  ;;  %v6520_v32 = vcombine.low %v4020_v53, %v4024_v43  ;;  %v11985_v14 = vpop.xlane.xlu0 %2799 }
 0x295   :  { %v3772_v57 = vrot.slane %v11746_v10, %v11114_v54  ;;  %v6466_v55 = vrot.slane %v6452_v62, %v11186_v11  ;;  %v6116_v40 = vrot.slane %v6108_v36, %v11186_v11  ;;  %v3776_v27 = vrot.slane %v11746_v10, %v11118_v17  ;;  %8318 = vperm.xlu0 %8904, %v11601_v42   ;;  %v12000_v39 = vpop.xlane.xlu1 %2808 }
 0x296   :  { %v3780_v47 = vrot.slane %v11746_v10, %v11121_v26  ;;  %v6527_v63 = vrot.slane %v6517_v20, %v11186_v11  ;;  %v6534_v50 = vrot.slane %v6518_v34, %v11186_v11  ;;  %v3784_v25 = vrot.slane %v11746_v10, %v11124_v28 }
 0x297   :  { %v3788_v3 = vrot.slane %v11746_v10, %v11127_v60  ;;  %v6123_v12 = vrot.slane %v6109_v52, %v11186_v11  ;;  %v6541_v48 = vrot.slane %v6519_v37, %v11186_v11  ;;  %v3792_v23 = vrot.slane %v11746_v10, %v11130_v38 }
 0x298   :  { %v3796_v46 = vrot.slane %v11746_v10, %v11133_v7  ;;  %8300 = vperm.xlu1 %8903, %v11595_v58   ;;  %v6548_v44 = vrot.slane %v6520_v32, %v11186_v11  ;;  %v3800_v62 = vrot.slane %v11746_v10, %v11136_v22  ;;  %v6174_v42 = vcombine.low %v3772_v57, %v3776_v27  ;;  %v2806_v20 = vpop.xlane.xlu0 %2805 }
 0x299   :  { %v6175_v36 = vcombine.low %v3780_v47, %v3784_v25  ;;  %v12006_v13 = vcombine.low %v6459_v51, %v6466_v55  ;;  %v6176_v8 = vcombine.low %v3788_v3, %v3792_v23  ;;  %v4060_v53 = vrot.slane %v11907_v2, %v11114_v54  ;;  %8324 = vperm.xlu0 %8904, %v11674_v41   ;;  %v12023_v55 = vpop.xlane.xlu1 %2814 }
 0x29a   :  { %v4064_v43 = vrot.slane %v11907_v2, %v11118_v17  ;;  %v6549_v52 = vcombine.low %v6527_v63, %v6534_v50  ;;  %v6177_v34 = vcombine.low %v3796_v46, %v3800_v62  ;;  %v6184_v58 = vrot.slane %v6174_v42, %v11186_v11 }
 0x29b   :  { %v6191_v37 = vrot.slane %v6175_v36, %v11186_v11  ;;  %v12015_v10 = vmax.f32 %v11928_v29, %v2794_v35  ;;  %v6198_v51 = vrot.slane %v6176_v8, %v11186_v11  ;;  %v4068_v32 = vrot.slane %v11907_v2, %v11121_v26 }
 0x29c   :  { %v4072_v57 = vrot.slane %v11907_v2, %v11124_v28  ;;  %8303 = vperm.xlu1 %8903, %v11603_v16   ;;  %v12026_v27 = vcombine.low %v6116_v40, %v6123_v12  ;;  %v6550_v47 = vcombine.low %v6541_v48, %v6548_v44  ;;  %v6205_v29 = vrot.slane %v6177_v34, %v11186_v11  ;;  %v2812_v3 = vpop.xlane.xlu0 %2811 }
 0x29d   :  { %v4076_v41 = vrot.slane %v11907_v2, %v11127_v60  ;;  %v4080_v35 = vrot.slane %v11907_v2, %v11130_v38  ;;  %v4084_v63 = vrot.slane %v11907_v2, %v11133_v7  ;;  %v4088_v50 = vrot.slane %v11907_v2, %v11136_v22  ;;  %8330 = vperm.xlu0 %8904, %v11722_v33  }
 0x29e   :  { %v6615_v25 = vcombine.low %v4060_v53, %v4064_v43  ;;  %v6557_v16 = vrot.slane %v6549_v52, %v11186_v11  ;;  %v6206_v40 = vcombine.low %v6184_v58, %v6191_v37  ;;  %v6207_v12 = vcombine.low %v6198_v51, %v6205_v29  ;;  %v12042_v42 = vpop.xlane.xlu1 %2820 }
 0x29f   :  { %v6616_v48 = vcombine.low %v4068_v32, %v4072_v57  ;;  %v6617_v23 = vcombine.low %v4076_v41, %v4080_v35  ;;  %v6618_v46 = vcombine.low %v4084_v63, %v4088_v50  ;;  %v3836_v62 = vrot.slane %v11765_v45, %v11114_v54 }
 0x2a0   :  { %v6625_v44 = vrot.slane %v6615_v25, %v11186_v11  ;;  %8306 = vperm.xlu1 %8903, %v11678_v15   ;;  %v6564_v2 = vrot.slane %v6550_v47, %v11186_v11  ;;  %v3840_v8 = vrot.slane %v11765_v45, %v11118_v17  ;;  %v3844_v33 = vrot.slane %v11765_v45, %v11121_v26  ;;  %v2818_v34 = vpop.xlane.xlu0 %2817 }
 0x2a1   :  { %v6632_v36 = vrot.slane %v6616_v48, %v11186_v11  ;;  %v6639_v53 = vrot.slane %v6617_v23, %v11186_v11  ;;  %v6646_v43 = vrot.slane %v6618_v46, %v11186_v11  ;;  %v3848_v52 = vrot.slane %v11765_v45, %v11124_v28  ;;  %8336 = vperm.xlu0 %8904, %v11767_v18  }
 0x2a2   :  { %v3852_v15 = vrot.slane %v11765_v45, %v11127_v60  ;;  %v6214_v58 = vrot.slane %v6206_v40, %v11186_v11  ;;  %v6221_v37 = vrot.slane %v6207_v12, %v11186_v11  ;;  %v3856_v51 = vrot.slane %v11765_v45, %v11130_v38  ;;  %v12073_v63 = vpop.xlane.xlu1 %2826 }
 0x2a3   :  { %v3860_v32 = vrot.slane %v11765_v45, %v11133_v7  ;;  %v12065_v57 = vmax.f32 %v11948_v6, %v11985_v14  ;;  %v6647_v47 = vcombine.low %v6625_v44, %v6632_v36  ;;  %v3864_v29 = vrot.slane %v11765_v45, %v11136_v22 }
 0x2a4   :  { %v6272_v41 = vcombine.low %v3836_v62, %v3840_v8  ;;  %v12071_v35 = vmax.f32 %v11973_v5, %v2806_v20  ;;  %8309 = vperm.xlu1 %8903, %v11724_v19   ;;  %v12076_v50 = vcombine.low %v6557_v16, %v6564_v2  ;;  %v6648_v25 = vcombine.low %v6639_v53, %v6646_v43  ;;  %v2824_v5 = vpop.xlane.xlu0 %2823 }
 0x2a5   :  { %v6273_v40 = vcombine.low %v3844_v33, %v3848_v52  ;;  %v6274_v6 = vcombine.low %v3852_v15, %v3856_v51  ;;  %v6275_v14 = vcombine.low %v3860_v32, %v3864_v29  ;;  %v4124_v18 = vrot.slane %v11962_v31, %v11114_v54  ;;  %8342 = vperm.xlu0 %8904, %v11819_v49  }
 0x2a6   :  { %v4128_v45 = vrot.slane %v11962_v31, %v11118_v17  ;;  %v12083_v12 = vmax.f32 %v12000_v39, %v2812_v3  ;;  %v12085_v20 = vcombine.low %v6214_v58, %v6221_v37  ;;  %v4132_v19 = vrot.slane %v11962_v31, %v11121_v26  ;;  %v12097_v3 = vpop.xlane.xlu1 %2832 }
 0x2a7   :  { %v4136_v16 = vrot.slane %v11962_v31, %v11124_v28  ;;  %v6655_v48 = vrot.slane %v6647_v47, %v11186_v11  ;;  %v6282_v23 = vrot.slane %v6272_v41, %v11186_v11  ;;  %v6289_v46 = vrot.slane %v6273_v40, %v11186_v11 }
 0x2a8   :  { %v4140_v39 = vrot.slane %v11962_v31, %v11127_v60  ;;  %8315 = vperm.xlu1 %8903, %v11774_v21   ;;  %v6662_v44 = vrot.slane %v6648_v25, %v11186_v11  ;;  %v4144_v62 = vrot.slane %v11962_v31, %v11130_v38  ;;  %v4148_v49 = vrot.slane %v11962_v31, %v11133_v7  ;;  %v12109_v43 = vpop.xlane.xlu0 %2829 }
 0x2a9   :  { %v4152_v2 = vrot.slane %v11962_v31, %v11136_v22  ;;  %v6296_v36 = vrot.slane %v6274_v6, %v11186_v11  ;;  %v6303_v8 = vrot.slane %v6275_v14, %v11186_v11  ;;  %v6713_v33 = vcombine.low %v4124_v18, %v4128_v45  ;;  %8348 = vperm.xlu0 %8904, %v11864_v1  }
 0x2aa   :  { %v6714_v53 = vcombine.low %v4132_v19, %v4136_v16  ;;  %v6715_v21 = vcombine.low %v4140_v39, %v4144_v62  ;;  %v3900_v15 = vrot.slane %v11813_v30, %v11114_v54  ;;  %v3904_v58 = vrot.slane %v11813_v30, %v11118_v17  ;;  %v12121_v47 = vpop.xlane.xlu1 %2838 }
 0x2ab   :  { %v6716_v52 = vcombine.low %v4148_v49, %v4152_v2  ;;  %v12116_v37 = vmax.f32 %v12023_v55, %v2818_v34  ;;  %v6304_v31 = vcombine.low %v6282_v23, %v6289_v46  ;;  %v6723_v51 = vrot.slane %v6713_v33, %v11186_v11 }
 0x2ac   :  { %v6730_v32 = vrot.slane %v6714_v53, %v11186_v11  ;;  %8321 = vperm.xlu1 %8903, %v11848_v56   ;;  %v6737_v29 = vrot.slane %v6715_v21, %v11186_v11  ;;  %v3908_v25 = vrot.slane %v11813_v30, %v11121_v26  ;;  %v3912_v55 = vrot.slane %v11813_v30, %v11124_v28  ;;  %v12137_v6 = vpop.xlane.xlu0 %2835 }
 0x2ad   :  { %v6744_v41 = vrot.slane %v6716_v52, %v11186_v11  ;;  %v12131_v1 = vmax.f32 %v12042_v42, %v2824_v5  ;;  %v6305_v34 = vcombine.low %v6296_v36, %v6303_v8  ;;  %v3916_v40 = vrot.slane %v11813_v30, %v11127_v60  ;;  %8354 = vperm.xlu0 %8904, %v11918_v24  }
 0x2ae   :  { %v3920_v56 = vrot.slane %v11813_v30, %v11130_v38  ;;  %v12139_v14 = vcombine.low %v6655_v48, %v6662_v44  ;;  %v3924_v18 = vrot.slane %v11813_v30, %v11133_v7  ;;  %v3928_v45 = vrot.slane %v11813_v30, %v11136_v22  ;;  %v12146_v46 = vpop.xlane.xlu1 %2844 }
 0x2af   :  { %v6370_v19 = vcombine.low %v3900_v15, %v3904_v58  ;;  %v6745_v42 = vcombine.low %v6723_v51, %v6730_v32  ;;  %v6746_v5 = vcombine.low %v6737_v29, %v6744_v41  ;;  %v6371_v16 = vcombine.low %v3908_v25, %v3912_v55 }
 0x2b0   :  { %v6372_v23 = vcombine.low %v3916_v40, %v3920_v56  ;;  %8327 = vperm.xlu1 %8903, %v11910_v59   ;;  %v6312_v48 = vrot.slane %v6304_v31, %v11186_v11  ;;  %v6373_v39 = vcombine.low %v3924_v18, %v3928_v45  ;;  %v4188_v62 = vrot.slane %v12015_v10, %v11114_v54  ;;  %v12159_v36 = vpop.xlane.xlu0 %2841 }
 0x2b1   :  { %v6380_v44 = vrot.slane %v6370_v19, %v11186_v11  ;;  %v6319_v30 = vrot.slane %v6305_v34, %v11186_v11  ;;  %v6387_v24 = vrot.slane %v6371_v16, %v11186_v11  ;;  %v4192_v49 = vrot.slane %v12015_v10, %v11118_v17  ;;  %8360 = vperm.xlu0 %8904, %v12006_v13  }
 0x2b2   :  { %v4196_v2 = vrot.slane %v12015_v10, %v11121_v26  ;;  %v6394_v59 = vrot.slane %v6372_v23, %v11186_v11  ;;  %v6401_v8 = vrot.slane %v6373_v39, %v11186_v11  ;;  %v4200_v33 = vrot.slane %v12015_v10, %v11124_v28  ;;  %v12174_v31 = vpop.xlane.xlu1 %2850 }
 0x2b3   :  { %v4204_v53 = vrot.slane %v12015_v10, %v11127_v60  ;;  %v6753_v21 = vrot.slane %v6745_v42, %v11186_v11  ;;  %v6760_v52 = vrot.slane %v6746_v5, %v11186_v11  ;;  %v4208_v15 = vrot.slane %v12015_v10, %v11130_v38 }
 0x2b4   :  { %v4212_v58 = vrot.slane %v12015_v10, %v11133_v7  ;;  %8333 = vperm.xlu1 %8903, %v11969_v4   ;;  %v6402_v51 = vcombine.low %v6380_v44, %v6387_v24  ;;  %v4216_v32 = vrot.slane %v12015_v10, %v11136_v22  ;;  %v6811_v29 = vcombine.low %v4188_v62, %v4192_v49  ;;  %v12183_v40 = vpop.xlane.xlu0 %2847 }
 0x2b5   :  { %v6812_v13 = vcombine.low %v4196_v2, %v4200_v33  ;;  %v6320_v41 = vcombine.low %v6312_v48, %v6319_v30  ;;  %v6813_v25 = vcombine.low %v4204_v53, %v4208_v15  ;;  %v3964_v55 = vrot.slane %v11862_v0, %v11114_v54  ;;  %8366 = vperm.xlu0 %8904, %v12076_v50  }
 0x2b6   :  { %v3968_v34 = vrot.slane %v11862_v0, %v11118_v17  ;;  %v6403_v56 = vcombine.low %v6394_v59, %v6401_v8  ;;  %v6814_v18 = vcombine.low %v4212_v58, %v4216_v32  ;;  %v6821_v4 = vrot.slane %v6811_v29, %v11186_v11  ;;  %v12193_v16 = vpop.xlane.xlu1 %2856 }
 0x2b7   :  { %v6828_v45 = vrot.slane %v6812_v13, %v11186_v11  ;;  %v6761_v10 = vcombine.low %v6753_v21, %v6760_v52  ;;  %v6835_v19 = vrot.slane %v6813_v25, %v11186_v11  ;;  %v3972_v42 = vrot.slane %v11862_v0, %v11121_v26 }
 0x2b8   :  { %v3976_v5 = vrot.slane %v11862_v0, %v11124_v28  ;;  %8339 = vperm.xlu1 %8903, %v12026_v27   ;;  %v6410_v23 = vrot.slane %v6402_v51, %v11186_v11  ;;  %v6842_v48 = vrot.slane %v6814_v18, %v11186_v11  ;;  %v3980_v50 = vrot.slane %v11862_v0, %v11127_v60  ;;  %v12206_v49 = vpop.xlane.xlu0 %2853 }
 0x2b9   :  { %v6843_v39 = vcombine.low %v6821_v4, %v6828_v45  ;;  %v3984_v44 = vrot.slane %v11862_v0, %v11130_v38  ;;  %v3988_v62 = vrot.slane %v11862_v0, %v11133_v7  ;;  %v3992_v30 = vrot.slane %v11862_v0, %v11136_v22  ;;  %8372 = vperm.xlu0 %8904, %v12139_v14  }
 0x2ba   :  { %v6468_v24 = vcombine.low %v3964_v55, %v3968_v34  ;;  %v6417_v27 = vrot.slane %v6403_v56, %v11186_v11  ;;  %v6844_v2 = vcombine.low %v6835_v19, %v6842_v48  ;;  %v6469_v8 = vcombine.low %v3972_v42, %v3976_v5 }
 0x2bb   :  { %v6851_v59 = vrot.slane %v6843_v39, %v11186_v11  ;;  %v6470_v33 = vcombine.low %v3980_v50, %v3984_v44  ;;  %v6471_v53 = vcombine.low %v3988_v62, %v3992_v30  ;;  %v4252_v52 = vrot.slane %v12071_v35, %v11114_v54  ;;  %v12214_v15 = vpop.xlane.xlu1 %2862  ;;  %v13885_v50 = vld [vmem:[#allocation41_spill] sm:$0xff] }
 0x2bc   :  { %v6478_v21 = vrot.slane %v6468_v24, %v11186_v11  ;;  %8345 = vperm.xlu1 %8903, %v12085_v20   ;;  %v6858_v0 = vrot.slane %v6844_v2, %v11186_v11  ;;  %v6485_v58 = vrot.slane %v6469_v8, %v11186_v11  ;;  %v4256_v51 = vrot.slane %v12071_v35, %v11118_v17  ;;  %v12229_v25 = vpop.xlane.xlu0 %2859 }
 0x2bd   :  { %v4260_v14 = vrot.slane %v12071_v35, %v11121_v26  ;;  %v6492_v32 = vrot.slane %v6470_v33, %v11186_v11  ;;  %v6499_v29 = vrot.slane %v6471_v53, %v11186_v11  ;;  %v4264_v13 = vrot.slane %v12071_v35, %v11124_v28  ;;  %8378 = vperm.xlu0 %8904, %v6761_v10  }
 0x2be   :  { %v4268_v20 = vrot.slane %v12071_v35, %v11127_v60  ;;  %v6418_v55 = vcombine.low %v6410_v23, %v6417_v27  ;;  %v6500_v34 = vcombine.low %v6478_v21, %v6485_v58  ;;  %v4272_v56 = vrot.slane %v12071_v35, %v11130_v38 }
 0x2bf   :  { %v4276_v18 = vrot.slane %v12071_v35, %v11133_v7  ;;  %v6859_v4 = vcombine.low %v6851_v59, %v6858_v0  ;;  %v6501_v45 = vcombine.low %v6492_v32, %v6499_v29  ;;  %v4280_v19 = vrot.slane %v12071_v35, %v11136_v22  ;;  %v12237_v5 = vpop.xlane.xlu1 %2868 }
 0x2c0   :  { %v6909_v42 = vcombine.low %v4252_v52, %v4256_v51  ;;  %8351 = vperm.xlu1 %8903, %v6320_v41   ;;  %v6508_v48 = vrot.slane %v6500_v34, %v11186_v11  ;;  %v6910_v23 = vcombine.low %v4260_v14, %v4264_v13  ;;  %v6911_v39 = vcombine.low %v4268_v20, %v4272_v56  ;;  %v12246_v35 = vpop.xlane.xlu0 %2865 }
 0x2c1   :  { %v4028_v44 = vrot.slane %v13885_v50, %v11114_v54  ;;  %v6515_v62 = vrot.slane %v6501_v45, %v11186_v11  ;;  %v6912_v30 = vcombine.low %v4276_v18, %v4280_v19  ;;  %v4032_v24 = vrot.slane %v13885_v50, %v11118_v17  ;;  %8384 = vperm.xlu0 %8904, %v6859_v4  }
 0x2c2   :  { %v6919_v10 = vrot.slane %v6909_v42, %v11186_v11  ;;  %v6926_v27 = vrot.slane %v6910_v23, %v11186_v11  ;;  %v6933_v41 = vrot.slane %v6911_v39, %v11186_v11  ;;  %v4036_v2 = vrot.slane %v13885_v50, %v11121_v26 }
 0x2c3   :  { %v4040_v59 = vrot.slane %v13885_v50, %v11124_v28  ;;  %v12256_v8 = vmax.f32 %v12073_v63, %v12109_v43  ;;  %v6516_v33 = vcombine.low %v6508_v48, %v6515_v62  ;;  %v6940_v53 = vrot.slane %v6912_v30, %v11186_v11  ;;  %v12261_v52 = vpop.xlane.xlu1 %2874 }
 0x2c4   :  { %v4044_v21 = vrot.slane %v13885_v50, %v11127_v60  ;;  %8357 = vperm.xlu1 %8903, %v6418_v55   ;;  %v6941_v0 = vcombine.low %v6919_v10, %v6926_v27  ;;  %v4048_v58 = vrot.slane %v13885_v50, %v11130_v38  ;;  %v4052_v51 = vrot.slane %v13885_v50, %v11133_v7  ;;  %v12271_v13 = vpop.xlane.xlu0 %2871 }
 0x2c5   :  { %v4056_v63 = vrot.slane %v13885_v50, %v11136_v22  ;;  %v6942_v43 = vcombine.low %v6933_v41, %v6940_v53  ;;  %v6566_v14 = vcombine.low %v4028_v44, %v4032_v24  ;;  %v6567_v32 = vcombine.low %v4036_v2, %v4040_v59 }
 0x2c6   :  { %v4316_v29 = vrot.slane %v12116_v37, %v11114_v54  ;;  %v6949_v20 = vrot.slane %v6941_v0, %v11186_v11  ;;  %v6568_v55 = vcombine.low %v4044_v21, %v4048_v58  ;;  %v4320_v56 = vrot.slane %v12116_v37, %v11118_v17 }
 0x2c7   :  { %v6569_v34 = vcombine.low %v4052_v51, %v4056_v63  ;;  %v12278_v18 = vmax.f32 %v12097_v3, %v12137_v6  ;;  %v6956_v4 = vrot.slane %v6942_v43, %v11186_v11  ;;  %v6576_v45 = vrot.slane %v6566_v14, %v11186_v11  ;;  %v12283_v42 = vpop.xlane.xlu1 %2880 }
 0x2c8   :  { %v6583_v19 = vrot.slane %v6567_v32, %v11186_v11  ;;  %8363 = vperm.xlu1 %8903, %v6516_v33   ;;  %v6590_v48 = vrot.slane %v6568_v55, %v11186_v11  ;;  %v4324_v39 = vrot.slane %v12116_v37, %v11121_v26  ;;  %v4328_v3 = vrot.slane %v12116_v37, %v11124_v28  ;;  %v12295_v10 = vpop.xlane.xlu0 %2877 }
 0x2c9   :  { %v6597_v23 = vrot.slane %v6569_v34, %v11186_v11  ;;  %v6957_v6 = vcombine.low %v6949_v20, %v6956_v4  ;;  %v4332_v44 = vrot.slane %v12116_v37, %v11127_v60  ;;  %v4336_v62 = vrot.slane %v12116_v37, %v11130_v38 }
 0x2ca   :  { %v6598_v50 = vcombine.low %v6576_v45, %v6583_v19  ;;  %v4340_v24 = vrot.slane %v12116_v37, %v11133_v7  ;;  %v4344_v27 = vrot.slane %v12116_v37, %v11136_v22  ;;  %v7007_v41 = vcombine.low %v4316_v29, %v4320_v56 }
 0x2cb   :  { %v6599_v30 = vcombine.low %v6590_v48, %v6597_v23  ;;  %v12303_v2 = vmax.f32 %v12121_v47, %v12159_v36  ;;  %8390 = vperm.xlu0 %8904, %v6957_v6   ;;  %v7008_v33 = vcombine.low %v4324_v39, %v4328_v3  ;;  %v7009_v53 = vcombine.low %v4332_v44, %v4336_v62  ;;  %v12306_v21 = vpop.xlane.xlu1 %2886 }
 0x2cc   :  { %v6606_v59 = vrot.slane %v6598_v50, %v11186_v11  ;;  %v7010_v58 = vcombine.low %v4340_v24, %v4344_v27  ;;  %v7017_v51 = vrot.slane %v7007_v41, %v11186_v11  ;;  %v4092_v37 = vrot.slane %v11916_v9, %v11114_v54  ;;  %v12323_v55 = vpop.xlane.xlu0 %2883 }
 0x2cd   :  { %v6613_v0 = vrot.slane %v6599_v30, %v11186_v11  ;;  %v7024_v63 = vrot.slane %v7008_v33, %v11186_v11  ;;  %v7031_v47 = vrot.slane %v7009_v53, %v11186_v11  ;;  %v4096_v36 = vrot.slane %v11916_v9, %v11118_v17 }
 0x2ce   :  { %v4100_v43 = vrot.slane %v11916_v9, %v11121_v26  ;;  %v7038_v32 = vrot.slane %v7010_v58, %v11186_v11  ;;  %v4104_v29 = vrot.slane %v11916_v9, %v11124_v28  ;;  %v4108_v20 = vrot.slane %v11916_v9, %v11127_v60 }
 0x2cf   :  { %v6614_v14 = vcombine.low %v6606_v59, %v6613_v0  ;;  %v7039_v34 = vcombine.low %v7017_v51, %v7024_v63  ;;  %v4112_v56 = vrot.slane %v11916_v9, %v11130_v38  ;;  %v4116_v4 = vrot.slane %v11916_v9, %v11133_v7  ;;  %v12335_v23 = vpop.xlane.xlu1 %2892 }
 0x2d0   :  { %v4120_v45 = vrot.slane %v11916_v9, %v11136_v22  ;;  %v12333_v19 = vmax.f32 %v12146_v46, %v12183_v40  ;;  %v7040_v48 = vcombine.low %v7031_v47, %v7038_v32  ;;  %v6664_v39 = vcombine.low %v4092_v37, %v4096_v36  ;;  %v12345_v24 = vpop.xlane.xlu0 %2889 }
 0x2d1   :  { %8369 = vperm.xlu1 %8903, %v6614_v14   ;;  %v6665_v3 = vcombine.low %v4100_v43, %v4104_v29  ;;  %v7047_v6 = vrot.slane %v7039_v34, %v11186_v11  ;;  %v6666_v50 = vcombine.low %v4108_v20, %v4112_v56  ;;  %v4380_v62 = vrot.slane %v12256_v8, %v11114_v54 }
 0x2d2   :  { %v6667_v44 = vcombine.low %v4116_v4, %v4120_v45  ;;  %v7054_v30 = vrot.slane %v7040_v48, %v11186_v11  ;;  %v6674_v9 = vrot.slane %v6664_v39, %v11186_v11  ;;  %v4384_v40 = vrot.slane %v12256_v8, %v11118_v17 }
 0x2d3   :  { %v6681_v46 = vrot.slane %v6665_v3, %v11186_v11  ;;  %v6688_v27 = vrot.slane %v6666_v50, %v11186_v11  ;;  %v4388_v59 = vrot.slane %v12256_v8, %v11121_v26  ;;  %v4392_v33 = vrot.slane %v12256_v8, %v11124_v28  ;;  %v12357_v37 = vpop.xlane.xlu1 %2898 }
 0x2d4   :  { %v6695_v41 = vrot.slane %v6667_v44, %v11186_v11  ;;  %v7055_v53 = vcombine.low %v7047_v6, %v7054_v30  ;;  %v4396_v58 = vrot.slane %v12256_v8, %v11127_v60  ;;  %v4400_v51 = vrot.slane %v12256_v8, %v11130_v38  ;;  %v12366_v34 = vpop.xlane.xlu0 %2895 }
 0x2d5   :  { %v6696_v0 = vcombine.low %v6674_v9, %v6681_v46  ;;  %v4404_v47 = vrot.slane %v12256_v8, %v11133_v7  ;;  %v4408_v36 = vrot.slane %v12256_v8, %v11136_v22  ;;  %v7105_v43 = vcombine.low %v4380_v62, %v4384_v40 }
 0x2d6   :  { %v6697_v63 = vcombine.low %v6688_v27, %v6695_v41  ;;  %8396 = vperm.xlu0 %8904, %v7055_v53   ;;  %v7106_v32 = vcombine.low %v4388_v59, %v4392_v33  ;;  %v7107_v29 = vcombine.low %v4396_v58, %v4400_v51  ;;  %v4156_v20 = vrot.slane %v11971_v61, %v11114_v54 }
 0x2d7   :  { %v6704_v14 = vrot.slane %v6696_v0, %v11186_v11  ;;  %v7108_v4 = vcombine.low %v4404_v47, %v4408_v36  ;;  %v7115_v45 = vrot.slane %v7105_v43, %v11186_v11  ;;  %v4160_v48 = vrot.slane %v11971_v61, %v11118_v17  ;;  %v12378_v50 = vpop.xlane.xlu1 %2904 }
 0x2d8   :  { %v6711_v56 = vrot.slane %v6697_v63, %v11186_v11  ;;  %v7122_v8 = vrot.slane %v7106_v32, %v11186_v11  ;;  %v7129_v39 = vrot.slane %v7107_v29, %v11186_v11  ;;  %v4164_v3 = vrot.slane %v11971_v61, %v11121_v26  ;;  %v12397_v43 = vpop.xlane.xlu0 %2901 }
 0x2d9   :  { %v4168_v6 = vrot.slane %v11971_v61, %v11124_v28  ;;  %v7136_v62 = vrot.slane %v7108_v4, %v11186_v11  ;;  %v4172_v30 = vrot.slane %v11971_v61, %v11127_v60  ;;  %v4176_v9 = vrot.slane %v11971_v61, %v11130_v38 }
 0x2da   :  { %v6712_v44 = vcombine.low %v6704_v14, %v6711_v56  ;;  %v7137_v46 = vcombine.low %v7115_v45, %v7122_v8  ;;  %v4180_v40 = vrot.slane %v11971_v61, %v11133_v7  ;;  %v4184_v27 = vrot.slane %v11971_v61, %v11136_v22 }
 0x2db   :  { %v6762_v41 = vcombine.low %v4156_v20, %v4160_v48  ;;  %v3017_v59 = vmax.f32 %v12261_v52, %v12295_v10  ;;  %v7138_v33 = vcombine.low %v7129_v39, %v7136_v62  ;;  %v6763_v53 = vcombine.low %v4164_v3, %v4168_v6  ;;  %v12395_v36 = vpop.xlane.xlu1 %2910 }
 0x2dc   :  { %8375 = vperm.xlu1 %8903, %v6712_v44   ;;  %v6764_v0 = vcombine.low %v4172_v30, %v4176_v9  ;;  %v7145_v58 = vrot.slane %v7137_v46, %v11186_v11  ;;  %v6765_v51 = vcombine.low %v4180_v40, %v4184_v27  ;;  %v4220_v47 = vrot.slane %v12065_v57, %v11114_v54 }
 0x2dd   :  { %v6772_v63 = vrot.slane %v6762_v41, %v11186_v11  ;;  %v7152_v61 = vrot.slane %v7138_v33, %v11186_v11  ;;  %v6779_v52 = vrot.slane %v6763_v53, %v11186_v11  ;;  %v4224_v14 = vrot.slane %v12065_v57, %v11118_v17  ;;  %v12428_v53 = vpop.xlane.xlu0 %2907 }
 0x2de   :  { %v6786_v10 = vrot.slane %v6764_v0, %v11186_v11  ;;  %v6793_v32 = vrot.slane %v6765_v51, %v11186_v11  ;;  %v4228_v29 = vrot.slane %v12065_v57, %v11121_v26  ;;  %v4232_v20 = vrot.slane %v12065_v57, %v11124_v28 }
 0x2df   :  { %v4236_v56 = vrot.slane %v12065_v57, %v11127_v60  ;;  %v7153_v4 = vcombine.low %v7145_v58, %v7152_v61  ;;  %v6794_v45 = vcombine.low %v6772_v63, %v6779_v52  ;;  %v4240_v48 = vrot.slane %v12065_v57, %v11130_v38  ;;  %v12417_v62 = vpop.xlane.xlu1 %2916 }
 0x2e0   :  { %v4244_v8 = vrot.slane %v12065_v57, %v11133_v7  ;;  %v6795_v39 = vcombine.low %v6786_v10, %v6793_v32  ;;  %v4248_v3 = vrot.slane %v12065_v57, %v11136_v22  ;;  %v6860_v6 = vcombine.low %v4220_v47, %v4224_v14 }
 0x2e1   :  { %v6861_v44 = vcombine.low %v4228_v29, %v4232_v20  ;;  %v12421_v30 = vmax.f32 %v12283_v42, %v12323_v55  ;;  %8402 = vperm.xlu0 %8904, %v7153_v4   ;;  %v6802_v9 = vrot.slane %v6794_v45, %v11186_v11  ;;  %v6862_v46 = vcombine.low %v4236_v56, %v4240_v48 }
 0x2e2   :  { %v4636_v40 = vrot.slane %v3017_v59, %v11114_v54  ;;  %v6809_v27 = vrot.slane %v6795_v39, %v11186_v11  ;;  %v6863_v41 = vcombine.low %v4244_v8, %v4248_v3  ;;  %v6870_v33 = vrot.slane %v6860_v6, %v11186_v11 }
 0x2e3   :  { %v6877_v57 = vrot.slane %v6861_v44, %v11186_v11  ;;  %v6884_v0 = vrot.slane %v6862_v46, %v11186_v11  ;;  %v4640_v42 = vrot.slane %v3017_v59, %v11118_v17  ;;  %v4644_v55 = vrot.slane %v3017_v59, %v11121_v26  ;;  %v12436_v52 = vpop.xlane.xlu1 %2922  ;;  %v12453_v46 = vpop.xlane.xlu0 %2913 }
 0x2e4   :  { %v4648_v58 = vrot.slane %v3017_v59, %v11124_v28  ;;  %v6810_v51 = vcombine.low %v6802_v9, %v6809_v27  ;;  %v6891_v63 = vrot.slane %v6863_v41, %v11186_v11  ;;  %v4652_v61 = vrot.slane %v3017_v59, %v11127_v60 }
 0x2e5   :  { %v6892_v47 = vcombine.low %v6870_v33, %v6877_v57  ;;  %v4656_v10 = vrot.slane %v3017_v59, %v11130_v38  ;;  %v4660_v14 = vrot.slane %v3017_v59, %v11133_v7  ;;  %v4664_v32 = vrot.slane %v3017_v59, %v11136_v22 }
 0x2e6   :  { %v7497_v29 = vcombine.low %v4636_v40, %v4640_v42  ;;  %8381 = vperm.xlu1 %8903, %v6810_v51   ;;  %v6893_v20 = vcombine.low %v6884_v0, %v6891_v63  ;;  %v7498_v4 = vcombine.low %v4644_v55, %v4648_v58  ;;  %v4284_v45 = vrot.slane %v12083_v12, %v11114_v54 }
 0x2e7   :  { %v6900_v56 = vrot.slane %v6892_v47, %v11186_v11  ;;  %v7499_v48 = vcombine.low %v4652_v61, %v4656_v10  ;;  %v7500_v8 = vcombine.low %v4660_v14, %v4664_v32  ;;  %v4288_v3 = vrot.slane %v12083_v12, %v11118_v17  ;;  %v12455_v40 = vpop.xlane.xlu1 %2928 }
 0x2e8   :  { %v7507_v39 = vrot.slane %v7497_v29, %v11186_v11  ;;  %v6907_v6 = vrot.slane %v6893_v20, %v11186_v11  ;;  %v7514_v59 = vrot.slane %v7498_v4, %v11186_v11  ;;  %v4292_v44 = vrot.slane %v12083_v12, %v11121_v26 }
 0x2e9   :  { %v4296_v9 = vrot.slane %v12083_v12, %v11124_v28  ;;  %v7521_v27 = vrot.slane %v7499_v48, %v11186_v11  ;;  %v7528_v41 = vrot.slane %v7500_v8, %v11186_v11  ;;  %v4300_v33 = vrot.slane %v12083_v12, %v11127_v60 }
 0x2ea   :  { %v4304_v57 = vrot.slane %v12083_v12, %v11130_v38  ;;  %v6908_v0 = vcombine.low %v6900_v56, %v6907_v6  ;;  %v7529_v42 = vcombine.low %v7507_v39, %v7514_v59  ;;  %v4308_v55 = vrot.slane %v12083_v12, %v11133_v7  ;;  %v12485_v39 = vpop.xlane.xlu0 %2919 }
 0x2eb   :  { %v4312_v58 = vrot.slane %v12083_v12, %v11136_v22  ;;  %v7530_v51 = vcombine.low %v7521_v27, %v7528_v41  ;;  %v6958_v63 = vcombine.low %v4284_v45, %v4288_v3  ;;  %v6959_v47 = vcombine.low %v4292_v44, %v4296_v9  ;;  %v12472_v20 = vpop.xlane.xlu1 %2934 }
 0x2ec   :  { %v6960_v61 = vcombine.low %v4300_v33, %v4304_v57  ;;  %v3019_v10 = vmax.f32 %v12306_v21, %v12345_v24  ;;  %8387 = vperm.xlu1 %8903, %v6908_v0   ;;  %v7537_v14 = vrot.slane %v7529_v42, %v11186_v11  ;;  %v4348_v29 = vrot.slane %v12131_v1, %v11114_v54 }
 0x2ed   :  { %v6961_v32 = vcombine.low %v4308_v55, %v4312_v58  ;;  %v7544_v56 = vrot.slane %v7530_v51, %v11186_v11  ;;  %v6968_v12 = vrot.slane %v6958_v63, %v11186_v11  ;;  %v6975_v4 = vrot.slane %v6959_v47, %v11186_v11 }
 0x2ee   :  { %v6982_v45 = vrot.slane %v6960_v61, %v11186_v11  ;;  %v4352_v21 = vrot.slane %v12131_v1, %v11118_v17  ;;  %v4356_v24 = vrot.slane %v12131_v1, %v11121_v26  ;;  %v4360_v8 = vrot.slane %v12131_v1, %v11124_v28 }
 0x2ef   :  { %v6989_v48 = vrot.slane %v6961_v32, %v11186_v11  ;;  %v7545_v3 = vcombine.low %v7537_v14, %v7544_v56  ;;  %v6990_v6 = vcombine.low %v6968_v12, %v6975_v4  ;;  %v4364_v59 = vrot.slane %v12131_v1, %v11127_v60  ;;  %v12495_v57 = vpop.xlane.xlu1 %2940  ;;  %v12512_v4 = vpop.xlane.xlu0 %2925 }
 0x2f0   :  { %v4368_v44 = vrot.slane %v12131_v1, %v11130_v38  ;;  %v4372_v27 = vrot.slane %v12131_v1, %v11133_v7  ;;  %v4376_v41 = vrot.slane %v12131_v1, %v11136_v22  ;;  %v7056_v33 = vcombine.low %v4348_v29, %v4352_v21 }
 0x2f1   :  { %v6991_v9 = vcombine.low %v6982_v45, %v6989_v48  ;;  %v12499_v0 = vmax.f32 %v12335_v23, %v12366_v34  ;;  %8426 = vperm.xlu0 %8904, %v7545_v3   ;;  %v6998_v42 = vrot.slane %v6990_v6, %v11186_v11  ;;  %v7057_v55 = vcombine.low %v4356_v24, %v4360_v8 }
 0x2f2   :  { %v7058_v58 = vcombine.low %v4364_v59, %v4368_v44  ;;  %v7059_v63 = vcombine.low %v4372_v27, %v4376_v41  ;;  %v7066_v47 = vrot.slane %v7056_v33, %v11186_v11  ;;  %v4700_v61 = vrot.slane %v3019_v10, %v11114_v54 }
 0x2f3   :  { %v7005_v51 = vrot.slane %v6991_v9, %v11186_v11  ;;  %v7073_v1 = vrot.slane %v7057_v55, %v11186_v11  ;;  %v4704_v32 = vrot.slane %v3019_v10, %v11118_v17  ;;  %v4708_v23 = vrot.slane %v3019_v10, %v11121_v26  ;;  %v12514_v45 = vpop.xlane.xlu1 %2946 }
 0x2f4   :  { %v7080_v14 = vrot.slane %v7058_v58, %v11186_v11  ;;  %v7087_v29 = vrot.slane %v7059_v63, %v11186_v11  ;;  %v4712_v56 = vrot.slane %v3019_v10, %v11124_v28  ;;  %v4716_v12 = vrot.slane %v3019_v10, %v11127_v60 }
 0x2f5   :  { %v7006_v34 = vcombine.low %v6998_v42, %v7005_v51  ;;  %v7088_v48 = vcombine.low %v7066_v47, %v7073_v1  ;;  %v4720_v21 = vrot.slane %v3019_v10, %v11130_v38  ;;  %v4724_v24 = vrot.slane %v3019_v10, %v11133_v7 }
 0x2f6   :  { %v4728_v8 = vrot.slane %v3019_v10, %v11136_v22  ;;  %v7089_v3 = vcombine.low %v7080_v14, %v7087_v29  ;;  %v7595_v6 = vcombine.low %v4700_v61, %v4704_v32  ;;  %v7596_v59 = vcombine.low %v4708_v23, %v4712_v56  ;;  %v12541_v29 = vpop.xlane.xlu0 %2931 }
 0x2f7   :  { %8393 = vperm.xlu1 %8903, %v7006_v34   ;;  %v4412_v44 = vrot.slane %v12278_v18, %v11114_v54  ;;  %v7096_v9 = vrot.slane %v7088_v48, %v11186_v11  ;;  %v7597_v27 = vcombine.low %v4716_v12, %v4720_v21  ;;  %v4416_v33 = vrot.slane %v12278_v18, %v11118_v17  ;;  %v12529_v51 = vpop.xlane.xlu1 %2952 }
 0x2f8   :  { %v7598_v41 = vcombine.low %v4724_v24, %v4728_v8  ;;  %v7103_v42 = vrot.slane %v7089_v3, %v11186_v11  ;;  %v7605_v55 = vrot.slane %v7595_v6, %v11186_v11  ;;  %v7612_v10 = vrot.slane %v7596_v59, %v11186_v11 }
 0x2f9   :  { %v4420_v58 = vrot.slane %v12278_v18, %v11121_v26  ;;  %v7619_v63 = vrot.slane %v7597_v27, %v11186_v11  ;;  %v4424_v61 = vrot.slane %v12278_v18, %v11124_v28  ;;  %v4428_v1 = vrot.slane %v12278_v18, %v11127_v60 }
 0x2fa   :  { %v7626_v47 = vrot.slane %v7598_v41, %v11186_v11  ;;  %v7104_v14 = vcombine.low %v7096_v9, %v7103_v42  ;;  %v7627_v32 = vcombine.low %v7605_v55, %v7612_v10  ;;  %v4432_v23 = vrot.slane %v12278_v18, %v11130_v38 }
 0x2fb   :  { %v4436_v34 = vrot.slane %v12278_v18, %v11133_v7  ;;  %v4440_v12 = vrot.slane %v12278_v18, %v11136_v22  ;;  %v7154_v48 = vcombine.low %v4412_v44, %v4416_v33  ;;  %v7155_v21 = vcombine.low %v4420_v58, %v4424_v61  ;;  %v12550_v59 = vpop.xlane.xlu1 %2958 }
 0x2fc   :  { %v7628_v56 = vcombine.low %v7619_v63, %v7626_v47  ;;  %v3021_v24 = vmax.f32 %v12357_v37, %v12397_v43  ;;  %8399 = vperm.xlu1 %8903, %v7104_v14   ;;  %v7635_v8 = vrot.slane %v7627_v32, %v11186_v11  ;;  %v7156_v3 = vcombine.low %v4428_v1, %v4432_v23  ;;  %v12571_v14 = vpop.xlane.xlu0 %2937 }
 0x2fd   :  { %v4668_v6 = vrot.slane %v12421_v30, %v11114_v54  ;;  %v7157_v27 = vcombine.low %v4436_v34, %v4440_v12  ;;  %v7164_v41 = vrot.slane %v7154_v48, %v11186_v11  ;;  %v7171_v18 = vrot.slane %v7155_v21, %v11186_v11 }
 0x2fe   :  { %v7642_v9 = vrot.slane %v7628_v56, %v11186_v11  ;;  %v7178_v44 = vrot.slane %v7156_v3, %v11186_v11  ;;  %v4672_v37 = vrot.slane %v12421_v30, %v11118_v17  ;;  %v4676_v43 = vrot.slane %v12421_v30, %v11121_v26 }
 0x2ff   :  { %v4680_v33 = vrot.slane %v12421_v30, %v11124_v28  ;;  %v7185_v55 = vrot.slane %v7157_v27, %v11186_v11  ;;  %v7186_v10 = vcombine.low %v7164_v41, %v7171_v18  ;;  %v4684_v58 = vrot.slane %v12421_v30, %v11127_v60  ;;  %v12573_v32 = vpop.xlane.xlu1 %2964 }
 0x300   :  { %v7643_v42 = vcombine.low %v7635_v8, %v7642_v9  ;;  %v4688_v63 = vrot.slane %v12421_v30, %v11130_v38  ;;  %v4692_v47 = vrot.slane %v12421_v30, %v11133_v7  ;;  %v4696_v61 = vrot.slane %v12421_v30, %v11136_v22 }
 0x301   :  { %v7546_v1 = vcombine.low %v4668_v6, %v4672_v37  ;;  %v12577_v23 = vmax.f32 %v12378_v50, %v12428_v53  ;;  %v7187_v34 = vcombine.low %v7178_v44, %v7185_v55  ;;  %v7194_v56 = vrot.slane %v7186_v10, %v11186_v11 }
 0x302   :  { %8432 = vperm.xlu0 %8904, %v7643_v42   ;;  %v7547_v12 = vcombine.low %v4676_v43, %v4680_v33  ;;  %v7548_v48 = vcombine.low %v4684_v58, %v4688_v63  ;;  %v7549_v21 = vcombine.low %v4692_v47, %v4696_v61  ;;  %v4764_v30 = vrot.slane %v3021_v24, %v11114_v54  ;;  %v12595_v47 = vpop.xlane.xlu0 %2943 }
 0x303   :  { %v7556_v8 = vrot.slane %v7546_v1, %v11186_v11  ;;  %v7201_v3 = vrot.slane %v7187_v34, %v11186_v11  ;;  %v4768_v9 = vrot.slane %v3021_v24, %v11118_v17  ;;  %v4772_v50 = vrot.slane %v3021_v24, %v11121_v26  ;;  %v12590_v44 = vpop.permute.xlu1 %8282 }
 0x304   :  { %v7563_v6 = vrot.slane %v7547_v12, %v11186_v11  ;;  %v7570_v53 = vrot.slane %v7548_v48, %v11186_v11  ;;  %v7577_v27 = vrot.slane %v7549_v21, %v11186_v11  ;;  %v4776_v41 = vrot.slane %v3021_v24, %v11124_v28 }
 0x305   :  { %v4780_v18 = vrot.slane %v3021_v24, %v11127_v60  ;;  %v7202_v37 = vcombine.low %v7194_v56, %v7201_v3  ;;  %v4784_v33 = vrot.slane %v3021_v24, %v11130_v38  ;;  %v4788_v42 = vrot.slane %v3021_v24, %v11133_v7 }
 0x306   :  { %v7578_v43 = vcombine.low %v7556_v8, %v7563_v6  ;;  %v7579_v55 = vcombine.low %v7570_v53, %v7577_v27  ;;  %v4792_v10 = vrot.slane %v3021_v24, %v11136_v22  ;;  %v7693_v58 = vcombine.low %v4764_v30, %v4768_v9 }
 0x307   :  { %v7694_v63 = vcombine.low %v4772_v50, %v4776_v41  ;;  %8405 = vperm.xlu1 %8903, %v7202_v37   ;;  %v7695_v1 = vcombine.low %v4780_v18, %v4784_v33  ;;  %v4732_v34 = vrot.slane %v12499_v0, %v11114_v54  ;;  %v4736_v56 = vrot.slane %v12499_v0, %v11118_v17  ;;  %v12605_v8 = vpop.permute.xlu1 %8288 }
 0x308   :  { %v7586_v61 = vrot.slane %v7578_v43, %v11186_v11  ;;  %v7593_v12 = vrot.slane %v7579_v55, %v11186_v11  ;;  %v7696_v48 = vcombine.low %v4788_v42, %v4792_v10  ;;  %v7703_v21 = vrot.slane %v7693_v58, %v11186_v11 }
 0x309   :  { %v7710_v24 = vrot.slane %v7694_v63, %v11186_v11  ;;  %v7717_v30 = vrot.slane %v7695_v1, %v11186_v11  ;;  %v4740_v3 = vrot.slane %v12499_v0, %v11121_v26  ;;  %v4744_v6 = vrot.slane %v12499_v0, %v11124_v28  ;;  %v12624_v63 = vpop.xlane.xlu0 %2949 }
 0x30a   :  { %v4748_v9 = vrot.slane %v12499_v0, %v11127_v60  ;;  %v7594_v50 = vcombine.low %v7586_v61, %v7593_v12  ;;  %v7724_v53 = vrot.slane %v7696_v48, %v11186_v11  ;;  %v4752_v41 = vrot.slane %v12499_v0, %v11130_v38 }
 0x30b   :  { %v7725_v27 = vcombine.low %v7703_v21, %v7710_v24  ;;  %v4756_v18 = vrot.slane %v12499_v0, %v11133_v7  ;;  %v4760_v37 = vrot.slane %v12499_v0, %v11136_v22  ;;  %v7644_v43 = vcombine.low %v4732_v34, %v4736_v56  ;;  %v12626_v61 = vpop.permute.xlu1 %8291 }
 0x30c   :  { %v7645_v33 = vcombine.low %v4740_v3, %v4744_v6  ;;  %v3023_v42 = vmax.f32 %v12395_v36, %v12453_v46  ;;  %8429 = vperm.xlu1 %8903, %v7594_v50   ;;  %v7726_v55 = vcombine.low %v7717_v30, %v7724_v53  ;;  %v7646_v58 = vcombine.low %v4748_v9, %v4752_v41 }
 0x30d   :  { %v7733_v10 = vrot.slane %v7725_v27, %v11186_v11  ;;  %v7647_v1 = vcombine.low %v4756_v18, %v4760_v37  ;;  %v7654_v12 = vrot.slane %v7644_v43, %v11186_v11  ;;  %v4796_v0 = vrot.slane %v12577_v23, %v11114_v54 }
 0x30e   :  { %v7661_v48 = vrot.slane %v7645_v33, %v11186_v11  ;;  %v7740_v34 = vrot.slane %v7726_v55, %v11186_v11  ;;  %v7668_v36 = vrot.slane %v7646_v58, %v11186_v11  ;;  %v4800_v46 = vrot.slane %v12577_v23, %v11118_v17 }
 0x30f   :  { %v4804_v56 = vrot.slane %v12577_v23, %v11121_v26  ;;  %v7675_v21 = vrot.slane %v7647_v1, %v11186_v11  ;;  %v4808_v30 = vrot.slane %v12577_v23, %v11124_v28  ;;  %v4812_v3 = vrot.slane %v12577_v23, %v11127_v60  ;;  %v12649_v27 = vpop.permute.xlu1 %8294  ;;  %v12655_v1 = vpop.xlane.xlu0 %2955 }
 0x310   :  { %v7676_v24 = vcombine.low %v7654_v12, %v7661_v48  ;;  %v7741_v6 = vcombine.low %v7733_v10, %v7740_v34  ;;  %v4816_v9 = vrot.slane %v12577_v23, %v11130_v38  ;;  %v4820_v50 = vrot.slane %v12577_v23, %v11133_v7 }
 0x311   :  { %v4824_v53 = vrot.slane %v12577_v23, %v11136_v22  ;;  %v7677_v41 = vcombine.low %v7668_v36, %v7675_v21  ;;  %v7742_v37 = vcombine.low %v4796_v0, %v4800_v46  ;;  %v7743_v43 = vcombine.low %v4804_v56, %v4808_v30 }
 0x312   :  { %v7684_v18 = vrot.slane %v7676_v24, %v11186_v11  ;;  %v3024_v33 = vmax.f32 %v12417_v62, %v12485_v39  ;;  %8438 = vperm.xlu0 %8904, %v7741_v6   ;;  %v7744_v55 = vcombine.low %v4812_v3, %v4816_v9  ;;  %v4828_v58 = vrot.slane %v3023_v42, %v11114_v54 }
 0x313   :  { %v7745_v10 = vcombine.low %v4820_v50, %v4824_v53  ;;  %v7691_v12 = vrot.slane %v7677_v41, %v11186_v11  ;;  %v7752_v23 = vrot.slane %v7742_v37, %v11186_v11  ;;  %v7759_v48 = vrot.slane %v7743_v43, %v11186_v11  ;;  %v12665_v46 = vpop.permute.xlu1 %8297 }
 0x314   :  { %v4832_v34 = vrot.slane %v3023_v42, %v11118_v17  ;;  %v7766_v0 = vrot.slane %v7744_v55, %v11186_v11  ;;  %v4836_v62 = vrot.slane %v3023_v42, %v11121_v26  ;;  %v4840_v39 = vrot.slane %v3023_v42, %v11124_v28 }
 0x315   :  { %v7773_v36 = vrot.slane %v7745_v10, %v11186_v11  ;;  %v7692_v56 = vcombine.low %v7684_v18, %v7691_v12  ;;  %v7774_v21 = vcombine.low %v7752_v23, %v7759_v48  ;;  %v4844_v24 = vrot.slane %v3023_v42, %v11127_v60  ;;  %v12677_v23 = vpop.xlane.xlu0 %2961 }
 0x316   :  { %v4848_v30 = vrot.slane %v3023_v42, %v11130_v38  ;;  %v4852_v6 = vrot.slane %v3023_v42, %v11133_v7  ;;  %v4856_v9 = vrot.slane %v3023_v42, %v11136_v22  ;;  %v7791_v50 = vcombine.low %v4828_v58, %v4832_v34 }
 0x317   :  { %v7775_v3 = vcombine.low %v7766_v0, %v7773_v36  ;;  %8435 = vperm.xlu1 %8903, %v7692_v56   ;;  %v3025_v53 = vmax.f32 %v12436_v52, %v12512_v4  ;;  %v7782_v41 = vrot.slane %v7774_v21, %v11186_v11  ;;  %v7792_v37 = vcombine.low %v4836_v62, %v4840_v39  ;;  %v12679_v48 = vpop.permute.xlu1 %8300 }
 0x318   :  { %v7793_v43 = vcombine.low %v4844_v24, %v4848_v30  ;;  %v7794_v55 = vcombine.low %v4852_v6, %v4856_v9  ;;  %v7801_v10 = vrot.slane %v7791_v50, %v11186_v11  ;;  %v4860_v12 = vrot.slane %v3024_v33, %v11114_v54 }
 0x319   :  { %v7789_v18 = vrot.slane %v7775_v3, %v11186_v11  ;;  %v7808_v42 = vrot.slane %v7792_v37, %v11186_v11  ;;  %v4864_v52 = vrot.slane %v3024_v33, %v11118_v17  ;;  %v4868_v4 = vrot.slane %v3024_v33, %v11121_v26 }
 0x31a   :  { %v7815_v58 = vrot.slane %v7793_v43, %v11186_v11  ;;  %v7822_v0 = vrot.slane %v7794_v55, %v11186_v11  ;;  %v4872_v36 = vrot.slane %v3024_v33, %v11124_v28  ;;  %v4876_v62 = vrot.slane %v3024_v33, %v11127_v60 }
 0x31b   :  { %v7790_v34 = vcombine.low %v7782_v41, %v7789_v18  ;;  %v7823_v39 = vcombine.low %v7801_v10, %v7808_v42  ;;  %v4880_v56 = vrot.slane %v3024_v33, %v11130_v38  ;;  %v4884_v21 = vrot.slane %v3024_v33, %v11133_v7  ;;  %v12695_v50 = vpop.permute.xlu1 %8303 }
 0x31c   :  { %v4888_v24 = vrot.slane %v3024_v33, %v11136_v22  ;;  %v12693_v30 = vmax.f32 %v12174_v31, %v12206_v49  ;;  %v7824_v3 = vcombine.low %v7815_v58, %v7822_v0  ;;  %v7840_v6 = vcombine.low %v4860_v12, %v4864_v52  ;;  %v12703_v49 = vpop.xlane.xlu0 %2967 }
 0x31d   :  { %8441 = vperm.xlu1 %8903, %v7790_v34   ;;  %v7841_v9 = vcombine.low %v4868_v4, %v4872_v36  ;;  %v7831_v41 = vrot.slane %v7823_v39, %v11186_v11  ;;  %v7842_v37 = vcombine.low %v4876_v62, %v4880_v56  ;;  %v4892_v18 = vrot.slane %v3025_v53, %v11114_v54 }
 0x31e   :  { %v7843_v43 = vcombine.low %v4884_v21, %v4888_v24  ;;  %v7838_v55 = vrot.slane %v7824_v3, %v11186_v11  ;;  %v7850_v33 = vrot.slane %v7840_v6, %v11186_v11  ;;  %v4896_v31 = vrot.slane %v3025_v53, %v11118_v17 }
 0x31f   :  { %v7857_v10 = vrot.slane %v7841_v9, %v11186_v11  ;;  %v7864_v12 = vrot.slane %v7842_v37, %v11186_v11  ;;  %v4900_v58 = vrot.slane %v3025_v53, %v11121_v26  ;;  %v4904_v52 = vrot.slane %v3025_v53, %v11124_v28  ;;  %v12711_v62 = vpop.permute.xlu1 %8306 }
 0x320   :  { %v7871_v42 = vrot.slane %v7843_v43, %v11186_v11  ;;  %v7839_v4 = vcombine.low %v7831_v41, %v7838_v55  ;;  %v4908_v0 = vrot.slane %v3025_v53, %v11127_v60  ;;  %v4912_v36 = vrot.slane %v3025_v53, %v11130_v38  ;;  %v12718_v37 = vpop.permute.xlu0 %8285 }
 0x321   :  { %v7872_v34 = vcombine.low %v7850_v33, %v7857_v10  ;;  %v4916_v56 = vrot.slane %v3025_v53, %v11133_v7  ;;  %v4920_v21 = vrot.slane %v3025_v53, %v11136_v22  ;;  %v7889_v24 = vcombine.low %v4892_v18, %v4896_v31 }
 0x322   :  { %v7873_v39 = vcombine.low %v7864_v12, %v7871_v42  ;;  %v3026_v3 = vmax.f32 %v12455_v40, %v12541_v29  ;;  %8444 = vperm.xlu0 %8904, %v7839_v4   ;;  %v7890_v9 = vcombine.low %v4900_v58, %v4904_v52  ;;  %v7891_v41 = vcombine.low %v4908_v0, %v4912_v36 }
 0x323   :  { %v7880_v6 = vrot.slane %v7872_v34, %v11186_v11  ;;  %v7892_v55 = vcombine.low %v4916_v56, %v4920_v21  ;;  %v7899_v33 = vrot.slane %v7889_v24, %v11186_v11  ;;  %v4444_v10 = vrot.slane %v12303_v2, %v11114_v54  ;;  %v12741_v36 = vpop.permute.xlu1 %8309 }
 0x324   :  { %v7887_v43 = vrot.slane %v7873_v39, %v11186_v11  ;;  %v7906_v53 = vrot.slane %v7890_v9, %v11186_v11  ;;  %v7913_v18 = vrot.slane %v7891_v41, %v11186_v11  ;;  %v4448_v40 = vrot.slane %v12303_v2, %v11118_v17 }
 0x325   :  { %v4452_v29 = vrot.slane %v12303_v2, %v11121_v26  ;;  %v7920_v12 = vrot.slane %v7892_v55, %v11186_v11  ;;  %v4456_v42 = vrot.slane %v12303_v2, %v11124_v28  ;;  %v4460_v58 = vrot.slane %v12303_v2, %v11127_v60  ;;  %v12746_v55 = vpop.permute.xlu0 %8312 }
 0x326   :  { %v7888_v31 = vcombine.low %v7880_v6, %v7887_v43  ;;  %v7921_v52 = vcombine.low %v7899_v33, %v7906_v53  ;;  %v4464_v4 = vrot.slane %v12303_v2, %v11130_v38  ;;  %v4468_v34 = vrot.slane %v12303_v2, %v11133_v7 }
 0x327   :  { %v4472_v0 = vrot.slane %v12303_v2, %v11136_v22  ;;  %v7922_v39 = vcombine.low %v7913_v18, %v7920_v12  ;;  %v7203_v56 = vcombine.low %v4444_v10, %v4448_v40  ;;  %v7204_v21 = vcombine.low %v4452_v29, %v4456_v42 }
 0x328   :  { %8447 = vperm.xlu1 %8903, %v7888_v31   ;;  %v4924_v24 = vrot.slane %v3026_v3, %v11114_v54  ;;  %v7929_v6 = vrot.slane %v7921_v52, %v11186_v11  ;;  %v7205_v9 = vcombine.low %v4460_v58, %v4464_v4  ;;  %v4928_v43 = vrot.slane %v3026_v3, %v11118_v17 }
 0x329   :  { %v7206_v41 = vcombine.low %v4468_v34, %v4472_v0  ;;  %v7936_v33 = vrot.slane %v7922_v39, %v11186_v11  ;;  %v7213_v2 = vrot.slane %v7203_v56, %v11186_v11  ;;  %v7220_v53 = vrot.slane %v7204_v21, %v11186_v11  ;;  %v12759_v56 = vpop.permute.xlu1 %8315 }
 0x32a   :  { %v4932_v18 = vrot.slane %v3026_v3, %v11121_v26  ;;  %v7227_v10 = vrot.slane %v7205_v9, %v11186_v11  ;;  %v4936_v29 = vrot.slane %v3026_v3, %v11124_v28  ;;  %v4940_v31 = vrot.slane %v3026_v3, %v11127_v60 }
 0x32b   :  { %v7234_v40 = vrot.slane %v7206_v41, %v11186_v11  ;;  %v7937_v12 = vcombine.low %v7929_v6, %v7936_v33  ;;  %v7235_v42 = vcombine.low %v7213_v2, %v7220_v53  ;;  %v4944_v58 = vrot.slane %v3026_v3, %v11130_v38 }
 0x32c   :  { %v4948_v52 = vrot.slane %v3026_v3, %v11133_v7  ;;  %v4952_v34 = vrot.slane %v3026_v3, %v11136_v22  ;;  %v7938_v0 = vcombine.low %v4924_v24, %v4928_v43  ;;  %v7939_v39 = vcombine.low %v4932_v18, %v4936_v29  ;;  %v12769_v24 = vpop.permute.xlu0 %8318 }
 0x32d   :  { %v7236_v4 = vcombine.low %v7227_v10, %v7234_v40  ;;  %v3027_v21 = vmax.f32 %v12472_v20, %v12571_v14  ;;  %8450 = vperm.xlu0 %8904, %v7937_v12   ;;  %v7243_v9 = vrot.slane %v7235_v42, %v11186_v11  ;;  %v7940_v41 = vcombine.low %v4940_v31, %v4944_v58 }
 0x32e   :  { %v4476_v6 = vrot.slane %v12333_v19, %v11114_v54  ;;  %v7941_v2 = vcombine.low %v4948_v52, %v4952_v34  ;;  %v7948_v53 = vrot.slane %v7938_v0, %v11186_v11  ;;  %v7955_v3 = vrot.slane %v7939_v39, %v11186_v11 }
 0x32f   :  { %v7250_v33 = vrot.slane %v7236_v4, %v11186_v11  ;;  %v7962_v43 = vrot.slane %v7940_v41, %v11186_v11  ;;  %v4480_v20 = vrot.slane %v12333_v19, %v11118_v17  ;;  %v4484_v14 = vrot.slane %v12333_v19, %v11121_v26 }
 0x330   :  { %v4488_v18 = vrot.slane %v12333_v19, %v11124_v28  ;;  %v7969_v40 = vrot.slane %v7941_v2, %v11186_v11  ;;  %v7970_v29 = vcombine.low %v7948_v53, %v7955_v3  ;;  %v4492_v31 = vrot.slane %v12333_v19, %v11127_v60 }
 0x331   :  { %v7251_v10 = vcombine.low %v7243_v9, %v7250_v33  ;;  %v4496_v12 = vrot.slane %v12333_v19, %v11130_v38  ;;  %v4500_v42 = vrot.slane %v12333_v19, %v11133_v7  ;;  %v4504_v58 = vrot.slane %v12333_v19, %v11136_v22  ;;  %v12789_v9 = vpop.permute.xlu1 %8321 }
 0x332   :  { %v7252_v52 = vcombine.low %v4476_v6, %v4480_v20  ;;  %v7971_v4 = vcombine.low %v7962_v43, %v7969_v40  ;;  %v7978_v34 = vrot.slane %v7970_v29, %v11186_v11  ;;  %v7253_v0 = vcombine.low %v4484_v14, %v4488_v18  ;;  %13886 = vst [vmem:[#allocation47_spill] sm:$0xff] %v12789_v9  ;;  %v12797_v20 = vpop.permute.xlu0 %8324 }
 0x333   :  { %8408 = vperm.xlu0 %8904, %v7251_v10   ;;  %v4956_v39 = vrot.slane %v3027_v21, %v11114_v54  ;;  %v7254_v41 = vcombine.low %v4492_v31, %v4496_v12  ;;  %v7255_v33 = vcombine.low %v4500_v42, %v4504_v58  ;;  %v4960_v53 = vrot.slane %v3027_v21, %v11118_v17 }
 0x334   :  { %v7262_v2 = vrot.slane %v7252_v52, %v11186_v11  ;;  %v7985_v3 = vrot.slane %v7971_v4, %v11186_v11  ;;  %v7269_v19 = vrot.slane %v7253_v0, %v11186_v11  ;;  %v4964_v6 = vrot.slane %v3027_v21, %v11121_v26 }
 0x335   :  { %v4968_v43 = vrot.slane %v3027_v21, %v11124_v28  ;;  %v7276_v14 = vrot.slane %v7254_v41, %v11186_v11  ;;  %v7283_v18 = vrot.slane %v7255_v33, %v11186_v11  ;;  %v4972_v10 = vrot.slane %v3027_v21, %v11127_v60 }
 0x336   :  { %v4976_v40 = vrot.slane %v3027_v21, %v11130_v38  ;;  %v7986_v29 = vcombine.low %v7978_v34, %v7985_v3  ;;  %v7284_v31 = vcombine.low %v7262_v2, %v7269_v19  ;;  %v4980_v12 = vrot.slane %v3027_v21, %v11133_v7  ;;  %v12814_v2 = vpop.permute.xlu1 %8327  ;;  %v12827_v19 = vpop.permute.xlu0 %8330 }
 0x337   :  { %v4984_v42 = vrot.slane %v3027_v21, %v11136_v22  ;;  %v7285_v58 = vcombine.low %v7276_v14, %v7283_v18  ;;  %v7987_v52 = vcombine.low %v4956_v39, %v4960_v53  ;;  %v7988_v4 = vcombine.low %v4964_v6, %v4968_v43  ;;  %13887 = vst [vmem:[#allocation48_spill] sm:$0xff] %v12814_v2 }
 0x338   :  { %v7989_v0 = vcombine.low %v4972_v10, %v4976_v40  ;;  %v12807_v9 = vmax.f32 %v12193_v16, %v12229_v25  ;;  %v12811_v41 = vmax.f32 %v12214_v15, %v12246_v35  ;;  %8453 = vperm.xlu1 %8903, %v7986_v29   ;;  %v7292_v34 = vrot.slane %v7284_v31, %v11186_v11 }
 0x339   :  { %v7990_v33 = vcombine.low %v4980_v12, %v4984_v42  ;;  %v7299_v21 = vrot.slane %v7285_v58, %v11186_v11  ;;  %v7997_v39 = vrot.slane %v7987_v52, %v11186_v11  ;;  %v8004_v53 = vrot.slane %v7988_v4, %v11186_v11 }
 0x33a   :  { %v8011_v3 = vrot.slane %v7989_v0, %v11186_v11  ;;  %v3028_v16 = vmax.f32 %v12495_v57, %v12595_v47  ;;  %v4508_v25 = vrot.slane %v12693_v30, %v11114_v54  ;;  %v4512_v35 = vrot.slane %v12693_v30, %v11118_v17  ;;  %v12848_v4 = vpop.permute.xlu1 %8333 }
 0x33b   :  { %v8018_v15 = vrot.slane %v7990_v33, %v11186_v11  ;;  %v7300_v6 = vcombine.low %v7292_v34, %v7299_v21  ;;  %v8019_v43 = vcombine.low %v7997_v39, %v8004_v53  ;;  %v4516_v14 = vrot.slane %v12693_v30, %v11121_v26 }
 0x33c   :  { %v4520_v18 = vrot.slane %v12693_v30, %v11124_v28  ;;  %v12835_v57 = vmax.f32 %v12237_v5, %v12271_v13  ;;  %v4524_v10 = vrot.slane %v12693_v30, %v11127_v60  ;;  %v4528_v40 = vrot.slane %v12693_v30, %v11130_v38 }
 0x33d   :  { %v8020_v47 = vcombine.low %v8011_v3, %v8018_v15  ;;  %8411 = vperm.xlu0 %8904, %v7300_v6   ;;  %v8027_v29 = vrot.slane %v8019_v43, %v11186_v11  ;;  %v4532_v31 = vrot.slane %v12693_v30, %v11133_v7  ;;  %v4536_v12 = vrot.slane %v12693_v30, %v11136_v22  ;;  %v12856_v15 = vpop.permute.xlu0 %8336 }
 0x33e   :  { %v7301_v42 = vcombine.low %v4508_v25, %v4512_v35  ;;  %v7302_v13 = vcombine.low %v4516_v14, %v4520_v18  ;;  %v7303_v58 = vcombine.low %v4524_v10, %v4528_v40  ;;  %v4988_v52 = vrot.slane %v3028_v16, %v11114_v54 }
 0x33f   :  { %v8034_v5 = vrot.slane %v8020_v47, %v11186_v11  ;;  %v7304_v0 = vcombine.low %v4532_v31, %v4536_v12  ;;  %v4992_v33 = vrot.slane %v3028_v16, %v11118_v17  ;;  %v4996_v21 = vrot.slane %v3028_v16, %v11121_v26 }
 0x340   :  { %v7311_v34 = vrot.slane %v7301_v42, %v11186_v11  ;;  %v7318_v53 = vrot.slane %v7302_v13, %v11186_v11  ;;  %v7325_v30 = vrot.slane %v7303_v58, %v11186_v11  ;;  %v5000_v3 = vrot.slane %v3028_v16, %v11124_v28 }
 0x341   :  { %v8035_v39 = vcombine.low %v8027_v29, %v8034_v5  ;;  %v7332_v25 = vrot.slane %v7304_v0, %v11186_v11  ;;  %v5004_v35 = vrot.slane %v3028_v16, %v11127_v60  ;;  %v5008_v6 = vrot.slane %v3028_v16, %v11130_v38  ;;  %v12872_v0 = vpop.permute.xlu1 %8339 }
 0x342   :  { %v5012_v43 = vrot.slane %v3028_v16, %v11133_v7  ;;  %v7333_v14 = vcombine.low %v7311_v34, %v7318_v53  ;;  %v5016_v18 = vrot.slane %v3028_v16, %v11136_v22  ;;  %v8036_v47 = vcombine.low %v4988_v52, %v4992_v33 }
 0x343   :  { %8456 = vperm.xlu1 %8903, %v8035_v39   ;;  %v8037_v10 = vcombine.low %v4996_v21, %v5000_v3  ;;  %v3029_v40 = vmax.f32 %v12514_v45, %v12624_v63  ;;  %v12867_v29 = vmax.f32 %v12529_v51, %v12655_v1  ;;  %v7334_v31 = vcombine.low %v7325_v30, %v7332_v25  ;;  %v12886_v39 = vpop.permute.xlu0 %8342 }
 0x344   :  { %v8038_v12 = vcombine.low %v5004_v35, %v5008_v6  ;;  %v7341_v42 = vrot.slane %v7333_v14, %v11186_v11  ;;  %v8039_v5 = vcombine.low %v5012_v43, %v5016_v18  ;;  %v8046_v13 = vrot.slane %v8036_v47, %v11186_v11 }
 0x345   :  { %v8053_v58 = vrot.slane %v8037_v10, %v11186_v11  ;;  %v13888_v16 = vlaneseq  ;;  %v7348_v45 = vrot.slane %v7334_v31, %v11186_v11  ;;  %v4540_v51 = vrot.slane %v12807_v9, %v11114_v54 }
 0x346   :  { %v8060_v63 = vrot.slane %v8038_v12, %v11186_v11  ;;  %v8067_v1 = vrot.slane %v8039_v5, %v11186_v11  ;;  %v4544_v33 = vrot.slane %v12807_v9, %v11118_v17  ;;  %v4548_v21 = vrot.slane %v12807_v9, %v11121_v26  ;;  %v12907_v5 = vpop.permute.xlu1 %8345 }
 0x347   :  { %v12875_v52 = vand.u32 127, %v13888_v16  ;;  %v8068_v34 = vcombine.low %v8046_v13, %v8053_v58  ;;  %v12890_v53 = vmax.f32 %v12550_v59, %v12677_v23  ;;  %v7349_v30 = vcombine.low %v7341_v42, %v7348_v45 }
 0x348   :  { %v4552_v3 = vrot.slane %v12807_v9, %v11124_v28  ;;  %v4556_v25 = vrot.slane %v12807_v9, %v11127_v60  ;;  %v8069_v35 = vcombine.low %v8060_v63, %v8067_v1  ;;  %v4560_v43 = vrot.slane %v12807_v9, %v11130_v38 }
 0x349   :  { %v8076_v6 = vrot.slane %v8068_v34, %v11186_v11  ;;  %v4564_v14 = vrot.slane %v12807_v9, %v11133_v7  ;;  %8414 = vperm.xlu0 %8904, %v7349_v30   ;;  %v4568_v59 = vrot.slane %v12807_v9, %v11136_v22  ;;  %v7350_v23 = vcombine.low %v4540_v51, %v4544_v33  ;;  %v12915_v33 = vpop.permute.xlu0 %8348 }
 0x34a   :  { %v7351_v18 = vcombine.low %v4548_v21, %v4552_v3  ;;  %v5020_v47 = vrot.slane %v3029_v40, %v11114_v54  ;;  %v8083_v10 = vrot.slane %v8069_v35, %v11186_v11  ;;  %v7352_v31 = vcombine.low %v4556_v25, %v4560_v43 }
 0x34b   :  { %v5024_v12 = vrot.slane %v3029_v40, %v11118_v17  ;;  %v5028_v42 = vrot.slane %v3029_v40, %v11121_v26  ;;  %v7353_v13 = vcombine.low %v4564_v14, %v4568_v59  ;;  %v7360_v58 = vrot.slane %v7350_v23, %v11186_v11  ;;  %v13889_v59 = vld [vmem:[#allocation58_spill] sm:$0xff] }
 0x34c   :  { %v7367_v45 = vrot.slane %v7351_v18, %v11186_v11  ;;  %v5032_v9 = vrot.slane %v3029_v40, %v11124_v28  ;;  %v8084_v63 = vcombine.low %v8076_v6, %v8083_v10  ;;  %v7374_v51 = vrot.slane %v7352_v31, %v11186_v11 }
 0x34d   :  { %v5036_v1 = vrot.slane %v3029_v40, %v11127_v60  ;;  %v5040_v34 = vrot.slane %v3029_v40, %v11130_v38  ;;  %v7381_v21 = vrot.slane %v7353_v13, %v11186_v11  ;;  %v5044_v3 = vrot.slane %v3029_v40, %v11133_v7 }
 0x34e   :  { %v7382_v30 = vcombine.low %v7360_v58, %v7367_v45  ;;  %v5048_v25 = vrot.slane %v3029_v40, %v11136_v22  ;;  %8459 = vperm.xlu1 %8903, %v8084_v63   ;;  %v8486_v35 = vadd.s32 4294967280, %v12875_v52  ;;  %v8085_v43 = vcombine.low %v5020_v47, %v5024_v12  ;;  %v12931_v47 = vpop.permute.xlu1 %8351 }
 0x34f   :  { %v8086_v6 = vcombine.low %v5028_v42, %v5032_v9  ;;  %v8087_v14 = vcombine.low %v5036_v1, %v5040_v34  ;;  %v12923_v23 = vsub.s32 %v12875_v52, %v13889_v59  ;;  %v7383_v18 = vcombine.low %v7374_v51, %v7381_v21 }
 0x350   :  { %v7390_v10 = vrot.slane %v7382_v30, %v11186_v11  ;;  %v8088_v31 = vcombine.low %v5044_v3, %v5048_v25  ;;  %v8095_v13 = vrot.slane %v8085_v43, %v11186_v11  ;;  %v4572_v45 = vrot.slane %v12811_v41, %v11114_v54  ;;  %v12946_v30 = vpop.permute.xlu0 %8354 }
 0x351   :  { %v8102_v58 = vrot.slane %v8086_v6, %v11186_v11  ;;  %v8109_v40 = vrot.slane %v8087_v14, %v11186_v11  ;;  %v7397_v12 = vrot.slane %v7383_v18, %v11186_v11  ;;  %v4576_v9 = vrot.slane %v12811_v41, %v11118_v17  ;;  %13890 = vst [vmem:[#allocation49_spill] sm:$0xff] %v12946_v30 }
 0x352   :  { %v8116_v42 = vrot.slane %v8088_v31, %v11186_v11  ;;  %v4580_v63 = vrot.slane %v12811_v41, %v11121_v26  ;;  %v12940_v51 = vsub.s32 %v8486_v35, %v13889_v59  ;;  %v4584_v34 = vrot.slane %v12811_v41, %v11124_v28 }
 0x353   :  { %v8117_v1 = vcombine.low %v8095_v13, %v8102_v58  ;;  %v4588_v21 = vrot.slane %v12811_v41, %v11127_v60  ;;  %v7398_v3 = vcombine.low %v7390_v10, %v7397_v12  ;;  %v4592_v43 = vrot.slane %v12811_v41, %v11130_v38 }
 0x354   :  { %v8118_v25 = vcombine.low %v8109_v40, %v8116_v42  ;;  %v4596_v6 = vrot.slane %v12811_v41, %v11133_v7  ;;  %v4600_v14 = vrot.slane %v12811_v41, %v11136_v22  ;;  %v7399_v18 = vcombine.low %v4572_v45, %v4576_v9  ;;  %v12964_v45 = vpop.permute.xlu1 %8357 }
 0x355   :  { %v8125_v35 = vrot.slane %v8117_v1, %v11186_v11  ;;  %v7400_v31 = vcombine.low %v4580_v63, %v4584_v34  ;;  %8417 = vperm.xlu0 %8904, %v7398_v3   ;;  %v7401_v58 = vcombine.low %v4588_v21, %v4592_v43  ;;  %v5052_v10 = vrot.slane %v12867_v29, %v11114_v54 }
 0x356   :  { %v8132_v13 = vrot.slane %v8118_v25, %v11186_v11  ;;  %v5056_v40 = vrot.slane %v12867_v29, %v11118_v17  ;;  %v7402_v12 = vcombine.low %v4596_v6, %v4600_v14  ;;  %v7409_v42 = vrot.slane %v7399_v18, %v11186_v11  ;;  %13891 = vst [vmem:[#allocation50_spill] sm:$0xff] %v12964_v45  ;;  %v12976_v14 = vpop.permute.xlu0 %8360 }
 0x357   :  { %v7416_v1 = vrot.slane %v7400_v31, %v11186_v11  ;;  %v5060_v41 = vrot.slane %v12867_v29, %v11121_v26  ;;  %v7423_v63 = vrot.slane %v7401_v58, %v11186_v11  ;;  %v5064_v34 = vrot.slane %v12867_v29, %v11124_v28  ;;  %13892 = vst [vmem:[#allocation51_spill] sm:$0xff] %v12976_v14 }
 0x358   :  { %v8133_v9 = vcombine.low %v8125_v35, %v8132_v13  ;;  %v5068_v21 = vrot.slane %v12867_v29, %v11127_v60  ;;  %v7430_v3 = vrot.slane %v7402_v12, %v11186_v11  ;;  %v5072_v43 = vrot.slane %v12867_v29, %v11130_v38 }
 0x359   :  { %v7431_v25 = vcombine.low %v7409_v42, %v7416_v1  ;;  %v5076_v6 = vrot.slane %v12867_v29, %v11133_v7  ;;  %v8493_v35 = vadd.s32 4294967272, %v12875_v52  ;;  %v5080_v18 = vrot.slane %v12867_v29, %v11136_v22 }
 0x35a   :  { %8462 = vperm.xlu1 %8903, %v8133_v9   ;;  %v8134_v31 = vcombine.low %v5052_v10, %v5056_v40  ;;  %v8135_v13 = vcombine.low %v5060_v41, %v5064_v34  ;;  %v7432_v58 = vcombine.low %v7423_v63, %v7430_v3  ;;  %v8136_v42 = vcombine.low %v5068_v21, %v5072_v43  ;;  %v12995_v41 = vpop.permute.xlu1 %8363  ;;  %v13009_v43 = vpop.permute.xlu0 %8366 }
 0x35b   :  { %v7439_v12 = vrot.slane %v7431_v25, %v11186_v11  ;;  %v8479_v1 = vadd.s32 4294967288, %v12875_v52  ;;  %v8478_v16 = vrot.slane %v12590_v44, %v12923_v23  ;;  %v8137_v2 = vcombine.low %v5076_v6, %v5080_v18  ;;  %13893 = vst [vmem:[#allocation52_spill] sm:$0xff] %v12995_v41  ;;  %13894 = vst [vmem:[#allocation53_spill] sm:$0xff] %v13009_v43 }
 0x35c   :  { %v8144_v45 = vrot.slane %v8134_v31, %v11186_v11  ;;  %v8151_v9 = vrot.slane %v8135_v13, %v11186_v11  ;;  %v12991_v29 = vmax.f32 %v12573_v32, %v12703_v49  ;;  %v7446_v10 = vrot.slane %v7432_v58, %v11186_v11 }
 0x35d   :  { %v8158_v40 = vrot.slane %v8136_v42, %v11186_v11  ;;  %v12998_v44 = vsub.s32 %v8493_v35, %v13889_v59  ;;  %v8165_v63 = vrot.slane %v8137_v2, %v11186_v11  ;;  %v13002_v21 = vsub.s32 %v8479_v1, %v13889_v59 }
 0x35e   :  { %v8166_v34 = vcombine.low %v8144_v45, %v8151_v9  ;;  %v7447_v3 = vcombine.low %v7439_v12, %v7446_v10  ;;  %v8500_v25 = vadd.s32 4294967264, %v12875_v52  ;;  %v4604_v32 = vrot.slane %v12835_v57, %v11114_v54 }
 0x35f   :  { %v4608_v49 = vrot.slane %v12835_v57, %v11118_v17  ;;  %v8167_v6 = vcombine.low %v8158_v40, %v8165_v63  ;;  %v4612_v2 = vrot.slane %v12835_v57, %v11121_v26  ;;  %v4616_v45 = vrot.slane %v12835_v57, %v11124_v28 }
 0x360   :  { %v8174_v35 = vrot.slane %v8166_v34, %v11186_v11  ;;  %8420 = vperm.xlu0 %8904, %v7447_v3   ;;  %v4620_v18 = vrot.slane %v12835_v57, %v11127_v60  ;;  %v4624_v31 = vrot.slane %v12835_v57, %v11130_v38  ;;  %v4628_v13 = vrot.slane %v12835_v57, %v11133_v7  ;;  %v13031_v34 = vpop.permute.xlu1 %8369 }
 0x361   :  { %v8181_v58 = vrot.slane %v8167_v6, %v11186_v11  ;;  %v8483_v12 = vrot.slane %v12718_v37, %v13002_v21  ;;  %v4632_v42 = vrot.slane %v12835_v57, %v11136_v22  ;;  %v7448_v1 = vcombine.low %v4604_v32, %v4608_v49  ;;  %13895 = vst [vmem:[#allocation54_spill] sm:$0xff] %v13031_v34 }
 0x362   :  { %v7449_v9 = vcombine.low %v4612_v2, %v4616_v45  ;;  %v7450_v10 = vcombine.low %v4620_v18, %v4624_v31  ;;  %v5084_v40 = vrot.slane %v12890_v53, %v11114_v54  ;;  %v5088_v63 = vrot.slane %v12890_v53, %v11118_v17  ;;  %v13042_v45 = vpop.permute.xlu0 %8372 }
 0x363   :  { %v8182_v3 = vcombine.low %v8174_v35, %v8181_v58  ;;  %v7451_v14 = vcombine.low %v4628_v13, %v4632_v42  ;;  %v7458_v6 = vrot.slane %v7448_v1, %v11186_v11  ;;  %v5092_v37 = vrot.slane %v12890_v53, %v11121_v26  ;;  %13896 = vst [vmem:[#allocation55_spill] sm:$0xff] %v13042_v45 }
 0x364   :  { %v7465_v57 = vrot.slane %v7449_v9, %v11186_v11  ;;  %v7472_v32 = vrot.slane %v7450_v10, %v11186_v11  ;;  %v5096_v49 = vrot.slane %v12890_v53, %v11124_v28  ;;  %v5100_v2 = vrot.slane %v12890_v53, %v11127_v60  ;;  %v13058_v30 = vpop.permute.xlu1 %8375 }
 0x365   :  { %8465 = vperm.xlu1 %8903, %v8182_v3   ;;  %v7479_v35 = vrot.slane %v7451_v14, %v11186_v11  ;;  %v5104_v18 = vrot.slane %v12890_v53, %v11130_v38  ;;  %v5108_v31 = vrot.slane %v12890_v53, %v11133_v7  ;;  %v5112_v13 = vrot.slane %v12890_v53, %v11136_v22 }
 0x366   :  { %v7480_v58 = vcombine.low %v7458_v6, %v7465_v57  ;;  %v8183_v42 = vcombine.low %v5084_v40, %v5088_v63  ;;  %v8184_v1 = vcombine.low %v5092_v37, %v5096_v49  ;;  %v8485_v9 = vsel %vm8484_vm1, %v8483_v12, %v8478_v16  ;;  %v13070_v57 = vpop.permute.xlu0 %8378 }
 0x367   :  { %v7481_v10 = vcombine.low %v7472_v32, %v7479_v35  ;;  %v8185_v34 = vcombine.low %v5100_v2, %v5104_v18  ;;  %v8186_v3 = vcombine.low %v5108_v31, %v5112_v13  ;;  %v13053_v14 = vsub.s32 %v8500_v25, %v13889_v59 }
 0x368   :  { %v7488_v41 = vrot.slane %v7480_v58, %v11186_v11  ;;  %v8193_v45 = vrot.slane %v8183_v42, %v11186_v11  ;;  %v8200_v43 = vrot.slane %v8184_v1, %v11186_v11  ;;  %v8497_v12 = vrot.slane %v12626_v61, %v12998_v44  ;;  %v13094_v31 = vpop.permute.xlu1 %8381 }
 0x369   :  { %v7495_v53 = vrot.slane %v7481_v10, %v11186_v11  ;;  %v8207_v40 = vrot.slane %v8185_v34, %v11186_v11  ;;  %v8214_v16 = vrot.slane %v8186_v3, %v11186_v11  ;;  %v13897_v25 = vrot.slane %v12605_v8, %v12940_v51 }
 0x36a   :  { %v8215_v6 = vcombine.low %v8193_v45, %v8200_v43  ;;  %v8507_v37 = vadd.s32 4294967256, %v12875_v52  ;;  %v5116_v34 = vrot.slane %v12991_v29, %v11114_v54  ;;  %v8504_v2 = vrot.slane %v12649_v27, %v13053_v14 }
 0x36b   :  { %v8492_v63 = vsel %vm8491_vm2, %v13897_v25, %v8485_v9  ;;  %v7496_v32 = vcombine.low %v7488_v41, %v7495_v53  ;;  %v8216_v49 = vcombine.low %v8207_v40, %v8214_v16  ;;  %v5120_v8 = vrot.slane %v12991_v29, %v11118_v17  ;;  %v13100_v9 = vpop.permute.xlu0 %8384 }
 0x36c   :  { %v8223_v61 = vrot.slane %v8215_v6, %v11186_v11  ;;  %v5124_v41 = vrot.slane %v12991_v29, %v11121_v26  ;;  %v5128_v45 = vrot.slane %v12991_v29, %v11124_v28  ;;  %v5132_v54 = vrot.slane %v12991_v29, %v11127_v60 }
 0x36d   :  { %8423 = vperm.xlu0 %8904, %v7496_v32   ;;  %v8230_v43 = vrot.slane %v8216_v49, %v11186_v11  ;;  %v13087_v27 = vsub.s32 %v8507_v37, %v13889_v59  ;;  %v8499_v35 = vsel %vm8498_vm3, %v8497_v12, %v8492_v63  ;;  %v5136_v17 = vrot.slane %v12991_v29, %v11130_v38  ;;  %v13119_v32 = vpop.permute.xlu1 %8387 }
 0x36e   :  { %v5140_v18 = vrot.slane %v12991_v29, %v11133_v7  ;;  %v5144_v28 = vrot.slane %v12991_v29, %v11136_v22  ;;  %v8232_v13 = vcombine.low %v5116_v34, %v5120_v8  ;;  %v8233_v58 = vcombine.low %v5124_v41, %v5128_v45 }
 0x36f   :  { %v8231_v26 = vcombine.low %v8223_v61, %v8230_v43  ;;  %v8542_v60 = vadd.s32 4294967216, %v12875_v52  ;;  %v8234_v42 = vcombine.low %v5132_v54, %v5136_v17  ;;  %v8514_v1 = vadd.s32 4294967248, %v12875_v52  ;;  %v13132_v41 = vpop.permute.xlu0 %8390 }
 0x370   :  { %v8235_v38 = vcombine.low %v5140_v18, %v5144_v28  ;;  %v8242_v7 = vrot.slane %v8232_v13, %v11186_v11  ;;  %v8249_v10 = vrot.slane %v8233_v58, %v11186_v11  ;;  %v8521_v3 = vadd.s32 4294967240, %v12875_v52 }
 0x371   :  { %8468 = vperm.xlu1 %8903, %v8231_v26   ;;  %v8506_v22 = vsel %vm8505_vm4, %v8504_v2, %v8499_v35  ;;  %v8511_v29 = vrot.slane %v12665_v46, %v13087_v27  ;;  %v8256_v53 = vrot.slane %v8234_v42, %v11186_v11  ;;  %v13110_v40 = vsub.s32 %v8514_v1, %v13889_v59 }
 0x372   :  { %v8263_v16 = vrot.slane %v8235_v38, %v11186_v11  ;;  %v8264_v12 = vcombine.low %v8242_v7, %v8249_v10  ;;  %v8556_v25 = vadd.s32 4294967200, %v12875_v52  ;;  %v13115_v63 = vsub.s32 %v8521_v3, %v13889_v59 }
 0x373   :  { %v8570_v6 = vadd.s32 4294967184, %v12875_v52  ;;  %v8528_v37 = vadd.s32 4294967232, %v12875_v52  ;;  %v13122_v46 = vsub.s32 %v8542_v60, %v13889_v59  ;;  %v8513_v2 = vsel %vm8512_vm5, %v8511_v29, %v8506_v22  ;;  %v13171_v22 = vpop.permute.xlu0 %8396 }
 0x374   :  { %v8265_v49 = vcombine.low %v8256_v53, %v8263_v16  ;;  %v8272_v34 = vrot.slane %v8264_v12, %v11186_v11  ;;  %v8518_v61 = vrot.slane %v12679_v48, %v13110_v40  ;;  %v8535_v43 = vadd.s32 4294967224, %v12875_v52 }
 0x375   :  { %v13129_v8 = vsub.s32 %v8528_v37, %v13889_v59  ;;  %v13136_v54 = vsub.s32 %v8556_v25, %v13889_v59  ;;  %v8525_v35 = vrot.slane %v12695_v50, %v13115_v63  ;;  %v13141_v17 = vsub.s32 %v8570_v6, %v13889_v59 }
 0x376   :  { %v8279_v45 = vrot.slane %v8265_v49, %v11186_v11  ;;  %v13146_v18 = vsub.s32 %v8535_v43, %v13889_v59  ;;  %v8546_v26 = vrot.slane %v12746_v55, %v13122_v46  ;;  %v8549_v13 = vadd.s32 4294967208, %v12875_v52  ;;  %v13155_v42 = vpop.permute.xlu1 %8393  ;;  %v13900_v43 = vld [vmem:[#allocation51_spill] sm:$0xff] }
 0x377   :  { %v8532_v48 = vrot.slane %v12711_v62, %v13129_v8  ;;  %v8520_v58 = vsel %vm8519_vm6, %v8518_v61, %v8513_v2  ;;  %v8563_v60 = vadd.s32 4294967192, %v12875_v52  ;;  %v8560_v62 = vrot.slane %v12769_v24, %v13136_v54  ;;  %v8403_v61 = vpop.permute.xlu0 %8402 }
 0x378   :  { %v8280_v28 = vcombine.low %v8272_v34, %v8279_v45  ;;  %v8539_v50 = vrot.slane %v12741_v36, %v13146_v18  ;;  %v8527_v55 = vsel %vm8526_vm7, %v8525_v35, %v8520_v58  ;;  %v8587_v1 = vrot.slane %v12827_v19, %v12923_v23  ;;  %v13901_v35 = vld [vmem:[#allocation53_spill] sm:$0xff]  ;;  %v13903_v58 = vld [vmem:[#allocation48_spill] sm:$0xff] }
 0x379   :  { %v13163_v38 = vsub.s32 %v8549_v13, %v13889_v59  ;;  %v8574_v7 = vrot.slane %v12797_v20, %v13141_v17  ;;  %v8534_v36 = vsel %vm8533_vm8, %v8532_v48, %v8527_v55  ;;  %v8596_v10 = vrot.slane %v12856_v15, %v12940_v51 }
 0x37a   :  { %8471 = vperm.xlu1 %8903, %v8280_v28   ;;  %v8577_v3 = vadd.s32 4294967176, %v12875_v52  ;;  %v8541_v24 = vsel %vm8540_vm9, %v8539_v50, %v8534_v36  ;;  %v8591_v29 = vrot.slane %v12848_v4, %v13002_v21  ;;  %v8606_v53 = vrot.slane %v12886_v39, %v13053_v14 }
 0x37b   :  { %v8553_v19 = vrot.slane %v12759_v56, %v13163_v38  ;;  %v13181_v16 = vsub.s32 %v8563_v60, %v13889_v59  ;;  %v8601_v15 = vrot.slane %v12872_v0, %v12998_v44  ;;  %v8611_v56 = vrot.slane %v12907_v5, %v13087_v27  ;;  %v8400_v6 = vpop.permute.xlu1 %8399  ;;  %v13898_v5 = vld [vmem:[#allocation47_spill] sm:$0xff] }
 0x37c   :  { %v8592_v52 = vsel %vm8484_vm1, %v8591_v29, %v8587_v1  ;;  %v8548_v12 = vsel %vm8547_vm10, %v8546_v26, %v8541_v24  ;;  %v8616_v4 = vrot.slane %v12915_v33, %v13110_v40  ;;  %v13192_v39 = vsub.s32 %v8577_v3, %v13889_v59  ;;  %v13899_v33 = vld [vmem:[#allocation49_spill] sm:$0xff]  ;;  %v13904_v60 = vld [vmem:[#allocation55_spill] sm:$0xff]  ;;  %v13905_v3 = vld [vmem:[#allocation52_spill] sm:$0xff] }
 0x37d   :  { %v8597_v25 = vsel %vm8491_vm2, %v8596_v10, %v8592_v52  ;;  %v8555_v0 = vsel %vm8554_vm11, %v8553_v19, %v8548_v12  ;;  %v8621_v49 = vrot.slane %v12931_v47, %v13115_v63  ;;  %v8567_v34 = vrot.slane %v13898_v5, %v13181_v16  ;;  %v13902_v47 = vld [vmem:[#allocation50_spill] sm:$0xff]  ;;  %v8427_v52 = vpop.permute.xlu0 %8426  ;;  %v8859_v12 = vld [vmem:[#allocation5] sm:$0x3] }
 0x37e   :  { %v8602_v37 = vsel %vm8498_vm3, %v8601_v15, %v8597_v25  ;;  %v8626_v2 = vrot.slane %v13899_v33, %v13129_v8  ;;  %v8636_v45 = vrot.slane %v13900_v43, %v13122_v46  ;;  %v8646_v48 = vrot.slane %v13901_v35, %v13136_v54  ;;  %v13906_v25 = vld [vmem:[#allocation54_spill] sm:$0xff] }
 0x37f   :  { %v8607_v59 = vsel %vm8505_vm4, %v8606_v53, %v8602_v37  ;;  %v8631_v28 = vrot.slane %v13902_v47, %v13146_v18  ;;  %v8562_v13 = vsel %vm8561_vm12, %v8560_v62, %v8555_v0  ;;  %v8581_v50 = vrot.slane %v13903_v58, %v13192_v39 }
 0x380   :  { %v8612_v26 = vsel %vm8512_vm5, %v8611_v56, %v8607_v59  ;;  %v8656_v55 = vrot.slane %v13904_v60, %v13141_v17  ;;  %v8666_v10 = vrot.slane %v13070_v57, %v12923_v23  ;;  %v8641_v24 = vrot.slane %v13905_v3, %v13163_v38  ;;  %v8860_v57 = vld [vmem:[#allocation5 + $0x2] sm:$0x3] }
 0x381   :  { %v8617_v1 = vsel %vm8519_vm6, %v8616_v4, %v8612_v26  ;;  %v8670_v19 = vrot.slane %v13094_v31, %v13002_v21  ;;  %v8569_v62 = vsel %vm8568_vm13, %v8567_v34, %v8562_v13  ;;  %v8675_v53 = vrot.slane %v13100_v9, %v12940_v51  ;;  %v8433_v35 = vpop.permute.xlu0 %8432 }
 0x382   :  { %v8622_v36 = vsel %vm8526_vm7, %v8621_v49, %v8617_v1  ;;  %v8680_v15 = vrot.slane %v13119_v32, %v12998_v44  ;;  %v8651_v0 = vrot.slane %v13906_v25, %v13181_v16  ;;  %v8690_v37 = vrot.slane %v13155_v42, %v13087_v27 }
 0x383   :  { %v8627_v29 = vsel %vm8533_vm8, %v8626_v2, %v8622_v36  ;;  %v8671_v31 = vsel %vm8484_vm1, %v8670_v19, %v8666_v10  ;;  %v8685_v9 = vrot.slane %v13132_v41, %v13053_v14  ;;  %v13907_v5 = vlaneseq }
 0x384   :  { %v8632_v4 = vsel %vm8540_vm9, %v8631_v28, %v8627_v29  ;;  %v8676_v32 = vsel %vm8491_vm2, %v8675_v53, %v8671_v31  ;;  %v8661_v33 = vrot.slane %v13058_v30, %v13192_v39  ;;  %v8700_v59 = vrot.slane %v8400_v6, %v13115_v63 }
 0x385   :  { %v8637_v49 = vsel %vm8547_vm10, %v8636_v45, %v8632_v4  ;;  %vm8861_vm0 = vcmp.lt.s32.totalorder %v13907_v5, 192  ;;  %v8681_v2 = vsel %vm8498_vm3, %v8680_v15, %v8676_v32  ;;  %v8576_v41 = vsel %vm8575_vm14, %v8574_v7, %v8569_v62 }
 0x386   :  { %v8406_v56 = vpop.permute.xlu1 %8405  ;;  %v8642_v34 = vsel %vm8554_vm11, %v8641_v24, %v8637_v49  ;;  %8863 = vst.msk [vmem:[#allocation7 + $0x2] sm:$0x3] %vm8861_vm0, %v8859_v12  ;;  %8864 = vst.msk [vmem:[#allocation7 + $0x6] sm:$0x3] %vm8861_vm0, %v8860_v57  ;;  %v8695_v43 = vrot.slane %v13171_v22, %v13110_v40  ;;  %v8686_v45 = vsel %vm8505_vm4, %v8685_v9, %v8681_v2  ;;  %vm13272_vm0 = vcmp.lt.s32.totalorder %v13907_v5, 256 }
 0x387   :  { %v8647_v42 = vsel %vm8561_vm12, %v8646_v48, %v8642_v34  ;;  %v8705_v26 = vrot.slane %v8403_v61, %v13129_v8  ;;  %v8691_v6 = vsel %vm8512_vm5, %v8690_v37, %v8686_v45  ;;  %v8710_v47 = vrot.slane %v8406_v56, %v13146_v18 }
 0x388   :  { %v8652_v30 = vsel %vm8568_vm13, %v8651_v0, %v8647_v42  ;;  %v8745_v7 = vrot.slane %v8427_v52, %v12923_v23  ;;  %v8696_v48 = vsel %vm8519_vm6, %v8695_v43, %v8691_v6  ;;  %v8583_v13 = vsel %vm8582_vm15, %v8581_v50, %v8576_v41 }
 0x389   :  { %v8657_v20 = vsel %vm8575_vm14, %v8656_v55, %v8652_v30  ;;  %v8701_v60 = vsel %vm8526_vm7, %v8700_v59, %v8696_v48  ;;  %v8754_v61 = vrot.slane %v8433_v35, %v12940_v51 }
 0x38a   :  { %v8662_v58 = vsel %vm8582_vm15, %v8661_v33, %v8657_v20  ;;  %v8706_v36 = vsel %vm8533_vm8, %v8705_v26, %v8701_v60 }
 0x38b   :  { %v8430_v28 = vpop.permute.xlu1 %8429  ;;  %v8821_v1 = vcombine.low %v8583_v13, %v8662_v58  ;;  %v8711_v55 = vsel %vm8540_vm9, %v8710_v47, %v8706_v36 }
 0x38c   :  { %v8749_v22 = vrot.slane %v8430_v28, %v13002_v21 }
 0x38d   :  { %v8828_v3 = vrot.slane %v8821_v1, %v11186_v11 }
 0x38e   :  { %v8750_v10 = vsel %vm8484_vm1, %v8749_v22, %v8745_v7 }
 0x38f   :  { %v8755_v23 = vsel %vm8491_vm2, %v8754_v61, %v8750_v10  ;;  %v8835_v50 = vrot.slane %v8828_v3, %v11186_v11 }
 0x391   :  { %8857 = vst.msk [vmem:[#allocation7] sm:$0x3] %vm13272_vm0, %v8835_v50  ;;  %v8439_v51 = vpop.permute.xlu0 %8438 }
 0x392   :  { %v8764_v62 = vrot.slane %v8439_v51, %v13053_v14 }
 0x396   :  { %v8436_v24 = vpop.permute.xlu1 %8435 }
 0x397   :  { %v8759_v19 = vrot.slane %v8436_v24, %v12998_v44 }
 0x399   :  { %v8760_v29 = vsel %vm8498_vm3, %v8759_v19, %v8755_v23 }
 0x39a   :  { %v8765_v53 = vsel %vm8505_vm4, %v8764_v62, %v8760_v29 }
 0x39c   :  { %v8442_v15 = vpop.permute.xlu1 %8441 }
 0x39d   :  { %v8769_v52 = vrot.slane %v8442_v15, %v13087_v27 }
 0x39f   :  { %v8770_v56 = vsel %vm8512_vm5, %v8769_v52, %v8765_v53 }
 0x3a1   :  { %v8445_v12 = vpop.permute.xlu0 %8444 }
 0x3a2   :  { %v8774_v57 = vrot.slane %v8445_v12, %v13110_v40 }
 0x3a4   :  { %v8775_v4 = vsel %vm8519_vm6, %v8774_v57, %v8770_v56 }
 0x3a7   :  { %v8448_v25 = vpop.permute.xlu1 %8447 }
 0x3a8   :  { %v8779_v0 = vrot.slane %v8448_v25, %v13115_v63 }
 0x3aa   :  { %v8780_v44 = vsel %vm8526_vm7, %v8779_v0, %v8775_v4 }
 0x3ac   :  { %v8451_v14 = vpop.permute.xlu0 %8450 }
 0x3ad   :  { %v8784_v31 = vrot.slane %v8451_v14, %v13129_v8 }
 0x3af   :  { %v8785_v37 = vsel %vm8533_vm8, %v8784_v31, %v8780_v44 }
 0x3b2   :  { %v8409_v32 = vpop.permute.xlu0 %8408 }
 0x3b3   :  { %v8715_v42 = vrot.slane %v8409_v32, %v13122_v46 }
 0x3b5   :  { %v8716_v28 = vsel %vm8547_vm10, %v8715_v42, %v8711_v55 }
 0x3b7   :  { %v8454_v49 = vpop.permute.xlu1 %8453 }
 0x3b8   :  { %v8789_v27 = vrot.slane %v8454_v49, %v13146_v18 }
 0x3ba   :  { %v8790_v9 = vsel %vm8540_vm9, %v8789_v27, %v8785_v37 }
 0x3bc   :  { %v8412_v40 = vpop.permute.xlu0 %8411 }
 0x3bd   :  { %v8720_v45 = vrot.slane %v8412_v40, %v13163_v38 }
 0x3bf   :  { %v8721_v48 = vsel %vm8554_vm11, %v8720_v45, %v8716_v28 }
 0x3c2   :  { %v8457_v5 = vpop.permute.xlu1 %8456 }
 0x3c3   :  { %v8794_v8 = vrot.slane %v8457_v5, %v13122_v46 }
 0x3c5   :  { %v8795_v20 = vsel %vm8547_vm10, %v8794_v8, %v8790_v9 }
 0x3c8   :  { %v8415_v33 = vpop.permute.xlu0 %8414 }
 0x3c9   :  { %v8725_v35 = vrot.slane %v8415_v33, %v13136_v54 }
 0x3cd   :  { %v8460_v34 = vpop.permute.xlu1 %8459 }
 0x3ce   :  { %v8799_v18 = vrot.slane %v8460_v34, %v13163_v38 }
 0x3d0   :  { %v8800_v38 = vsel %vm8554_vm11, %v8799_v18, %v8795_v20 }
 0x3d4   :  { %v8418_v59 = vpop.permute.xlu0 %8417 }
 0x3d5   :  { %v8730_v6 = vrot.slane %v8418_v59, %v13181_v16 }
 0x3d9   :  { %v8463_v2 = vpop.permute.xlu1 %8462 }
 0x3da   :  { %v8804_v30 = vrot.slane %v8463_v2, %v13136_v54  ;;  %v8726_v54 = vsel %vm8561_vm12, %v8725_v35, %v8721_v48 }
 0x3dc   :  { %v8805_v13 = vsel %vm8561_vm12, %v8804_v30, %v8800_v38 }
 0x3df   :  { %v8421_v41 = vpop.permute.xlu0 %8420 }
 0x3e0   :  { %v8735_v46 = vrot.slane %v8421_v41, %v13141_v17 }
 0x3e4   :  { %v8466_v63 = vpop.permute.xlu1 %8465 }
 0x3e5   :  { %v8809_v47 = vrot.slane %v8466_v63, %v13181_v16  ;;  %v8731_v16 = vsel %vm8568_vm13, %v8730_v6, %v8726_v54 }
 0x3e6   :  { %v8736_v1 = vsel %vm8575_vm14, %v8735_v46, %v8731_v16 }
 0x3e7   :  { %v8810_v60 = vsel %vm8568_vm13, %v8809_v47, %v8805_v13 }
 0x3ec   :  { %v8424_v26 = vpop.permute.xlu0 %8423 }
 0x3ed   :  { %v8740_v22 = vrot.slane %v8424_v26, %v13192_v39 }
 0x3ef   :  { %v8741_v36 = vsel %vm8582_vm15, %v8740_v22, %v8736_v1 }
 0x3f0   :  { %v8469_v43 = vpop.permute.xlu1 %8468 }
 0x3f1   :  { %v8814_v7 = vrot.slane %v8469_v43, %v13141_v17 }
 0x3f3   :  { %v8815_v17 = vsel %vm8575_vm14, %v8814_v7, %v8810_v60 }
 0x3f9   :  { %v8472_v58 = vpop.permute.xlu1 %8471 }
 0x3fa   :  { %v8819_v61 = vrot.slane %v8472_v58, %v13192_v39 }
 0x3fc   :  { %v8820_v10 = vsel %vm8582_vm15, %v8819_v61, %v8815_v17 }
 0x3fd   :  { %v8836_v55 = vcombine.low %v8741_v36, %v8820_v10 }
 0x3ff   :  { %v8843_v23 = vrot.slane %v8836_v55, %v11186_v11 }
 0x401   :  { %v8850_v3 = vrot.slane %v8843_v23, %v11186_v11 }
 0x403   :  { %8858 = vst.msk [vmem:[#allocation7 + $0x4] sm:$0x3] %vm13272_vm0, %v8850_v3 }
 0x404   :  { %8960 = shalt.err (!%p8957_p6)
}
 0x405   :  { %s8961_s19 = scalar_lea.hbm %s13335_s2, 128 }
 0x406   :  { %p8962_p7 = scmp.ne.s32.totalorder %s13335_s2, %s8961_s19  ;;  %p8965_p8 = scmp.lt.u32.totalorder %s8961_s19, %s13335_s2 }
 0x408   :  { %p8967_p9 = pnand %p8965_p8, %p8962_p7 }
 0x40a   :  { %8970 = shalt.err (!%p8967_p9)
}
 0x40b   :  { %s8995_s24 = smov 64   ;;  %s8996_s25 = smov 4  }
 0x40c   :  { %8876 = dma.vmem_to_hbm [thread:$0]  %s8871_s15, 128, %s13335_s2, [#allocation4], %s8995_s24, %s8995_s24, %s8996_s25  }
 0x40d   :  { %8975 = dma.done.wait [#allocation4], 128  }
 0x40e   :  { %8976 = vsyncadd [#allocation4], 4294967168 }
 0x40f   :  { %8880 = vsyncpa [#allocation3], 1 }
 0x410   :  { %8881 = vsyncpa [#allocation6], 1 }
 0x411   :  { %8882 = vsyncpa [#allocation4], 1 }

</bundles_post_ra>
